<compile_context>
chip_gen: v6e
topology: v6e:2x2x1
jax: 0.10.0
libtpu: 0.0.40
codegen_flags: <defaults>
</compile_context>

<pallas_src>
import functools

import jax
import jax.numpy as jnp
from jax.experimental import pallas as pl
from jax.experimental.pallas import tpu as pltpu


def _round_up(x, m):
    return (x + m - 1) // m * m


def _cdiv(a, b):
    return -(-a // b)


# ----------------------------------------------------------------------------
# Fused decoder kernel: all GRU layers + 1x1-conv means head, one time chunk
# per grid step.  Per-layer hidden states live in VMEM scratch across chunks;
# inter-layer activations stay in a VMEM buffer (no HBM round trips).
# ----------------------------------------------------------------------------
def _vae_decoder_kernel(x_ref, len_ref, *args, n_layers, chunk, batch, hidden,
                        compute_dtype):
    n_w = 4 * n_layers
    w_refs = args[:n_w]                                  # per layer: wih, whh, bias, bhn
    wm_ref, bm_ref, out_ref = args[n_w:n_w + 3]
    h_refs = args[n_w + 3:n_w + 3 + n_layers]            # per-layer hidden (Bp, Hp) f32
    gi_ref, act_ref = args[n_w + 3 + n_layers:]
    Hp = hidden

    c = pl.program_id(0)

    @pl.when(c == 0)
    def _():
        for h_ref in h_refs:
            h_ref[...] = jnp.zeros(h_ref.shape, h_ref.dtype)

    lens = len_ref[...]                                  # (Bp, 1) int32
    t0 = c * chunk                                       # global time offset of this chunk

    for l in range(n_layers):
        wih = w_refs[4 * l][...]                         # (K_l, 3Hp)  compute dtype
        whh = w_refs[4 * l + 1][...]                     # (Hp, 3Hp)   compute dtype
        bias = w_refs[4 * l + 2][...]                    # (1, 3Hp)    f32 (r/z hidden bias folded)
        # Hoisted out of the time loop (JAX does not CSE broadcast_in_dim).
        bhn = jnp.broadcast_to(w_refs[4 * l + 3][...], (batch, Hp))   # (Bp, Hp) f32

        # (1) Chunk-wide input->hidden projection: one MXU matmul per layer.
        src = x_ref[...] if l == 0 else act_ref[...].astype(compute_dtype)
        gi_ref[...] = jnp.dot(src, wih, preferred_element_type=jnp.float32) + bias

        # (2) Recurrence: one (Bp,Hp)@(Hp,3Hp) matmul + elementwise per step.
        def step(t, h, whh=whh, bhn=bhn):
            row = pl.multiple_of(t * batch, 8)           # sublane-aligned row block
            gi_t = gi_ref[pl.ds(row, batch), :]          # (Bp, 3Hp) f32, lane-aligned slices
            gh = jnp.dot(h.astype(compute_dtype), whh,
                         preferred_element_type=jnp.float32)
            r = jax.nn.sigmoid(gi_t[:, :Hp] + gh[:, :Hp])
            z = jax.nn.sigmoid(gi_t[:, Hp:2 * Hp] + gh[:, Hp:2 * Hp])
            n = jnp.tanh(gi_t[:, 2 * Hp:] + r * (gh[:, 2 * Hp:] + bhn))
            h_new = (1.0 - z) * n + z * h
            # pack_padded/pad_packed semantics: outputs past length[b] are zero.
            act_ref[pl.ds(row, batch), :] = jnp.where(t0 + t < lens, h_new, 0.0)
            return h_new

        # TODO(synk): if the per-step dot saturates the MXU push slot, switch to
        # pltpu.matmul_push_rhs (push W_hh once per chunk) + matmul_acc_lhs/pop.
        h_refs[l][...] = jax.lax.fori_loop(0, chunk, step, h_refs[l][...],
                                           unroll=min(chunk, 8))

    # (3) Fused 1x1-conv "means" head on the masked last-layer chunk output
    #     (lane-dense Cp output -> unmasked writeback).
    out_ref[...] = (jnp.dot(act_ref[...].astype(compute_dtype), wm_ref[...],
                            preferred_element_type=jnp.float32)
                    + bm_ref[...]).astype(out_ref.dtype)


# ----------------------------------------------------------------------------
# VMEM budgeting and time-chunk selection
# ----------------------------------------------------------------------------
def _vmem_capacity_bytes():
    try:
        info = pltpu.get_tpu_info()
        for name in ("vmem_capacity_bytes", "vmem_size_bytes", "vmem_bytes"):
            v = getattr(info, name, None)
            if v:
                return int(v)
    except Exception:
        pass
    return 64 * 1024 * 1024          # conservative (v7x-sized) fallback


def _pick_time_chunk(T, Bp, in0p, Hp, Cp, k_sizes, act_bytes, budget):
    """Largest time chunk whose chunk buffers fit an explicit VMEM byte budget."""
    n_layers = len(k_sizes)
    # Resident weights: counted at 2x (default BlockSpec pipelining
    # double-buffers even grid-invariant operands).
    # TODO(synk): on v7x with large H, single-buffer these (pl.Buffered(1)).
    fixed = 0
    for k in k_sizes:
        fixed += 2 * (k * 3 * Hp * act_bytes          # W_ih
                      + Hp * 3 * Hp * act_bytes       # W_hh
                      + 3 * Hp * 4 + Hp * 4)          # biases (f32)
    fixed += 2 * (Hp * Cp * act_bytes + Cp * 4)       # means head
    fixed += 2 * Bp * 4                               # lengths
    fixed += n_layers * Bp * Hp * 4                   # hidden-state scratch
    # Per activation row: x chunk (2x), out chunk (2x), gi + act scratch (1x).
    per_row = (2 * in0p * act_bytes + 2 * Cp * 4 + 3 * Hp * 4 + Hp * 4)
    max_rows = max(Bp, (budget - fixed) // per_row)
    max_rows = min(max_rows, 4096)                    # keep some x/out pipelining
    chunk = max(1, min(T, max_rows // Bp))
    n_chunks = _cdiv(T, chunk)
    chunk = _cdiv(T, n_chunks)                        # rebalance: Tpad close to T
    return int(chunk), int(n_chunks)


# ----------------------------------------------------------------------------
# Parameter construction (PyTorch layout) and packing for the kernel
# ----------------------------------------------------------------------------
def init_params(key, bn_size, num_layers, hidden_size, input_size):
    input_sizes = [bn_size] + [hidden_size] * (num_layers - 1)
    H = hidden_size
    bound = 1.0 / (H ** 0.5)
    params = {"gru": []}
    for in_size in input_sizes:
        key, k1, k2, k3, k4 = jax.random.split(key, 5)
        params["gru"].append(dict(
            w_ih=jax.random.uniform(k1, (3 * H, in_size), jnp.float32, -bound, bound),
            w_hh=jax.random.uniform(k2, (3 * H, H), jnp.float32, -bound, bound),
            b_ih=jax.random.uniform(k3, (3 * H,), jnp.float32, -bound, bound),
            b_hh=jax.random.uniform(k4, (3 * H,), jnp.float32, -bound, bound),
        ))
    key, k1, k2, k3, k4 = jax.random.split(key, 5)
    params["means_w"] = jax.random.uniform(k1, (input_size, H), jnp.float32, -bound, bound)
    params["means_b"] = jax.random.uniform(k2, (1, input_size), jnp.float32, -bound, bound)
    params["vars_w"] = jax.random.uniform(k3, (input_size, H), jnp.float32, -bound, bound)
    params["vars_b"] = jax.random.uniform(k4, (1, input_size), jnp.float32, -bound, bound)
    return params


def _pack_gru_layer(lp, H, Hp, Kp, compute_dtype):
    """PyTorch-layout GRU params -> packed, padded, pre-transposed kernel params.

    Gate columns are laid out as [r (Hp) | z (Hp) | n (Hp)]; padded rows/cols
    are zero so the padded hidden components stay exactly zero through the
    recurrence.  The r/z hidden biases are folded into the input-side bias; the
    n gate's hidden bias (b_hn) stays inside the r*(...) term.
    """
    w_ih, w_hh = lp["w_ih"], lp["w_hh"]      # (3H, K), (3H, H); gate rows [r; z; n]
    b_ih, b_hh = lp["b_ih"], lp["b_hh"]      # (3H,), (3H,)
    K = w_ih.shape[1]

    def pack_w(w, k, kp):
        out = jnp.zeros((kp, 3 * Hp), jnp.float32)
        for g in range(3):
            out = out.at[:k, g * Hp:g * Hp + H].set(w[g * H:(g + 1) * H, :].T)
        return out.astype(compute_dtype)

    wih_p = pack_w(w_ih, K, Kp)              # (Kp, 3Hp)
    whh_p = pack_w(w_hh, H, Hp)              # (Hp, 3Hp)
    bias = jnp.zeros((1, 3 * Hp), jnp.float32)
    for g in range(3):
        b = b_ih[g * H:(g + 1) * H]
        if g < 2:
            b = b + b_hh[g * H:(g + 1) * H]
        bias = bias.at[0, g * Hp:g * Hp + H].set(b)
    bhn = jnp.zeros((1, Hp), jnp.float32).at[0, :H].set(b_hh[2 * H:])
    return wih_p, whh_p, bias, bhn


# ----------------------------------------------------------------------------
# Forward pass (unit_decoder_var=True, the module's default)
# ----------------------------------------------------------------------------
@functools.partial(jax.jit, static_argnames=("input_size", "compute_dtype"))
def vae_decoder_forward(inputs, lengths, params, *, input_size,
                        compute_dtype=jnp.bfloat16):
    """inputs: (B, T, bn_size) f32, lengths: (B,) int (lengths[b] <= T, tail padding)
    -> (means, vars), each (B, T, input_size)."""
    B, T, F_in = inputs.shape
    L = len(params["gru"])
    H = params["gru"][0]["w_hh"].shape[1]

    Bp = _round_up(B, 8)                 # sublane-aligned per-step row blocks
    Hp = _round_up(H, 128)               # lane-aligned gate slices
    In0p = _round_up(F_in, 128)
    Cp = _round_up(input_size, 128)      # lane-dense fused-head output
    act_bytes = jnp.dtype(compute_dtype).itemsize

    k_sizes = [In0p] + [Hp] * (L - 1)
    budget = int(_vmem_capacity_bytes() * 0.6)   # headroom for compiler scratch
    chunk, n_chunks = _pick_time_chunk(T, Bp, In0p, Hp, Cp, k_sizes,
                                       act_bytes, budget)
    Tp = chunk * n_chunks
    rows = chunk * Bp

    # --- operands ------------------------------------------------------------
    lens2d = jnp.zeros((Bp, 1), jnp.int32).at[:B, 0].set(lengths.astype(jnp.int32))

    # Time-major flattened, zero-padded activations: row t*Bp + b <-> (t, b).
    x = jnp.zeros((Tp, Bp, In0p), compute_dtype)
    x = x.at[:T, :B, :F_in].set(jnp.transpose(inputs, (1, 0, 2)).astype(compute_dtype))
    x = x.reshape(Tp * Bp, In0p)

    const2d = lambda c: (0, 0)
    layer_ops, layer_specs = [], []
    for li, lp in enumerate(params["gru"]):
        wih_p, whh_p, bias_p, bhn_p = _pack_gru_layer(lp, H, Hp, k_sizes[li],
                                                      compute_dtype)
        layer_ops += [wih_p, whh_p, bias_p, bhn_p]
        layer_specs += [pl.BlockSpec((k_sizes[li], 3 * Hp), const2d),
                        pl.BlockSpec((Hp, 3 * Hp), const2d),
                        pl.BlockSpec((1, 3 * Hp), const2d),
                        pl.BlockSpec((1, Hp), const2d)]

    wm_p = jnp.zeros((Hp, Cp), jnp.float32).at[:H, :input_size].set(
        params["means_w"].T).astype(compute_dtype)
    bm_p = jnp.zeros((1, Cp), jnp.float32).at[0, :input_size].set(
        params["means_b"].reshape(-1))

    kernel = functools.partial(_vae_decoder_kernel, n_layers=L, chunk=chunk,
                               batch=Bp, hidden=Hp, compute_dtype=compute_dtype)

    out = pl.pallas_call(
        kernel,
        out_shape=jax.ShapeDtypeStruct((Tp * Bp, Cp), jnp.float32),
        grid_spec=pltpu.PrefetchScalarGridSpec(
            num_scalar_prefetch=0,
            grid=(n_chunks,),
            in_specs=[pl.BlockSpec((rows, In0p), lambda c: (c, 0)),   # x chunk
                      pl.BlockSpec((Bp, 1), const2d)]                 # lengths
                     + layer_specs
                     + [pl.BlockSpec((Hp, Cp), const2d),              # means W
                        pl.BlockSpec((1, Cp), const2d)],              # means b
            out_specs=pl.BlockSpec((rows, Cp), lambda c: (c, 0)),
            scratch_shapes=[pltpu.VMEM((Bp, Hp), jnp.float32)         # per-layer h
                            for _ in range(L)]
                           + [pltpu.VMEM((rows, 3 * Hp), jnp.float32),  # gi chunk
                              pltpu.VMEM((rows, Hp), jnp.float32)]),    # act chunk
        compiler_params=pltpu.CompilerParams(
            # The time axis is a recurrence -> sequential grid.
            # TODO(synk): on v7x add a leading "parallel" batch-split axis to
            # use both TensorCores (no effect on v5e/v6e, 1 TC/chip).
            dimension_semantics=("arbitrary",),
            vmem_limit_bytes=budget),
    )(x, lens2d, *layer_ops, wm_p, bm_p)

    means = jnp.transpose(out.reshape(Tp, Bp, Cp)[:T, :B, :input_size], (1, 0, 2))

    # unit_decoder_var=True branch of the module: zeros, then transposed.
    # TODO(synk): shared_decoder_var / learned-variance branches would reuse the
    #             same fused-head path with ones / the GRU output; only the
    #             default (unit variance) branch is exercised here.
    vars_ = jnp.zeros((B, T, input_size), dtype=jnp.float32)
    return means, vars_


# ----------------------------------------------------------------------------
# Pure-JAX reference (mirrors the PyTorch module) for correctness checks
# ----------------------------------------------------------------------------
def _reference_means(inputs, lengths, params, input_size):
    B, T, _ = inputs.shape
    mask = (jnp.arange(T)[None, :] < lengths[:, None]).astype(jnp.float32)  # (B,T)
    x = inputs
    for lp in params["gru"]:
        H = lp["w_hh"].shape[1]
        w_ih, w_hh, b_ih, b_hh = lp["w_ih"], lp["w_hh"], lp["b_ih"], lp["b_hh"]

        def cell(h, x_t, w_ih=w_ih, w_hh=w_hh, b_ih=b_ih, b_hh=b_hh, H=H):
            gi = x_t @ w_ih.T + b_ih
            gh = h @ w_hh.T + b_hh
            r = jax.nn.sigmoid(gi[:, :H] + gh[:, :H])
            z = jax.nn.sigmoid(gi[:, H:2 * H] + gh[:, H:2 * H])
            n = jnp.tanh(gi[:, 2 * H:] + r * gh[:, 2 * H:])
            h = (1.0 - z) * n + z * h
            return h, h

        h0 = jnp.zeros((B, H), jnp.float32)
        _, ys = jax.lax.scan(cell, h0, jnp.transpose(x, (1, 0, 2)))
        x = jnp.transpose(ys, (1, 0, 2)) * mask[:, :, None]
    return x @ params["means_w"].T + params["means_b"]   # (B, T, C)


if __name__ == "__main__":
    # Small shapes consistent with the module.
    B, T = 2, 8
    bn_size, num_layers, hidden_size, input_size = 8, 2, 32, 16

    key = jax.random.PRNGKey(0)
    key, kp, kx = jax.random.split(key, 3)
    params = init_params(kp, bn_size, num_layers, hidden_size, input_size)

    inputs = jax.random.normal(kx, (B, T, bn_size), dtype=jnp.float32)
    lengths = jnp.array([8, 5], dtype=jnp.int32)   # descending, tail-only padding
    assert int(jnp.max(lengths)) <= T              # pack_padded_sequence precondition

    ref = _reference_means(inputs, lengths, params, input_size)

    # f32 path: strict numerical check against the pure-JAX reference.
    means32, vars32 = vae_decoder_forward(inputs, lengths, params,
                                          input_size=input_size,
                                          compute_dtype=jnp.float32)
    jax.block_until_ready((means32, vars32))
    assert means32.shape == (B, T, input_size)
    assert vars32.shape == (B, T, input_size)
    assert bool(jnp.all(vars32 == 0.0))
    err32 = float(jnp.max(jnp.abs(means32 - ref)))
    assert err32 < 1e-3, f"f32 means mismatch vs reference: max abs err {err32}"

    # bf16 fast path (MXU-friendly weights/inputs, f32 accumulation + gate math).
    means, vars_ = vae_decoder_forward(inputs, lengths, params,
                                       input_size=input_size,
                                       compute_dtype=jnp.bfloat16)
    jax.block_until_ready((means, vars_))
    assert bool(jnp.all(jnp.isfinite(means)))
    assert bool(jnp.all(vars_ == 0.0))
    err16 = float(jnp.max(jnp.abs(means - ref)))
    assert err16 < 5e-2, f"bf16 means mismatch vs reference: max abs err {err16}"

    print("KERNEL_OK")
</pallas_src>

<mosaic_0001>
module attributes {stable_mosaic.version = 11 : i64} {
  func.func @_vae_decoder_kernel(%arg0: i32, %arg1: memref<64x128xf32, #tpu.memory_space<vmem>>, %arg2: memref<8x1xi32, #tpu.memory_space<vmem>>, %arg3: memref<128x384xf32, #tpu.memory_space<vmem>>, %arg4: memref<128x384xf32, #tpu.memory_space<vmem>>, %arg5: memref<1x384xf32, #tpu.memory_space<vmem>>, %arg6: memref<1x128xf32, #tpu.memory_space<vmem>>, %arg7: memref<128x384xf32, #tpu.memory_space<vmem>>, %arg8: memref<128x384xf32, #tpu.memory_space<vmem>>, %arg9: memref<1x384xf32, #tpu.memory_space<vmem>>, %arg10: memref<1x128xf32, #tpu.memory_space<vmem>>, %arg11: memref<128x128xf32, #tpu.memory_space<vmem>>, %arg12: memref<1x128xf32, #tpu.memory_space<vmem>>, %arg13: memref<64x128xf32, #tpu.memory_space<vmem>>, %arg14: memref<8x128xf32, #tpu.memory_space<vmem>>, %arg15: memref<8x128xf32, #tpu.memory_space<vmem>>, %arg16: memref<64x384xf32, #tpu.memory_space<vmem>>, %arg17: memref<64x128xf32, #tpu.memory_space<vmem>>) attributes {dimension_semantics = [#tpu.dimension_semantics<arbitrary>], iteration_bounds = array<i64: 1>, scalar_prefetch = 0 : i64, scratch_operands = 4 : i64, tpu.core_type = #tpu.core_type<tc>, window_params = [{transform_indices = @transform_0, window_bounds = array<i64: 64, 128>}, {pipeline_mode = #tpu.pipeline_mode<synchronous>, transform_indices = @transform_1, window_bounds = array<i64: 8, 1>}, {pipeline_mode = #tpu.pipeline_mode<synchronous>, transform_indices = @transform_2, window_bounds = array<i64: 128, 384>}, {pipeline_mode = #tpu.pipeline_mode<synchronous>, transform_indices = @transform_3, window_bounds = array<i64: 128, 384>}, {pipeline_mode = #tpu.pipeline_mode<synchronous>, transform_indices = @transform_4, window_bounds = array<i64: 1, 384>}, {pipeline_mode = #tpu.pipeline_mode<synchronous>, transform_indices = @transform_5, window_bounds = array<i64: 1, 128>}, {pipeline_mode = #tpu.pipeline_mode<synchronous>, transform_indices = @transform_6, window_bounds = array<i64: 128, 384>}, {pipeline_mode = #tpu.pipeline_mode<synchronous>, transform_indices = @transform_7, window_bounds = array<i64: 128, 384>}, {pipeline_mode = #tpu.pipeline_mode<synchronous>, transform_indices = @transform_8, window_bounds = array<i64: 1, 384>}, {pipeline_mode = #tpu.pipeline_mode<synchronous>, transform_indices = @transform_9, window_bounds = array<i64: 1, 128>}, {pipeline_mode = #tpu.pipeline_mode<synchronous>, transform_indices = @transform_10, window_bounds = array<i64: 128, 128>}, {pipeline_mode = #tpu.pipeline_mode<synchronous>, transform_indices = @transform_11, window_bounds = array<i64: 1, 128>}, {transform_indices = @transform_12, window_bounds = array<i64: 64, 128>}]} {
    %c0_i32 = arith.constant 0 : i32
    %0 = arith.cmpi eq, %arg0, %c0_i32 : i32
    %1 = arith.extui %0 : i1 to i32
    %c0_i32_0 = arith.constant 0 : i32
    %2 = arith.cmpi ne, %1, %c0_i32_0 : i32
    scf.if %2 {
      %cst_183 = arith.constant 0.000000e+00 : f32
      %694 = vector.broadcast %cst_183 : f32 to vector<8x128xf32>
      %c0_184 = arith.constant 0 : index
      %c0_185 = arith.constant 0 : index
      %695 = vector.load %arg14[%c0_184, %c0_185] : memref<8x128xf32, #tpu.memory_space<vmem>>, vector<8x128xf32>
      tpu.vector_store %arg14[%c0_184, %c0_185], %694 {strides = array<i32>} : memref<8x128xf32, #tpu.memory_space<vmem>>, vector<8x128xf32>,
      %cst_186 = arith.constant 0.000000e+00 : f32
      %696 = vector.broadcast %cst_186 : f32 to vector<8x128xf32>
      %c0_187 = arith.constant 0 : index
      %c0_188 = arith.constant 0 : index
      %697 = vector.load %arg15[%c0_187, %c0_188] : memref<8x128xf32, #tpu.memory_space<vmem>>, vector<8x128xf32>
      tpu.vector_store %arg15[%c0_187, %c0_188], %696 {strides = array<i32>} : memref<8x128xf32, #tpu.memory_space<vmem>>, vector<8x128xf32>,
    } else {
    }
    %c0 = arith.constant 0 : index
    %c0_1 = arith.constant 0 : index
    %3 = vector.load %arg2[%c0, %c0_1] : memref<8x1xi32, #tpu.memory_space<vmem>>, vector<8x1xi32>
    %c8_i32 = arith.constant 8 : i32
    %4 = arith.muli %arg0, %c8_i32 : i32
    %c0_2 = arith.constant 0 : index
    %c0_3 = arith.constant 0 : index
    %5 = vector.load %arg3[%c0_2, %c0_3] : memref<128x384xf32, #tpu.memory_space<vmem>>, vector<128x384xf32>
    %c0_4 = arith.constant 0 : index
    %c0_5 = arith.constant 0 : index
    %6 = vector.load %arg4[%c0_4, %c0_5] : memref<128x384xf32, #tpu.memory_space<vmem>>, vector<128x384xf32>
    %c0_6 = arith.constant 0 : index
    %c0_7 = arith.constant 0 : index
    %7 = vector.load %arg5[%c0_6, %c0_7] : memref<1x384xf32, #tpu.memory_space<vmem>>, vector<1x384xf32>
    %c0_8 = arith.constant 0 : index
    %c0_9 = arith.constant 0 : index
    %8 = vector.load %arg6[%c0_8, %c0_9] : memref<1x128xf32, #tpu.memory_space<vmem>>, vector<1x128xf32>
    %9 = vector.shape_cast %8 : vector<1x128xf32> to vector<1x128xf32>
    %10 = vector.broadcast %9 : vector<1x128xf32> to vector<8x128xf32>
    %c0_10 = arith.constant 0 : index
    %c0_11 = arith.constant 0 : index
    %11 = vector.load %arg1[%c0_10, %c0_11] : memref<64x128xf32, #tpu.memory_space<vmem>>, vector<64x128xf32>
    %cst = arith.constant dense<0.000000e+00> : vector<64x384xf32>
    %12 = tpu.matmul %11, %5, %cst {dimension_numbers = #tpu.dot_dimension_numbers<[1], [0], [0], [1], [0, 0, 1, 1], [], []>} : vector<64x128xf32>, vector<128x384xf32>, vector<64x384xf32> -> vector<64x384xf32>
    %13 = vector.broadcast %7 : vector<1x384xf32> to vector<64x384xf32>
    %14 = arith.addf %12, %13 : vector<64x384xf32>
    %c0_12 = arith.constant 0 : index
    %c0_13 = arith.constant 0 : index
    %15 = vector.load %arg16[%c0_12, %c0_13] : memref<64x384xf32, #tpu.memory_space<vmem>>, vector<64x384xf32>
    tpu.vector_store %arg16[%c0_12, %c0_13], %14 {strides = array<i32>} : memref<64x384xf32, #tpu.memory_space<vmem>>, vector<64x384xf32>,
    %c0_14 = arith.constant 0 : index
    %c0_15 = arith.constant 0 : index
    %16 = vector.load %arg14[%c0_14, %c0_15] : memref<8x128xf32, #tpu.memory_space<vmem>>, vector<8x128xf32>
    %c0_i32_16 = arith.constant 0 : i32
    %c8_i32_17 = arith.constant 8 : i32
    %17 = arith.muli %c0_i32_16, %c8_i32_17 : i32
    %18 = tpu.assume_multiple %17, 8 : i32
    %19 = arith.index_cast %18 : i32 to index
    %c0_18 = arith.constant 0 : index
    %20 = vector.load %arg16[%19, %c0_18] : memref<64x384xf32, #tpu.memory_space<vmem>>, vector<8x384xf32>
    %cst_19 = arith.constant dense<0.000000e+00> : vector<8x384xf32>
    %21 = tpu.matmul %16, %6, %cst_19 {dimension_numbers = #tpu.dot_dimension_numbers<[1], [0], [0], [1], [0, 0, 1, 1], [], []>} : vector<8x128xf32>, vector<128x384xf32>, vector<8x384xf32> -> vector<8x384xf32>
    %22 = vector.extract_strided_slice %20 {offsets = [0, 0], sizes = [8, 128], strides = [1, 1]} : vector<8x384xf32> to vector<8x128xf32>
    %23 = vector.extract_strided_slice %21 {offsets = [0, 0], sizes = [8, 128], strides = [1, 1]} : vector<8x384xf32> to vector<8x128xf32>
    %24 = arith.addf %22, %23 : vector<8x128xf32>
    %25 = arith.negf %24 : vector<8x128xf32>
    %26 = math.exp %25 : vector<8x128xf32>
    %cst_20 = arith.constant 1.000000e+00 : f32
    %27 = vector.broadcast %cst_20 : f32 to vector<8x128xf32>
    %28 = arith.addf %27, %26 : vector<8x128xf32>
    %29 = arith.divf %27, %28 : vector<8x128xf32>
    %30 = vector.extract_strided_slice %20 {offsets = [0, 128], sizes = [8, 128], strides = [1, 1]} : vector<8x384xf32> to vector<8x128xf32>
    %31 = vector.extract_strided_slice %21 {offsets = [0, 128], sizes = [8, 128], strides = [1, 1]} : vector<8x384xf32> to vector<8x128xf32>
    %32 = arith.addf %30, %31 : vector<8x128xf32>
    %33 = arith.negf %32 : vector<8x128xf32>
    %34 = math.exp %33 : vector<8x128xf32>
    %cst_21 = arith.constant 1.000000e+00 : f32
    %35 = vector.broadcast %cst_21 : f32 to vector<8x128xf32>
    %36 = arith.addf %35, %34 : vector<8x128xf32>
    %37 = arith.divf %35, %36 : vector<8x128xf32>
    %38 = vector.extract_strided_slice %20 {offsets = [0, 256], sizes = [8, 128], strides = [1, 1]} : vector<8x384xf32> to vector<8x128xf32>
    %39 = vector.extract_strided_slice %21 {offsets = [0, 256], sizes = [8, 128], strides = [1, 1]} : vector<8x384xf32> to vector<8x128xf32>
    %40 = arith.addf %39, %10 : vector<8x128xf32>
    %41 = arith.mulf %29, %40 : vector<8x128xf32>
    %42 = arith.addf %38, %41 : vector<8x128xf32>
    %43 = math.tanh %42 : vector<8x128xf32>
    %cst_22 = arith.constant 1.000000e+00 : f32
    %44 = vector.broadcast %cst_22 : f32 to vector<8x128xf32>
    %45 = arith.subf %44, %37 : vector<8x128xf32>
    %46 = arith.mulf %45, %43 : vector<8x128xf32>
    %47 = arith.mulf %37, %16 : vector<8x128xf32>
    %48 = arith.addf %46, %47 : vector<8x128xf32>
    %49 = arith.addi %4, %c0_i32_16 : i32
    %50 = vector.broadcast %49 : i32 to vector<8x1xi32>
    %51 = arith.cmpi slt, %50, %3 : vector<8x1xi32>
    %cst_23 = arith.constant 0.000000e+00 : f32
    %52 = vector.shape_cast %51 : vector<8x1xi1> to vector<8x1xi1>
    %53 = vector.broadcast %52 : vector<8x1xi1> to vector<8x128xi1>
    %54 = vector.broadcast %cst_23 : f32 to vector<8x128xf32>
    %55 = arith.select %53, %48, %54 : vector<8x128xi1>, vector<8x128xf32>
    %56 = arith.index_cast %18 : i32 to index
    %c0_24 = arith.constant 0 : index
    %57 = vector.load %arg17[%56, %c0_24] : memref<64x128xf32, #tpu.memory_space<vmem>>, vector<8x128xf32>
    tpu.vector_store %arg17[%56, %c0_24], %55 {strides = array<i32>} : memref<64x128xf32, #tpu.memory_space<vmem>>, vector<8x128xf32>,
    %c1_i32 = arith.constant 1 : i32
    %c8_i32_25 = arith.constant 8 : i32
    %58 = arith.muli %c1_i32, %c8_i32_25 : i32
    %59 = tpu.assume_multiple %58, 8 : i32
    %60 = arith.index_cast %59 : i32 to index
    %c0_26 = arith.constant 0 : index
    %61 = vector.load %arg16[%60, %c0_26] : memref<64x384xf32, #tpu.memory_space<vmem>>, vector<8x384xf32>
    %cst_27 = arith.constant dense<0.000000e+00> : vector<8x384xf32>
    %62 = tpu.matmul %48, %6, %cst_27 {dimension_numbers = #tpu.dot_dimension_numbers<[1], [0], [0], [1], [0, 0, 1, 1], [], []>} : vector<8x128xf32>, vector<128x384xf32>, vector<8x384xf32> -> vector<8x384xf32>
    %63 = vector.extract_strided_slice %61 {offsets = [0, 0], sizes = [8, 128], strides = [1, 1]} : vector<8x384xf32> to vector<8x128xf32>
    %64 = vector.extract_strided_slice %62 {offsets = [0, 0], sizes = [8, 128], strides = [1, 1]} : vector<8x384xf32> to vector<8x128xf32>
    %65 = arith.addf %63, %64 : vector<8x128xf32>
    %66 = arith.negf %65 : vector<8x128xf32>
    %67 = math.exp %66 : vector<8x128xf32>
    %cst_28 = arith.constant 1.000000e+00 : f32
    %68 = vector.broadcast %cst_28 : f32 to vector<8x128xf32>
    %69 = arith.addf %68, %67 : vector<8x128xf32>
    %70 = arith.divf %68, %69 : vector<8x128xf32>
    %71 = vector.extract_strided_slice %61 {offsets = [0, 128], sizes = [8, 128], strides = [1, 1]} : vector<8x384xf32> to vector<8x128xf32>
    %72 = vector.extract_strided_slice %62 {offsets = [0, 128], sizes = [8, 128], strides = [1, 1]} : vector<8x384xf32> to vector<8x128xf32>
    %73 = arith.addf %71, %72 : vector<8x128xf32>
    %74 = arith.negf %73 : vector<8x128xf32>
    %75 = math.exp %74 : vector<8x128xf32>
    %cst_29 = arith.constant 1.000000e+00 : f32
    %76 = vector.broadcast %cst_29 : f32 to vector<8x128xf32>
    %77 = arith.addf %76, %75 : vector<8x128xf32>
    %78 = arith.divf %76, %77 : vector<8x128xf32>
    %79 = vector.extract_strided_slice %61 {offsets = [0, 256], sizes = [8, 128], strides = [1, 1]} : vector<8x384xf32> to vector<8x128xf32>
    %80 = vector.extract_strided_slice %62 {offsets = [0, 256], sizes = [8, 128], strides = [1, 1]} : vector<8x384xf32> to vector<8x128xf32>
    %81 = arith.addf %80, %10 : vector<8x128xf32>
    %82 = arith.mulf %70, %81 : vector<8x128xf32>
    %83 = arith.addf %79, %82 : vector<8x128xf32>
    %84 = math.tanh %83 : vector<8x128xf32>
    %cst_30 = arith.constant 1.000000e+00 : f32
    %85 = vector.broadcast %cst_30 : f32 to vector<8x128xf32>
    %86 = arith.subf %85, %78 : vector<8x128xf32>
    %87 = arith.mulf %86, %84 : vector<8x128xf32>
    %88 = arith.mulf %78, %48 : vector<8x128xf32>
    %89 = arith.addf %87, %88 : vector<8x128xf32>
    %90 = arith.addi %4, %c1_i32 : i32
    %91 = vector.broadcast %90 : i32 to vector<8x1xi32>
    %92 = arith.cmpi slt, %91, %3 : vector<8x1xi32>
    %cst_31 = arith.constant 0.000000e+00 : f32
    %93 = vector.shape_cast %92 : vector<8x1xi1> to vector<8x1xi1>
    %94 = vector.broadcast %93 : vector<8x1xi1> to vector<8x128xi1>
    %95 = vector.broadcast %cst_31 : f32 to vector<8x128xf32>
    %96 = arith.select %94, %89, %95 : vector<8x128xi1>, vector<8x128xf32>
    %97 = arith.index_cast %59 : i32 to index
    %c0_32 = arith.constant 0 : index
    %98 = vector.load %arg17[%97, %c0_32] : memref<64x128xf32, #tpu.memory_space<vmem>>, vector<8x128xf32>
    tpu.vector_store %arg17[%97, %c0_32], %96 {strides = array<i32>} : memref<64x128xf32, #tpu.memory_space<vmem>>, vector<8x128xf32>,
    %c2_i32 = arith.constant 2 : i32
    %c8_i32_33 = arith.constant 8 : i32
    %99 = arith.muli %c2_i32, %c8_i32_33 : i32
    %100 = tpu.assume_multiple %99, 8 : i32
    %101 = arith.index_cast %100 : i32 to index
    %c0_34 = arith.constant 0 : index
    %102 = vector.load %arg16[%101, %c0_34] : memref<64x384xf32, #tpu.memory_space<vmem>>, vector<8x384xf32>
    %cst_35 = arith.constant dense<0.000000e+00> : vector<8x384xf32>
    %103 = tpu.matmul %89, %6, %cst_35 {dimension_numbers = #tpu.dot_dimension_numbers<[1], [0], [0], [1], [0, 0, 1, 1], [], []>} : vector<8x128xf32>, vector<128x384xf32>, vector<8x384xf32> -> vector<8x384xf32>
    %104 = vector.extract_strided_slice %102 {offsets = [0, 0], sizes = [8, 128], strides = [1, 1]} : vector<8x384xf32> to vector<8x128xf32>
    %105 = vector.extract_strided_slice %103 {offsets = [0, 0], sizes = [8, 128], strides = [1, 1]} : vector<8x384xf32> to vector<8x128xf32>
    %106 = arith.addf %104, %105 : vector<8x128xf32>
    %107 = arith.negf %106 : vector<8x128xf32>
    %108 = math.exp %107 : vector<8x128xf32>
    %cst_36 = arith.constant 1.000000e+00 : f32
    %109 = vector.broadcast %cst_36 : f32 to vector<8x128xf32>
    %110 = arith.addf %109, %108 : vector<8x128xf32>
    %111 = arith.divf %109, %110 : vector<8x128xf32>
    %112 = vector.extract_strided_slice %102 {offsets = [0, 128], sizes = [8, 128], strides = [1, 1]} : vector<8x384xf32> to vector<8x128xf32>
    %113 = vector.extract_strided_slice %103 {offsets = [0, 128], sizes = [8, 128], strides = [1, 1]} : vector<8x384xf32> to vector<8x128xf32>
    %114 = arith.addf %112, %113 : vector<8x128xf32>
    %115 = arith.negf %114 : vector<8x128xf32>
    %116 = math.exp %115 : vector<8x128xf32>
    %cst_37 = arith.constant 1.000000e+00 : f32
    %117 = vector.broadcast %cst_37 : f32 to vector<8x128xf32>
    %118 = arith.addf %117, %116 : vector<8x128xf32>
    %119 = arith.divf %117, %118 : vector<8x128xf32>
    %120 = vector.extract_strided_slice %102 {offsets = [0, 256], sizes = [8, 128], strides = [1, 1]} : vector<8x384xf32> to vector<8x128xf32>
    %121 = vector.extract_strided_slice %103 {offsets = [0, 256], sizes = [8, 128], strides = [1, 1]} : vector<8x384xf32> to vector<8x128xf32>
    %122 = arith.addf %121, %10 : vector<8x128xf32>
    %123 = arith.mulf %111, %122 : vector<8x128xf32>
    %124 = arith.addf %120, %123 : vector<8x128xf32>
    %125 = math.tanh %124 : vector<8x128xf32>
    %cst_38 = arith.constant 1.000000e+00 : f32
    %126 = vector.broadcast %cst_38 : f32 to vector<8x128xf32>
    %127 = arith.subf %126, %119 : vector<8x128xf32>
    %128 = arith.mulf %127, %125 : vector<8x128xf32>
    %129 = arith.mulf %119, %89 : vector<8x128xf32>
    %130 = arith.addf %128, %129 : vector<8x128xf32>
    %131 = arith.addi %4, %c2_i32 : i32
    %132 = vector.broadcast %131 : i32 to vector<8x1xi32>
    %133 = arith.cmpi slt, %132, %3 : vector<8x1xi32>
    %cst_39 = arith.constant 0.000000e+00 : f32
    %134 = vector.shape_cast %133 : vector<8x1xi1> to vector<8x1xi1>
    %135 = vector.broadcast %134 : vector<8x1xi1> to vector<8x128xi1>
    %136 = vector.broadcast %cst_39 : f32 to vector<8x128xf32>
    %137 = arith.select %135, %130, %136 : vector<8x128xi1>, vector<8x128xf32>
    %138 = arith.index_cast %100 : i32 to index
    %c0_40 = arith.constant 0 : index
    %139 = vector.load %arg17[%138, %c0_40] : memref<64x128xf32, #tpu.memory_space<vmem>>, vector<8x128xf32>
    tpu.vector_store %arg17[%138, %c0_40], %137 {strides = array<i32>} : memref<64x128xf32, #tpu.memory_space<vmem>>, vector<8x128xf32>,
    %c3_i32 = arith.constant 3 : i32
    %c8_i32_41 = arith.constant 8 : i32
    %140 = arith.muli %c3_i32, %c8_i32_41 : i32
    %141 = tpu.assume_multiple %140, 8 : i32
    %142 = arith.index_cast %141 : i32 to index
    %c0_42 = arith.constant 0 : index
    %143 = vector.load %arg16[%142, %c0_42] : memref<64x384xf32, #tpu.memory_space<vmem>>, vector<8x384xf32>
    %cst_43 = arith.constant dense<0.000000e+00> : vector<8x384xf32>
    %144 = tpu.matmul %130, %6, %cst_43 {dimension_numbers = #tpu.dot_dimension_numbers<[1], [0], [0], [1], [0, 0, 1, 1], [], []>} : vector<8x128xf32>, vector<128x384xf32>, vector<8x384xf32> -> vector<8x384xf32>
    %145 = vector.extract_strided_slice %143 {offsets = [0, 0], sizes = [8, 128], strides = [1, 1]} : vector<8x384xf32> to vector<8x128xf32>
    %146 = vector.extract_strided_slice %144 {offsets = [0, 0], sizes = [8, 128], strides = [1, 1]} : vector<8x384xf32> to vector<8x128xf32>
    %147 = arith.addf %145, %146 : vector<8x128xf32>
    %148 = arith.negf %147 : vector<8x128xf32>
    %149 = math.exp %148 : vector<8x128xf32>
    %cst_44 = arith.constant 1.000000e+00 : f32
    %150 = vector.broadcast %cst_44 : f32 to vector<8x128xf32>
    %151 = arith.addf %150, %149 : vector<8x128xf32>
    %152 = arith.divf %150, %151 : vector<8x128xf32>
    %153 = vector.extract_strided_slice %143 {offsets = [0, 128], sizes = [8, 128], strides = [1, 1]} : vector<8x384xf32> to vector<8x128xf32>
    %154 = vector.extract_strided_slice %144 {offsets = [0, 128], sizes = [8, 128], strides = [1, 1]} : vector<8x384xf32> to vector<8x128xf32>
    %155 = arith.addf %153, %154 : vector<8x128xf32>
    %156 = arith.negf %155 : vector<8x128xf32>
    %157 = math.exp %156 : vector<8x128xf32>
    %cst_45 = arith.constant 1.000000e+00 : f32
    %158 = vector.broadcast %cst_45 : f32 to vector<8x128xf32>
    %159 = arith.addf %158, %157 : vector<8x128xf32>
    %160 = arith.divf %158, %159 : vector<8x128xf32>
    %161 = vector.extract_strided_slice %143 {offsets = [0, 256], sizes = [8, 128], strides = [1, 1]} : vector<8x384xf32> to vector<8x128xf32>
    %162 = vector.extract_strided_slice %144 {offsets = [0, 256], sizes = [8, 128], strides = [1, 1]} : vector<8x384xf32> to vector<8x128xf32>
    %163 = arith.addf %162, %10 : vector<8x128xf32>
    %164 = arith.mulf %152, %163 : vector<8x128xf32>
    %165 = arith.addf %161, %164 : vector<8x128xf32>
    %166 = math.tanh %165 : vector<8x128xf32>
    %cst_46 = arith.constant 1.000000e+00 : f32
    %167 = vector.broadcast %cst_46 : f32 to vector<8x128xf32>
    %168 = arith.subf %167, %160 : vector<8x128xf32>
    %169 = arith.mulf %168, %166 : vector<8x128xf32>
    %170 = arith.mulf %160, %130 : vector<8x128xf32>
    %171 = arith.addf %169, %170 : vector<8x128xf32>
    %172 = arith.addi %4, %c3_i32 : i32
    %173 = vector.broadcast %172 : i32 to vector<8x1xi32>
    %174 = arith.cmpi slt, %173, %3 : vector<8x1xi32>
    %cst_47 = arith.constant 0.000000e+00 : f32
    %175 = vector.shape_cast %174 : vector<8x1xi1> to vector<8x1xi1>
    %176 = vector.broadcast %175 : vector<8x1xi1> to vector<8x128xi1>
    %177 = vector.broadcast %cst_47 : f32 to vector<8x128xf32>
    %178 = arith.select %176, %171, %177 : vector<8x128xi1>, vector<8x128xf32>
    %179 = arith.index_cast %141 : i32 to index
    %c0_48 = arith.constant 0 : index
    %180 = vector.load %arg17[%179, %c0_48] : memref<64x128xf32, #tpu.memory_space<vmem>>, vector<8x128xf32>
    tpu.vector_store %arg17[%179, %c0_48], %178 {strides = array<i32>} : memref<64x128xf32, #tpu.memory_space<vmem>>, vector<8x128xf32>,
    %c4_i32 = arith.constant 4 : i32
    %c8_i32_49 = arith.constant 8 : i32
    %181 = arith.muli %c4_i32, %c8_i32_49 : i32
    %182 = tpu.assume_multiple %181, 8 : i32
    %183 = arith.index_cast %182 : i32 to index
    %c0_50 = arith.constant 0 : index
    %184 = vector.load %arg16[%183, %c0_50] : memref<64x384xf32, #tpu.memory_space<vmem>>, vector<8x384xf32>
    %cst_51 = arith.constant dense<0.000000e+00> : vector<8x384xf32>
    %185 = tpu.matmul %171, %6, %cst_51 {dimension_numbers = #tpu.dot_dimension_numbers<[1], [0], [0], [1], [0, 0, 1, 1], [], []>} : vector<8x128xf32>, vector<128x384xf32>, vector<8x384xf32> -> vector<8x384xf32>
    %186 = vector.extract_strided_slice %184 {offsets = [0, 0], sizes = [8, 128], strides = [1, 1]} : vector<8x384xf32> to vector<8x128xf32>
    %187 = vector.extract_strided_slice %185 {offsets = [0, 0], sizes = [8, 128], strides = [1, 1]} : vector<8x384xf32> to vector<8x128xf32>
    %188 = arith.addf %186, %187 : vector<8x128xf32>
    %189 = arith.negf %188 : vector<8x128xf32>
    %190 = math.exp %189 : vector<8x128xf32>
    %cst_52 = arith.constant 1.000000e+00 : f32
    %191 = vector.broadcast %cst_52 : f32 to vector<8x128xf32>
    %192 = arith.addf %191, %190 : vector<8x128xf32>
    %193 = arith.divf %191, %192 : vector<8x128xf32>
    %194 = vector.extract_strided_slice %184 {offsets = [0, 128], sizes = [8, 128], strides = [1, 1]} : vector<8x384xf32> to vector<8x128xf32>
    %195 = vector.extract_strided_slice %185 {offsets = [0, 128], sizes = [8, 128], strides = [1, 1]} : vector<8x384xf32> to vector<8x128xf32>
    %196 = arith.addf %194, %195 : vector<8x128xf32>
    %197 = arith.negf %196 : vector<8x128xf32>
    %198 = math.exp %197 : vector<8x128xf32>
    %cst_53 = arith.constant 1.000000e+00 : f32
    %199 = vector.broadcast %cst_53 : f32 to vector<8x128xf32>
    %200 = arith.addf %199, %198 : vector<8x128xf32>
    %201 = arith.divf %199, %200 : vector<8x128xf32>
    %202 = vector.extract_strided_slice %184 {offsets = [0, 256], sizes = [8, 128], strides = [1, 1]} : vector<8x384xf32> to vector<8x128xf32>
    %203 = vector.extract_strided_slice %185 {offsets = [0, 256], sizes = [8, 128], strides = [1, 1]} : vector<8x384xf32> to vector<8x128xf32>
    %204 = arith.addf %203, %10 : vector<8x128xf32>
    %205 = arith.mulf %193, %204 : vector<8x128xf32>
    %206 = arith.addf %202, %205 : vector<8x128xf32>
    %207 = math.tanh %206 : vector<8x128xf32>
    %cst_54 = arith.constant 1.000000e+00 : f32
    %208 = vector.broadcast %cst_54 : f32 to vector<8x128xf32>
    %209 = arith.subf %208, %201 : vector<8x128xf32>
    %210 = arith.mulf %209, %207 : vector<8x128xf32>
    %211 = arith.mulf %201, %171 : vector<8x128xf32>
    %212 = arith.addf %210, %211 : vector<8x128xf32>
    %213 = arith.addi %4, %c4_i32 : i32
    %214 = vector.broadcast %213 : i32 to vector<8x1xi32>
    %215 = arith.cmpi slt, %214, %3 : vector<8x1xi32>
    %cst_55 = arith.constant 0.000000e+00 : f32
    %216 = vector.shape_cast %215 : vector<8x1xi1> to vector<8x1xi1>
    %217 = vector.broadcast %216 : vector<8x1xi1> to vector<8x128xi1>
    %218 = vector.broadcast %cst_55 : f32 to vector<8x128xf32>
    %219 = arith.select %217, %212, %218 : vector<8x128xi1>, vector<8x128xf32>
    %220 = arith.index_cast %182 : i32 to index
    %c0_56 = arith.constant 0 : index
    %221 = vector.load %arg17[%220, %c0_56] : memref<64x128xf32, #tpu.memory_space<vmem>>, vector<8x128xf32>
    tpu.vector_store %arg17[%220, %c0_56], %219 {strides = array<i32>} : memref<64x128xf32, #tpu.memory_space<vmem>>, vector<8x128xf32>,
    %c5_i32 = arith.constant 5 : i32
    %c8_i32_57 = arith.constant 8 : i32
    %222 = arith.muli %c5_i32, %c8_i32_57 : i32
    %223 = tpu.assume_multiple %222, 8 : i32
    %224 = arith.index_cast %223 : i32 to index
    %c0_58 = arith.constant 0 : index
    %225 = vector.load %arg16[%224, %c0_58] : memref<64x384xf32, #tpu.memory_space<vmem>>, vector<8x384xf32>
    %cst_59 = arith.constant dense<0.000000e+00> : vector<8x384xf32>
    %226 = tpu.matmul %212, %6, %cst_59 {dimension_numbers = #tpu.dot_dimension_numbers<[1], [0], [0], [1], [0, 0, 1, 1], [], []>} : vector<8x128xf32>, vector<128x384xf32>, vector<8x384xf32> -> vector<8x384xf32>
    %227 = vector.extract_strided_slice %225 {offsets = [0, 0], sizes = [8, 128], strides = [1, 1]} : vector<8x384xf32> to vector<8x128xf32>
    %228 = vector.extract_strided_slice %226 {offsets = [0, 0], sizes = [8, 128], strides = [1, 1]} : vector<8x384xf32> to vector<8x128xf32>
    %229 = arith.addf %227, %228 : vector<8x128xf32>
    %230 = arith.negf %229 : vector<8x128xf32>
    %231 = math.exp %230 : vector<8x128xf32>
    %cst_60 = arith.constant 1.000000e+00 : f32
    %232 = vector.broadcast %cst_60 : f32 to vector<8x128xf32>
    %233 = arith.addf %232, %231 : vector<8x128xf32>
    %234 = arith.divf %232, %233 : vector<8x128xf32>
    %235 = vector.extract_strided_slice %225 {offsets = [0, 128], sizes = [8, 128], strides = [1, 1]} : vector<8x384xf32> to vector<8x128xf32>
    %236 = vector.extract_strided_slice %226 {offsets = [0, 128], sizes = [8, 128], strides = [1, 1]} : vector<8x384xf32> to vector<8x128xf32>
    %237 = arith.addf %235, %236 : vector<8x128xf32>
    %238 = arith.negf %237 : vector<8x128xf32>
    %239 = math.exp %238 : vector<8x128xf32>
    %cst_61 = arith.constant 1.000000e+00 : f32
    %240 = vector.broadcast %cst_61 : f32 to vector<8x128xf32>
    %241 = arith.addf %240, %239 : vector<8x128xf32>
    %242 = arith.divf %240, %241 : vector<8x128xf32>
    %243 = vector.extract_strided_slice %225 {offsets = [0, 256], sizes = [8, 128], strides = [1, 1]} : vector<8x384xf32> to vector<8x128xf32>
    %244 = vector.extract_strided_slice %226 {offsets = [0, 256], sizes = [8, 128], strides = [1, 1]} : vector<8x384xf32> to vector<8x128xf32>
    %245 = arith.addf %244, %10 : vector<8x128xf32>
    %246 = arith.mulf %234, %245 : vector<8x128xf32>
    %247 = arith.addf %243, %246 : vector<8x128xf32>
    %248 = math.tanh %247 : vector<8x128xf32>
    %cst_62 = arith.constant 1.000000e+00 : f32
    %249 = vector.broadcast %cst_62 : f32 to vector<8x128xf32>
    %250 = arith.subf %249, %242 : vector<8x128xf32>
    %251 = arith.mulf %250, %248 : vector<8x128xf32>
    %252 = arith.mulf %242, %212 : vector<8x128xf32>
    %253 = arith.addf %251, %252 : vector<8x128xf32>
    %254 = arith.addi %4, %c5_i32 : i32
    %255 = vector.broadcast %254 : i32 to vector<8x1xi32>
    %256 = arith.cmpi slt, %255, %3 : vector<8x1xi32>
    %cst_63 = arith.constant 0.000000e+00 : f32
    %257 = vector.shape_cast %256 : vector<8x1xi1> to vector<8x1xi1>
    %258 = vector.broadcast %257 : vector<8x1xi1> to vector<8x128xi1>
    %259 = vector.broadcast %cst_63 : f32 to vector<8x128xf32>
    %260 = arith.select %258, %253, %259 : vector<8x128xi1>, vector<8x128xf32>
    %261 = arith.index_cast %223 : i32 to index
    %c0_64 = arith.constant 0 : index
    %262 = vector.load %arg17[%261, %c0_64] : memref<64x128xf32, #tpu.memory_space<vmem>>, vector<8x128xf32>
    tpu.vector_store %arg17[%261, %c0_64], %260 {strides = array<i32>} : memref<64x128xf32, #tpu.memory_space<vmem>>, vector<8x128xf32>,
    %c6_i32 = arith.constant 6 : i32
    %c8_i32_65 = arith.constant 8 : i32
    %263 = arith.muli %c6_i32, %c8_i32_65 : i32
    %264 = tpu.assume_multiple %263, 8 : i32
    %265 = arith.index_cast %264 : i32 to index
    %c0_66 = arith.constant 0 : index
    %266 = vector.load %arg16[%265, %c0_66] : memref<64x384xf32, #tpu.memory_space<vmem>>, vector<8x384xf32>
    %cst_67 = arith.constant dense<0.000000e+00> : vector<8x384xf32>
    %267 = tpu.matmul %253, %6, %cst_67 {dimension_numbers = #tpu.dot_dimension_numbers<[1], [0], [0], [1], [0, 0, 1, 1], [], []>} : vector<8x128xf32>, vector<128x384xf32>, vector<8x384xf32> -> vector<8x384xf32>
    %268 = vector.extract_strided_slice %266 {offsets = [0, 0], sizes = [8, 128], strides = [1, 1]} : vector<8x384xf32> to vector<8x128xf32>
    %269 = vector.extract_strided_slice %267 {offsets = [0, 0], sizes = [8, 128], strides = [1, 1]} : vector<8x384xf32> to vector<8x128xf32>
    %270 = arith.addf %268, %269 : vector<8x128xf32>
    %271 = arith.negf %270 : vector<8x128xf32>
    %272 = math.exp %271 : vector<8x128xf32>
    %cst_68 = arith.constant 1.000000e+00 : f32
    %273 = vector.broadcast %cst_68 : f32 to vector<8x128xf32>
    %274 = arith.addf %273, %272 : vector<8x128xf32>
    %275 = arith.divf %273, %274 : vector<8x128xf32>
    %276 = vector.extract_strided_slice %266 {offsets = [0, 128], sizes = [8, 128], strides = [1, 1]} : vector<8x384xf32> to vector<8x128xf32>
    %277 = vector.extract_strided_slice %267 {offsets = [0, 128], sizes = [8, 128], strides = [1, 1]} : vector<8x384xf32> to vector<8x128xf32>
    %278 = arith.addf %276, %277 : vector<8x128xf32>
    %279 = arith.negf %278 : vector<8x128xf32>
    %280 = math.exp %279 : vector<8x128xf32>
    %cst_69 = arith.constant 1.000000e+00 : f32
    %281 = vector.broadcast %cst_69 : f32 to vector<8x128xf32>
    %282 = arith.addf %281, %280 : vector<8x128xf32>
    %283 = arith.divf %281, %282 : vector<8x128xf32>
    %284 = vector.extract_strided_slice %266 {offsets = [0, 256], sizes = [8, 128], strides = [1, 1]} : vector<8x384xf32> to vector<8x128xf32>
    %285 = vector.extract_strided_slice %267 {offsets = [0, 256], sizes = [8, 128], strides = [1, 1]} : vector<8x384xf32> to vector<8x128xf32>
    %286 = arith.addf %285, %10 : vector<8x128xf32>
    %287 = arith.mulf %275, %286 : vector<8x128xf32>
    %288 = arith.addf %284, %287 : vector<8x128xf32>
    %289 = math.tanh %288 : vector<8x128xf32>
    %cst_70 = arith.constant 1.000000e+00 : f32
    %290 = vector.broadcast %cst_70 : f32 to vector<8x128xf32>
    %291 = arith.subf %290, %283 : vector<8x128xf32>
    %292 = arith.mulf %291, %289 : vector<8x128xf32>
    %293 = arith.mulf %283, %253 : vector<8x128xf32>
    %294 = arith.addf %292, %293 : vector<8x128xf32>
    %295 = arith.addi %4, %c6_i32 : i32
    %296 = vector.broadcast %295 : i32 to vector<8x1xi32>
    %297 = arith.cmpi slt, %296, %3 : vector<8x1xi32>
    %cst_71 = arith.constant 0.000000e+00 : f32
    %298 = vector.shape_cast %297 : vector<8x1xi1> to vector<8x1xi1>
    %299 = vector.broadcast %298 : vector<8x1xi1> to vector<8x128xi1>
    %300 = vector.broadcast %cst_71 : f32 to vector<8x128xf32>
    %301 = arith.select %299, %294, %300 : vector<8x128xi1>, vector<8x128xf32>
    %302 = arith.index_cast %264 : i32 to index
    %c0_72 = arith.constant 0 : index
    %303 = vector.load %arg17[%302, %c0_72] : memref<64x128xf32, #tpu.memory_space<vmem>>, vector<8x128xf32>
    tpu.vector_store %arg17[%302, %c0_72], %301 {strides = array<i32>} : memref<64x128xf32, #tpu.memory_space<vmem>>, vector<8x128xf32>,
    %c7_i32 = arith.constant 7 : i32
    %c8_i32_73 = arith.constant 8 : i32
    %304 = arith.muli %c7_i32, %c8_i32_73 : i32
    %305 = tpu.assume_multiple %304, 8 : i32
    %306 = arith.index_cast %305 : i32 to index
    %c0_74 = arith.constant 0 : index
    %307 = vector.load %arg16[%306, %c0_74] : memref<64x384xf32, #tpu.memory_space<vmem>>, vector<8x384xf32>
    %cst_75 = arith.constant dense<0.000000e+00> : vector<8x384xf32>
    %308 = tpu.matmul %294, %6, %cst_75 {dimension_numbers = #tpu.dot_dimension_numbers<[1], [0], [0], [1], [0, 0, 1, 1], [], []>} : vector<8x128xf32>, vector<128x384xf32>, vector<8x384xf32> -> vector<8x384xf32>
    %309 = vector.extract_strided_slice %307 {offsets = [0, 0], sizes = [8, 128], strides = [1, 1]} : vector<8x384xf32> to vector<8x128xf32>
    %310 = vector.extract_strided_slice %308 {offsets = [0, 0], sizes = [8, 128], strides = [1, 1]} : vector<8x384xf32> to vector<8x128xf32>
    %311 = arith.addf %309, %310 : vector<8x128xf32>
    %312 = arith.negf %311 : vector<8x128xf32>
    %313 = math.exp %312 : vector<8x128xf32>
    %cst_76 = arith.constant 1.000000e+00 : f32
    %314 = vector.broadcast %cst_76 : f32 to vector<8x128xf32>
    %315 = arith.addf %314, %313 : vector<8x128xf32>
    %316 = arith.divf %314, %315 : vector<8x128xf32>
    %317 = vector.extract_strided_slice %307 {offsets = [0, 128], sizes = [8, 128], strides = [1, 1]} : vector<8x384xf32> to vector<8x128xf32>
    %318 = vector.extract_strided_slice %308 {offsets = [0, 128], sizes = [8, 128], strides = [1, 1]} : vector<8x384xf32> to vector<8x128xf32>
    %319 = arith.addf %317, %318 : vector<8x128xf32>
    %320 = arith.negf %319 : vector<8x128xf32>
    %321 = math.exp %320 : vector<8x128xf32>
    %cst_77 = arith.constant 1.000000e+00 : f32
    %322 = vector.broadcast %cst_77 : f32 to vector<8x128xf32>
    %323 = arith.addf %322, %321 : vector<8x128xf32>
    %324 = arith.divf %322, %323 : vector<8x128xf32>
    %325 = vector.extract_strided_slice %307 {offsets = [0, 256], sizes = [8, 128], strides = [1, 1]} : vector<8x384xf32> to vector<8x128xf32>
    %326 = vector.extract_strided_slice %308 {offsets = [0, 256], sizes = [8, 128], strides = [1, 1]} : vector<8x384xf32> to vector<8x128xf32>
    %327 = arith.addf %326, %10 : vector<8x128xf32>
    %328 = arith.mulf %316, %327 : vector<8x128xf32>
    %329 = arith.addf %325, %328 : vector<8x128xf32>
    %330 = math.tanh %329 : vector<8x128xf32>
    %cst_78 = arith.constant 1.000000e+00 : f32
    %331 = vector.broadcast %cst_78 : f32 to vector<8x128xf32>
    %332 = arith.subf %331, %324 : vector<8x128xf32>
    %333 = arith.mulf %332, %330 : vector<8x128xf32>
    %334 = arith.mulf %324, %294 : vector<8x128xf32>
    %335 = arith.addf %333, %334 : vector<8x128xf32>
    %336 = arith.addi %4, %c7_i32 : i32
    %337 = vector.broadcast %336 : i32 to vector<8x1xi32>
    %338 = arith.cmpi slt, %337, %3 : vector<8x1xi32>
    %cst_79 = arith.constant 0.000000e+00 : f32
    %339 = vector.shape_cast %338 : vector<8x1xi1> to vector<8x1xi1>
    %340 = vector.broadcast %339 : vector<8x1xi1> to vector<8x128xi1>
    %341 = vector.broadcast %cst_79 : f32 to vector<8x128xf32>
    %342 = arith.select %340, %335, %341 : vector<8x128xi1>, vector<8x128xf32>
    %343 = arith.index_cast %305 : i32 to index
    %c0_80 = arith.constant 0 : index
    %344 = vector.load %arg17[%343, %c0_80] : memref<64x128xf32, #tpu.memory_space<vmem>>, vector<8x128xf32>
    tpu.vector_store %arg17[%343, %c0_80], %342 {strides = array<i32>} : memref<64x128xf32, #tpu.memory_space<vmem>>, vector<8x128xf32>,
    %c8_i32_81 = arith.constant 8 : i32
    %c0_82 = arith.constant 0 : index
    %c0_83 = arith.constant 0 : index
    %345 = vector.load %arg14[%c0_82, %c0_83] : memref<8x128xf32, #tpu.memory_space<vmem>>, vector<8x128xf32>
    tpu.vector_store %arg14[%c0_82, %c0_83], %335 {strides = array<i32>} : memref<8x128xf32, #tpu.memory_space<vmem>>, vector<8x128xf32>,
    %c0_84 = arith.constant 0 : index
    %c0_85 = arith.constant 0 : index
    %346 = vector.load %arg7[%c0_84, %c0_85] : memref<128x384xf32, #tpu.memory_space<vmem>>, vector<128x384xf32>
    %c0_86 = arith.constant 0 : index
    %c0_87 = arith.constant 0 : index
    %347 = vector.load %arg8[%c0_86, %c0_87] : memref<128x384xf32, #tpu.memory_space<vmem>>, vector<128x384xf32>
    %c0_88 = arith.constant 0 : index
    %c0_89 = arith.constant 0 : index
    %348 = vector.load %arg9[%c0_88, %c0_89] : memref<1x384xf32, #tpu.memory_space<vmem>>, vector<1x384xf32>
    %c0_90 = arith.constant 0 : index
    %c0_91 = arith.constant 0 : index
    %349 = vector.load %arg10[%c0_90, %c0_91] : memref<1x128xf32, #tpu.memory_space<vmem>>, vector<1x128xf32>
    %350 = vector.shape_cast %349 : vector<1x128xf32> to vector<1x128xf32>
    %351 = vector.broadcast %350 : vector<1x128xf32> to vector<8x128xf32>
    %c0_92 = arith.constant 0 : index
    %c0_93 = arith.constant 0 : index
    %352 = vector.load %arg17[%c0_92, %c0_93] : memref<64x128xf32, #tpu.memory_space<vmem>>, vector<64x128xf32>
    %cst_94 = arith.constant dense<0.000000e+00> : vector<64x384xf32>
    %353 = tpu.matmul %352, %346, %cst_94 {dimension_numbers = #tpu.dot_dimension_numbers<[1], [0], [0], [1], [0, 0, 1, 1], [], []>} : vector<64x128xf32>, vector<128x384xf32>, vector<64x384xf32> -> vector<64x384xf32>
    %354 = vector.broadcast %348 : vector<1x384xf32> to vector<64x384xf32>
    %355 = arith.addf %353, %354 : vector<64x384xf32>
    %c0_95 = arith.constant 0 : index
    %c0_96 = arith.constant 0 : index
    %356 = vector.load %arg16[%c0_95, %c0_96] : memref<64x384xf32, #tpu.memory_space<vmem>>, vector<64x384xf32>
    tpu.vector_store %arg16[%c0_95, %c0_96], %355 {strides = array<i32>} : memref<64x384xf32, #tpu.memory_space<vmem>>, vector<64x384xf32>,
    %c0_97 = arith.constant 0 : index
    %c0_98 = arith.constant 0 : index
    %357 = vector.load %arg15[%c0_97, %c0_98] : memref<8x128xf32, #tpu.memory_space<vmem>>, vector<8x128xf32>
    %c0_i32_99 = arith.constant 0 : i32
    %c8_i32_100 = arith.constant 8 : i32
    %358 = arith.muli %c0_i32_99, %c8_i32_100 : i32
    %359 = tpu.assume_multiple %358, 8 : i32
    %360 = arith.index_cast %359 : i32 to index
    %c0_101 = arith.constant 0 : index
    %361 = vector.load %arg16[%360, %c0_101] : memref<64x384xf32, #tpu.memory_space<vmem>>, vector<8x384xf32>
    %cst_102 = arith.constant dense<0.000000e+00> : vector<8x384xf32>
    %362 = tpu.matmul %357, %347, %cst_102 {dimension_numbers = #tpu.dot_dimension_numbers<[1], [0], [0], [1], [0, 0, 1, 1], [], []>} : vector<8x128xf32>, vector<128x384xf32>, vector<8x384xf32> -> vector<8x384xf32>
    %363 = vector.extract_strided_slice %361 {offsets = [0, 0], sizes = [8, 128], strides = [1, 1]} : vector<8x384xf32> to vector<8x128xf32>
    %364 = vector.extract_strided_slice %362 {offsets = [0, 0], sizes = [8, 128], strides = [1, 1]} : vector<8x384xf32> to vector<8x128xf32>
    %365 = arith.addf %363, %364 : vector<8x128xf32>
    %366 = arith.negf %365 : vector<8x128xf32>
    %367 = math.exp %366 : vector<8x128xf32>
    %cst_103 = arith.constant 1.000000e+00 : f32
    %368 = vector.broadcast %cst_103 : f32 to vector<8x128xf32>
    %369 = arith.addf %368, %367 : vector<8x128xf32>
    %370 = arith.divf %368, %369 : vector<8x128xf32>
    %371 = vector.extract_strided_slice %361 {offsets = [0, 128], sizes = [8, 128], strides = [1, 1]} : vector<8x384xf32> to vector<8x128xf32>
    %372 = vector.extract_strided_slice %362 {offsets = [0, 128], sizes = [8, 128], strides = [1, 1]} : vector<8x384xf32> to vector<8x128xf32>
    %373 = arith.addf %371, %372 : vector<8x128xf32>
    %374 = arith.negf %373 : vector<8x128xf32>
    %375 = math.exp %374 : vector<8x128xf32>
    %cst_104 = arith.constant 1.000000e+00 : f32
    %376 = vector.broadcast %cst_104 : f32 to vector<8x128xf32>
    %377 = arith.addf %376, %375 : vector<8x128xf32>
    %378 = arith.divf %376, %377 : vector<8x128xf32>
    %379 = vector.extract_strided_slice %361 {offsets = [0, 256], sizes = [8, 128], strides = [1, 1]} : vector<8x384xf32> to vector<8x128xf32>
    %380 = vector.extract_strided_slice %362 {offsets = [0, 256], sizes = [8, 128], strides = [1, 1]} : vector<8x384xf32> to vector<8x128xf32>
    %381 = arith.addf %380, %351 : vector<8x128xf32>
    %382 = arith.mulf %370, %381 : vector<8x128xf32>
    %383 = arith.addf %379, %382 : vector<8x128xf32>
    %384 = math.tanh %383 : vector<8x128xf32>
    %cst_105 = arith.constant 1.000000e+00 : f32
    %385 = vector.broadcast %cst_105 : f32 to vector<8x128xf32>
    %386 = arith.subf %385, %378 : vector<8x128xf32>
    %387 = arith.mulf %386, %384 : vector<8x128xf32>
    %388 = arith.mulf %378, %357 : vector<8x128xf32>
    %389 = arith.addf %387, %388 : vector<8x128xf32>
    %390 = arith.addi %4, %c0_i32_99 : i32
    %391 = vector.broadcast %390 : i32 to vector<8x1xi32>
    %392 = arith.cmpi slt, %391, %3 : vector<8x1xi32>
    %cst_106 = arith.constant 0.000000e+00 : f32
    %393 = vector.shape_cast %392 : vector<8x1xi1> to vector<8x1xi1>
    %394 = vector.broadcast %393 : vector<8x1xi1> to vector<8x128xi1>
    %395 = vector.broadcast %cst_106 : f32 to vector<8x128xf32>
    %396 = arith.select %394, %389, %395 : vector<8x128xi1>, vector<8x128xf32>
    %397 = arith.index_cast %359 : i32 to index
    %c0_107 = arith.constant 0 : index
    %398 = vector.load %arg17[%397, %c0_107] : memref<64x128xf32, #tpu.memory_space<vmem>>, vector<8x128xf32>
    tpu.vector_store %arg17[%397, %c0_107], %396 {strides = array<i32>} : memref<64x128xf32, #tpu.memory_space<vmem>>, vector<8x128xf32>,
    %c1_i32_108 = arith.constant 1 : i32
    %c8_i32_109 = arith.constant 8 : i32
    %399 = arith.muli %c1_i32_108, %c8_i32_109 : i32
    %400 = tpu.assume_multiple %399, 8 : i32
    %401 = arith.index_cast %400 : i32 to index
    %c0_110 = arith.constant 0 : index
    %402 = vector.load %arg16[%401, %c0_110] : memref<64x384xf32, #tpu.memory_space<vmem>>, vector<8x384xf32>
    %cst_111 = arith.constant dense<0.000000e+00> : vector<8x384xf32>
    %403 = tpu.matmul %389, %347, %cst_111 {dimension_numbers = #tpu.dot_dimension_numbers<[1], [0], [0], [1], [0, 0, 1, 1], [], []>} : vector<8x128xf32>, vector<128x384xf32>, vector<8x384xf32> -> vector<8x384xf32>
    %404 = vector.extract_strided_slice %402 {offsets = [0, 0], sizes = [8, 128], strides = [1, 1]} : vector<8x384xf32> to vector<8x128xf32>
    %405 = vector.extract_strided_slice %403 {offsets = [0, 0], sizes = [8, 128], strides = [1, 1]} : vector<8x384xf32> to vector<8x128xf32>
    %406 = arith.addf %404, %405 : vector<8x128xf32>
    %407 = arith.negf %406 : vector<8x128xf32>
    %408 = math.exp %407 : vector<8x128xf32>
    %cst_112 = arith.constant 1.000000e+00 : f32
    %409 = vector.broadcast %cst_112 : f32 to vector<8x128xf32>
    %410 = arith.addf %409, %408 : vector<8x128xf32>
    %411 = arith.divf %409, %410 : vector<8x128xf32>
    %412 = vector.extract_strided_slice %402 {offsets = [0, 128], sizes = [8, 128], strides = [1, 1]} : vector<8x384xf32> to vector<8x128xf32>
    %413 = vector.extract_strided_slice %403 {offsets = [0, 128], sizes = [8, 128], strides = [1, 1]} : vector<8x384xf32> to vector<8x128xf32>
    %414 = arith.addf %412, %413 : vector<8x128xf32>
    %415 = arith.negf %414 : vector<8x128xf32>
    %416 = math.exp %415 : vector<8x128xf32>
    %cst_113 = arith.constant 1.000000e+00 : f32
    %417 = vector.broadcast %cst_113 : f32 to vector<8x128xf32>
    %418 = arith.addf %417, %416 : vector<8x128xf32>
    %419 = arith.divf %417, %418 : vector<8x128xf32>
    %420 = vector.extract_strided_slice %402 {offsets = [0, 256], sizes = [8, 128], strides = [1, 1]} : vector<8x384xf32> to vector<8x128xf32>
    %421 = vector.extract_strided_slice %403 {offsets = [0, 256], sizes = [8, 128], strides = [1, 1]} : vector<8x384xf32> to vector<8x128xf32>
    %422 = arith.addf %421, %351 : vector<8x128xf32>
    %423 = arith.mulf %411, %422 : vector<8x128xf32>
    %424 = arith.addf %420, %423 : vector<8x128xf32>
    %425 = math.tanh %424 : vector<8x128xf32>
    %cst_114 = arith.constant 1.000000e+00 : f32
    %426 = vector.broadcast %cst_114 : f32 to vector<8x128xf32>
    %427 = arith.subf %426, %419 : vector<8x128xf32>
    %428 = arith.mulf %427, %425 : vector<8x128xf32>
    %429 = arith.mulf %419, %389 : vector<8x128xf32>
    %430 = arith.addf %428, %429 : vector<8x128xf32>
    %431 = arith.addi %4, %c1_i32_108 : i32
    %432 = vector.broadcast %431 : i32 to vector<8x1xi32>
    %433 = arith.cmpi slt, %432, %3 : vector<8x1xi32>
    %cst_115 = arith.constant 0.000000e+00 : f32
    %434 = vector.shape_cast %433 : vector<8x1xi1> to vector<8x1xi1>
    %435 = vector.broadcast %434 : vector<8x1xi1> to vector<8x128xi1>
    %436 = vector.broadcast %cst_115 : f32 to vector<8x128xf32>
    %437 = arith.select %435, %430, %436 : vector<8x128xi1>, vector<8x128xf32>
    %438 = arith.index_cast %400 : i32 to index
    %c0_116 = arith.constant 0 : index
    %439 = vector.load %arg17[%438, %c0_116] : memref<64x128xf32, #tpu.memory_space<vmem>>, vector<8x128xf32>
    tpu.vector_store %arg17[%438, %c0_116], %437 {strides = array<i32>} : memref<64x128xf32, #tpu.memory_space<vmem>>, vector<8x128xf32>,
    %c2_i32_117 = arith.constant 2 : i32
    %c8_i32_118 = arith.constant 8 : i32
    %440 = arith.muli %c2_i32_117, %c8_i32_118 : i32
    %441 = tpu.assume_multiple %440, 8 : i32
    %442 = arith.index_cast %441 : i32 to index
    %c0_119 = arith.constant 0 : index
    %443 = vector.load %arg16[%442, %c0_119] : memref<64x384xf32, #tpu.memory_space<vmem>>, vector<8x384xf32>
    %cst_120 = arith.constant dense<0.000000e+00> : vector<8x384xf32>
    %444 = tpu.matmul %430, %347, %cst_120 {dimension_numbers = #tpu.dot_dimension_numbers<[1], [0], [0], [1], [0, 0, 1, 1], [], []>} : vector<8x128xf32>, vector<128x384xf32>, vector<8x384xf32> -> vector<8x384xf32>
    %445 = vector.extract_strided_slice %443 {offsets = [0, 0], sizes = [8, 128], strides = [1, 1]} : vector<8x384xf32> to vector<8x128xf32>
    %446 = vector.extract_strided_slice %444 {offsets = [0, 0], sizes = [8, 128], strides = [1, 1]} : vector<8x384xf32> to vector<8x128xf32>
    %447 = arith.addf %445, %446 : vector<8x128xf32>
    %448 = arith.negf %447 : vector<8x128xf32>
    %449 = math.exp %448 : vector<8x128xf32>
    %cst_121 = arith.constant 1.000000e+00 : f32
    %450 = vector.broadcast %cst_121 : f32 to vector<8x128xf32>
    %451 = arith.addf %450, %449 : vector<8x128xf32>
    %452 = arith.divf %450, %451 : vector<8x128xf32>
    %453 = vector.extract_strided_slice %443 {offsets = [0, 128], sizes = [8, 128], strides = [1, 1]} : vector<8x384xf32> to vector<8x128xf32>
    %454 = vector.extract_strided_slice %444 {offsets = [0, 128], sizes = [8, 128], strides = [1, 1]} : vector<8x384xf32> to vector<8x128xf32>
    %455 = arith.addf %453, %454 : vector<8x128xf32>
    %456 = arith.negf %455 : vector<8x128xf32>
    %457 = math.exp %456 : vector<8x128xf32>
    %cst_122 = arith.constant 1.000000e+00 : f32
    %458 = vector.broadcast %cst_122 : f32 to vector<8x128xf32>
    %459 = arith.addf %458, %457 : vector<8x128xf32>
    %460 = arith.divf %458, %459 : vector<8x128xf32>
    %461 = vector.extract_strided_slice %443 {offsets = [0, 256], sizes = [8, 128], strides = [1, 1]} : vector<8x384xf32> to vector<8x128xf32>
    %462 = vector.extract_strided_slice %444 {offsets = [0, 256], sizes = [8, 128], strides = [1, 1]} : vector<8x384xf32> to vector<8x128xf32>
    %463 = arith.addf %462, %351 : vector<8x128xf32>
    %464 = arith.mulf %452, %463 : vector<8x128xf32>
    %465 = arith.addf %461, %464 : vector<8x128xf32>
    %466 = math.tanh %465 : vector<8x128xf32>
    %cst_123 = arith.constant 1.000000e+00 : f32
    %467 = vector.broadcast %cst_123 : f32 to vector<8x128xf32>
    %468 = arith.subf %467, %460 : vector<8x128xf32>
    %469 = arith.mulf %468, %466 : vector<8x128xf32>
    %470 = arith.mulf %460, %430 : vector<8x128xf32>
    %471 = arith.addf %469, %470 : vector<8x128xf32>
    %472 = arith.addi %4, %c2_i32_117 : i32
    %473 = vector.broadcast %472 : i32 to vector<8x1xi32>
    %474 = arith.cmpi slt, %473, %3 : vector<8x1xi32>
    %cst_124 = arith.constant 0.000000e+00 : f32
    %475 = vector.shape_cast %474 : vector<8x1xi1> to vector<8x1xi1>
    %476 = vector.broadcast %475 : vector<8x1xi1> to vector<8x128xi1>
    %477 = vector.broadcast %cst_124 : f32 to vector<8x128xf32>
    %478 = arith.select %476, %471, %477 : vector<8x128xi1>, vector<8x128xf32>
    %479 = arith.index_cast %441 : i32 to index
    %c0_125 = arith.constant 0 : index
    %480 = vector.load %arg17[%479, %c0_125] : memref<64x128xf32, #tpu.memory_space<vmem>>, vector<8x128xf32>
    tpu.vector_store %arg17[%479, %c0_125], %478 {strides = array<i32>} : memref<64x128xf32, #tpu.memory_space<vmem>>, vector<8x128xf32>,
    %c3_i32_126 = arith.constant 3 : i32
    %c8_i32_127 = arith.constant 8 : i32
    %481 = arith.muli %c3_i32_126, %c8_i32_127 : i32
    %482 = tpu.assume_multiple %481, 8 : i32
    %483 = arith.index_cast %482 : i32 to index
    %c0_128 = arith.constant 0 : index
    %484 = vector.load %arg16[%483, %c0_128] : memref<64x384xf32, #tpu.memory_space<vmem>>, vector<8x384xf32>
    %cst_129 = arith.constant dense<0.000000e+00> : vector<8x384xf32>
    %485 = tpu.matmul %471, %347, %cst_129 {dimension_numbers = #tpu.dot_dimension_numbers<[1], [0], [0], [1], [0, 0, 1, 1], [], []>} : vector<8x128xf32>, vector<128x384xf32>, vector<8x384xf32> -> vector<8x384xf32>
    %486 = vector.extract_strided_slice %484 {offsets = [0, 0], sizes = [8, 128], strides = [1, 1]} : vector<8x384xf32> to vector<8x128xf32>
    %487 = vector.extract_strided_slice %485 {offsets = [0, 0], sizes = [8, 128], strides = [1, 1]} : vector<8x384xf32> to vector<8x128xf32>
    %488 = arith.addf %486, %487 : vector<8x128xf32>
    %489 = arith.negf %488 : vector<8x128xf32>
    %490 = math.exp %489 : vector<8x128xf32>
    %cst_130 = arith.constant 1.000000e+00 : f32
    %491 = vector.broadcast %cst_130 : f32 to vector<8x128xf32>
    %492 = arith.addf %491, %490 : vector<8x128xf32>
    %493 = arith.divf %491, %492 : vector<8x128xf32>
    %494 = vector.extract_strided_slice %484 {offsets = [0, 128], sizes = [8, 128], strides = [1, 1]} : vector<8x384xf32> to vector<8x128xf32>
    %495 = vector.extract_strided_slice %485 {offsets = [0, 128], sizes = [8, 128], strides = [1, 1]} : vector<8x384xf32> to vector<8x128xf32>
    %496 = arith.addf %494, %495 : vector<8x128xf32>
    %497 = arith.negf %496 : vector<8x128xf32>
    %498 = math.exp %497 : vector<8x128xf32>
    %cst_131 = arith.constant 1.000000e+00 : f32
    %499 = vector.broadcast %cst_131 : f32 to vector<8x128xf32>
    %500 = arith.addf %499, %498 : vector<8x128xf32>
    %501 = arith.divf %499, %500 : vector<8x128xf32>
    %502 = vector.extract_strided_slice %484 {offsets = [0, 256], sizes = [8, 128], strides = [1, 1]} : vector<8x384xf32> to vector<8x128xf32>
    %503 = vector.extract_strided_slice %485 {offsets = [0, 256], sizes = [8, 128], strides = [1, 1]} : vector<8x384xf32> to vector<8x128xf32>
    %504 = arith.addf %503, %351 : vector<8x128xf32>
    %505 = arith.mulf %493, %504 : vector<8x128xf32>
    %506 = arith.addf %502, %505 : vector<8x128xf32>
    %507 = math.tanh %506 : vector<8x128xf32>
    %cst_132 = arith.constant 1.000000e+00 : f32
    %508 = vector.broadcast %cst_132 : f32 to vector<8x128xf32>
    %509 = arith.subf %508, %501 : vector<8x128xf32>
    %510 = arith.mulf %509, %507 : vector<8x128xf32>
    %511 = arith.mulf %501, %471 : vector<8x128xf32>
    %512 = arith.addf %510, %511 : vector<8x128xf32>
    %513 = arith.addi %4, %c3_i32_126 : i32
    %514 = vector.broadcast %513 : i32 to vector<8x1xi32>
    %515 = arith.cmpi slt, %514, %3 : vector<8x1xi32>
    %cst_133 = arith.constant 0.000000e+00 : f32
    %516 = vector.shape_cast %515 : vector<8x1xi1> to vector<8x1xi1>
    %517 = vector.broadcast %516 : vector<8x1xi1> to vector<8x128xi1>
    %518 = vector.broadcast %cst_133 : f32 to vector<8x128xf32>
    %519 = arith.select %517, %512, %518 : vector<8x128xi1>, vector<8x128xf32>
    %520 = arith.index_cast %482 : i32 to index
    %c0_134 = arith.constant 0 : index
    %521 = vector.load %arg17[%520, %c0_134] : memref<64x128xf32, #tpu.memory_space<vmem>>, vector<8x128xf32>
    tpu.vector_store %arg17[%520, %c0_134], %519 {strides = array<i32>} : memref<64x128xf32, #tpu.memory_space<vmem>>, vector<8x128xf32>,
    %c4_i32_135 = arith.constant 4 : i32
    %c8_i32_136 = arith.constant 8 : i32
    %522 = arith.muli %c4_i32_135, %c8_i32_136 : i32
    %523 = tpu.assume_multiple %522, 8 : i32
    %524 = arith.index_cast %523 : i32 to index
    %c0_137 = arith.constant 0 : index
    %525 = vector.load %arg16[%524, %c0_137] : memref<64x384xf32, #tpu.memory_space<vmem>>, vector<8x384xf32>
    %cst_138 = arith.constant dense<0.000000e+00> : vector<8x384xf32>
    %526 = tpu.matmul %512, %347, %cst_138 {dimension_numbers = #tpu.dot_dimension_numbers<[1], [0], [0], [1], [0, 0, 1, 1], [], []>} : vector<8x128xf32>, vector<128x384xf32>, vector<8x384xf32> -> vector<8x384xf32>
    %527 = vector.extract_strided_slice %525 {offsets = [0, 0], sizes = [8, 128], strides = [1, 1]} : vector<8x384xf32> to vector<8x128xf32>
    %528 = vector.extract_strided_slice %526 {offsets = [0, 0], sizes = [8, 128], strides = [1, 1]} : vector<8x384xf32> to vector<8x128xf32>
    %529 = arith.addf %527, %528 : vector<8x128xf32>
    %530 = arith.negf %529 : vector<8x128xf32>
    %531 = math.exp %530 : vector<8x128xf32>
    %cst_139 = arith.constant 1.000000e+00 : f32
    %532 = vector.broadcast %cst_139 : f32 to vector<8x128xf32>
    %533 = arith.addf %532, %531 : vector<8x128xf32>
    %534 = arith.divf %532, %533 : vector<8x128xf32>
    %535 = vector.extract_strided_slice %525 {offsets = [0, 128], sizes = [8, 128], strides = [1, 1]} : vector<8x384xf32> to vector<8x128xf32>
    %536 = vector.extract_strided_slice %526 {offsets = [0, 128], sizes = [8, 128], strides = [1, 1]} : vector<8x384xf32> to vector<8x128xf32>
    %537 = arith.addf %535, %536 : vector<8x128xf32>
    %538 = arith.negf %537 : vector<8x128xf32>
    %539 = math.exp %538 : vector<8x128xf32>
    %cst_140 = arith.constant 1.000000e+00 : f32
    %540 = vector.broadcast %cst_140 : f32 to vector<8x128xf32>
    %541 = arith.addf %540, %539 : vector<8x128xf32>
    %542 = arith.divf %540, %541 : vector<8x128xf32>
    %543 = vector.extract_strided_slice %525 {offsets = [0, 256], sizes = [8, 128], strides = [1, 1]} : vector<8x384xf32> to vector<8x128xf32>
    %544 = vector.extract_strided_slice %526 {offsets = [0, 256], sizes = [8, 128], strides = [1, 1]} : vector<8x384xf32> to vector<8x128xf32>
    %545 = arith.addf %544, %351 : vector<8x128xf32>
    %546 = arith.mulf %534, %545 : vector<8x128xf32>
    %547 = arith.addf %543, %546 : vector<8x128xf32>
    %548 = math.tanh %547 : vector<8x128xf32>
    %cst_141 = arith.constant 1.000000e+00 : f32
    %549 = vector.broadcast %cst_141 : f32 to vector<8x128xf32>
    %550 = arith.subf %549, %542 : vector<8x128xf32>
    %551 = arith.mulf %550, %548 : vector<8x128xf32>
    %552 = arith.mulf %542, %512 : vector<8x128xf32>
    %553 = arith.addf %551, %552 : vector<8x128xf32>
    %554 = arith.addi %4, %c4_i32_135 : i32
    %555 = vector.broadcast %554 : i32 to vector<8x1xi32>
    %556 = arith.cmpi slt, %555, %3 : vector<8x1xi32>
    %cst_142 = arith.constant 0.000000e+00 : f32
    %557 = vector.shape_cast %556 : vector<8x1xi1> to vector<8x1xi1>
    %558 = vector.broadcast %557 : vector<8x1xi1> to vector<8x128xi1>
    %559 = vector.broadcast %cst_142 : f32 to vector<8x128xf32>
    %560 = arith.select %558, %553, %559 : vector<8x128xi1>, vector<8x128xf32>
    %561 = arith.index_cast %523 : i32 to index
    %c0_143 = arith.constant 0 : index
    %562 = vector.load %arg17[%561, %c0_143] : memref<64x128xf32, #tpu.memory_space<vmem>>, vector<8x128xf32>
    tpu.vector_store %arg17[%561, %c0_143], %560 {strides = array<i32>} : memref<64x128xf32, #tpu.memory_space<vmem>>, vector<8x128xf32>,
    %c5_i32_144 = arith.constant 5 : i32
    %c8_i32_145 = arith.constant 8 : i32
    %563 = arith.muli %c5_i32_144, %c8_i32_145 : i32
    %564 = tpu.assume_multiple %563, 8 : i32
    %565 = arith.index_cast %564 : i32 to index
    %c0_146 = arith.constant 0 : index
    %566 = vector.load %arg16[%565, %c0_146] : memref<64x384xf32, #tpu.memory_space<vmem>>, vector<8x384xf32>
    %cst_147 = arith.constant dense<0.000000e+00> : vector<8x384xf32>
    %567 = tpu.matmul %553, %347, %cst_147 {dimension_numbers = #tpu.dot_dimension_numbers<[1], [0], [0], [1], [0, 0, 1, 1], [], []>} : vector<8x128xf32>, vector<128x384xf32>, vector<8x384xf32> -> vector<8x384xf32>
    %568 = vector.extract_strided_slice %566 {offsets = [0, 0], sizes = [8, 128], strides = [1, 1]} : vector<8x384xf32> to vector<8x128xf32>
    %569 = vector.extract_strided_slice %567 {offsets = [0, 0], sizes = [8, 128], strides = [1, 1]} : vector<8x384xf32> to vector<8x128xf32>
    %570 = arith.addf %568, %569 : vector<8x128xf32>
    %571 = arith.negf %570 : vector<8x128xf32>
    %572 = math.exp %571 : vector<8x128xf32>
    %cst_148 = arith.constant 1.000000e+00 : f32
    %573 = vector.broadcast %cst_148 : f32 to vector<8x128xf32>
    %574 = arith.addf %573, %572 : vector<8x128xf32>
    %575 = arith.divf %573, %574 : vector<8x128xf32>
    %576 = vector.extract_strided_slice %566 {offsets = [0, 128], sizes = [8, 128], strides = [1, 1]} : vector<8x384xf32> to vector<8x128xf32>
    %577 = vector.extract_strided_slice %567 {offsets = [0, 128], sizes = [8, 128], strides = [1, 1]} : vector<8x384xf32> to vector<8x128xf32>
    %578 = arith.addf %576, %577 : vector<8x128xf32>
    %579 = arith.negf %578 : vector<8x128xf32>
    %580 = math.exp %579 : vector<8x128xf32>
    %cst_149 = arith.constant 1.000000e+00 : f32
    %581 = vector.broadcast %cst_149 : f32 to vector<8x128xf32>
    %582 = arith.addf %581, %580 : vector<8x128xf32>
    %583 = arith.divf %581, %582 : vector<8x128xf32>
    %584 = vector.extract_strided_slice %566 {offsets = [0, 256], sizes = [8, 128], strides = [1, 1]} : vector<8x384xf32> to vector<8x128xf32>
    %585 = vector.extract_strided_slice %567 {offsets = [0, 256], sizes = [8, 128], strides = [1, 1]} : vector<8x384xf32> to vector<8x128xf32>
    %586 = arith.addf %585, %351 : vector<8x128xf32>
    %587 = arith.mulf %575, %586 : vector<8x128xf32>
    %588 = arith.addf %584, %587 : vector<8x128xf32>
    %589 = math.tanh %588 : vector<8x128xf32>
    %cst_150 = arith.constant 1.000000e+00 : f32
    %590 = vector.broadcast %cst_150 : f32 to vector<8x128xf32>
    %591 = arith.subf %590, %583 : vector<8x128xf32>
    %592 = arith.mulf %591, %589 : vector<8x128xf32>
    %593 = arith.mulf %583, %553 : vector<8x128xf32>
    %594 = arith.addf %592, %593 : vector<8x128xf32>
    %595 = arith.addi %4, %c5_i32_144 : i32
    %596 = vector.broadcast %595 : i32 to vector<8x1xi32>
    %597 = arith.cmpi slt, %596, %3 : vector<8x1xi32>
    %cst_151 = arith.constant 0.000000e+00 : f32
    %598 = vector.shape_cast %597 : vector<8x1xi1> to vector<8x1xi1>
    %599 = vector.broadcast %598 : vector<8x1xi1> to vector<8x128xi1>
    %600 = vector.broadcast %cst_151 : f32 to vector<8x128xf32>
    %601 = arith.select %599, %594, %600 : vector<8x128xi1>, vector<8x128xf32>
    %602 = arith.index_cast %564 : i32 to index
    %c0_152 = arith.constant 0 : index
    %603 = vector.load %arg17[%602, %c0_152] : memref<64x128xf32, #tpu.memory_space<vmem>>, vector<8x128xf32>
    tpu.vector_store %arg17[%602, %c0_152], %601 {strides = array<i32>} : memref<64x128xf32, #tpu.memory_space<vmem>>, vector<8x128xf32>,
    %c6_i32_153 = arith.constant 6 : i32
    %c8_i32_154 = arith.constant 8 : i32
    %604 = arith.muli %c6_i32_153, %c8_i32_154 : i32
    %605 = tpu.assume_multiple %604, 8 : i32
    %606 = arith.index_cast %605 : i32 to index
    %c0_155 = arith.constant 0 : index
    %607 = vector.load %arg16[%606, %c0_155] : memref<64x384xf32, #tpu.memory_space<vmem>>, vector<8x384xf32>
    %cst_156 = arith.constant dense<0.000000e+00> : vector<8x384xf32>
    %608 = tpu.matmul %594, %347, %cst_156 {dimension_numbers = #tpu.dot_dimension_numbers<[1], [0], [0], [1], [0, 0, 1, 1], [], []>} : vector<8x128xf32>, vector<128x384xf32>, vector<8x384xf32> -> vector<8x384xf32>
    %609 = vector.extract_strided_slice %607 {offsets = [0, 0], sizes = [8, 128], strides = [1, 1]} : vector<8x384xf32> to vector<8x128xf32>
    %610 = vector.extract_strided_slice %608 {offsets = [0, 0], sizes = [8, 128], strides = [1, 1]} : vector<8x384xf32> to vector<8x128xf32>
    %611 = arith.addf %609, %610 : vector<8x128xf32>
    %612 = arith.negf %611 : vector<8x128xf32>
    %613 = math.exp %612 : vector<8x128xf32>
    %cst_157 = arith.constant 1.000000e+00 : f32
    %614 = vector.broadcast %cst_157 : f32 to vector<8x128xf32>
    %615 = arith.addf %614, %613 : vector<8x128xf32>
    %616 = arith.divf %614, %615 : vector<8x128xf32>
    %617 = vector.extract_strided_slice %607 {offsets = [0, 128], sizes = [8, 128], strides = [1, 1]} : vector<8x384xf32> to vector<8x128xf32>
    %618 = vector.extract_strided_slice %608 {offsets = [0, 128], sizes = [8, 128], strides = [1, 1]} : vector<8x384xf32> to vector<8x128xf32>
    %619 = arith.addf %617, %618 : vector<8x128xf32>
    %620 = arith.negf %619 : vector<8x128xf32>
    %621 = math.exp %620 : vector<8x128xf32>
    %cst_158 = arith.constant 1.000000e+00 : f32
    %622 = vector.broadcast %cst_158 : f32 to vector<8x128xf32>
    %623 = arith.addf %622, %621 : vector<8x128xf32>
    %624 = arith.divf %622, %623 : vector<8x128xf32>
    %625 = vector.extract_strided_slice %607 {offsets = [0, 256], sizes = [8, 128], strides = [1, 1]} : vector<8x384xf32> to vector<8x128xf32>
    %626 = vector.extract_strided_slice %608 {offsets = [0, 256], sizes = [8, 128], strides = [1, 1]} : vector<8x384xf32> to vector<8x128xf32>
    %627 = arith.addf %626, %351 : vector<8x128xf32>
    %628 = arith.mulf %616, %627 : vector<8x128xf32>
    %629 = arith.addf %625, %628 : vector<8x128xf32>
    %630 = math.tanh %629 : vector<8x128xf32>
    %cst_159 = arith.constant 1.000000e+00 : f32
    %631 = vector.broadcast %cst_159 : f32 to vector<8x128xf32>
    %632 = arith.subf %631, %624 : vector<8x128xf32>
    %633 = arith.mulf %632, %630 : vector<8x128xf32>
    %634 = arith.mulf %624, %594 : vector<8x128xf32>
    %635 = arith.addf %633, %634 : vector<8x128xf32>
    %636 = arith.addi %4, %c6_i32_153 : i32
    %637 = vector.broadcast %636 : i32 to vector<8x1xi32>
    %638 = arith.cmpi slt, %637, %3 : vector<8x1xi32>
    %cst_160 = arith.constant 0.000000e+00 : f32
    %639 = vector.shape_cast %638 : vector<8x1xi1> to vector<8x1xi1>
    %640 = vector.broadcast %639 : vector<8x1xi1> to vector<8x128xi1>
    %641 = vector.broadcast %cst_160 : f32 to vector<8x128xf32>
    %642 = arith.select %640, %635, %641 : vector<8x128xi1>, vector<8x128xf32>
    %643 = arith.index_cast %605 : i32 to index
    %c0_161 = arith.constant 0 : index
    %644 = vector.load %arg17[%643, %c0_161] : memref<64x128xf32, #tpu.memory_space<vmem>>, vector<8x128xf32>
    tpu.vector_store %arg17[%643, %c0_161], %642 {strides = array<i32>} : memref<64x128xf32, #tpu.memory_space<vmem>>, vector<8x128xf32>,
    %c7_i32_162 = arith.constant 7 : i32
    %c8_i32_163 = arith.constant 8 : i32
    %645 = arith.muli %c7_i32_162, %c8_i32_163 : i32
    %646 = tpu.assume_multiple %645, 8 : i32
    %647 = arith.index_cast %646 : i32 to index
    %c0_164 = arith.constant 0 : index
    %648 = vector.load %arg16[%647, %c0_164] : memref<64x384xf32, #tpu.memory_space<vmem>>, vector<8x384xf32>
    %cst_165 = arith.constant dense<0.000000e+00> : vector<8x384xf32>
    %649 = tpu.matmul %635, %347, %cst_165 {dimension_numbers = #tpu.dot_dimension_numbers<[1], [0], [0], [1], [0, 0, 1, 1], [], []>} : vector<8x128xf32>, vector<128x384xf32>, vector<8x384xf32> -> vector<8x384xf32>
    %650 = vector.extract_strided_slice %648 {offsets = [0, 0], sizes = [8, 128], strides = [1, 1]} : vector<8x384xf32> to vector<8x128xf32>
    %651 = vector.extract_strided_slice %649 {offsets = [0, 0], sizes = [8, 128], strides = [1, 1]} : vector<8x384xf32> to vector<8x128xf32>
    %652 = arith.addf %650, %651 : vector<8x128xf32>
    %653 = arith.negf %652 : vector<8x128xf32>
    %654 = math.exp %653 : vector<8x128xf32>
    %cst_166 = arith.constant 1.000000e+00 : f32
    %655 = vector.broadcast %cst_166 : f32 to vector<8x128xf32>
    %656 = arith.addf %655, %654 : vector<8x128xf32>
    %657 = arith.divf %655, %656 : vector<8x128xf32>
    %658 = vector.extract_strided_slice %648 {offsets = [0, 128], sizes = [8, 128], strides = [1, 1]} : vector<8x384xf32> to vector<8x128xf32>
    %659 = vector.extract_strided_slice %649 {offsets = [0, 128], sizes = [8, 128], strides = [1, 1]} : vector<8x384xf32> to vector<8x128xf32>
    %660 = arith.addf %658, %659 : vector<8x128xf32>
    %661 = arith.negf %660 : vector<8x128xf32>
    %662 = math.exp %661 : vector<8x128xf32>
    %cst_167 = arith.constant 1.000000e+00 : f32
    %663 = vector.broadcast %cst_167 : f32 to vector<8x128xf32>
    %664 = arith.addf %663, %662 : vector<8x128xf32>
    %665 = arith.divf %663, %664 : vector<8x128xf32>
    %666 = vector.extract_strided_slice %648 {offsets = [0, 256], sizes = [8, 128], strides = [1, 1]} : vector<8x384xf32> to vector<8x128xf32>
    %667 = vector.extract_strided_slice %649 {offsets = [0, 256], sizes = [8, 128], strides = [1, 1]} : vector<8x384xf32> to vector<8x128xf32>
    %668 = arith.addf %667, %351 : vector<8x128xf32>
    %669 = arith.mulf %657, %668 : vector<8x128xf32>
    %670 = arith.addf %666, %669 : vector<8x128xf32>
    %671 = math.tanh %670 : vector<8x128xf32>
    %cst_168 = arith.constant 1.000000e+00 : f32
    %672 = vector.broadcast %cst_168 : f32 to vector<8x128xf32>
    %673 = arith.subf %672, %665 : vector<8x128xf32>
    %674 = arith.mulf %673, %671 : vector<8x128xf32>
    %675 = arith.mulf %665, %635 : vector<8x128xf32>
    %676 = arith.addf %674, %675 : vector<8x128xf32>
    %677 = arith.addi %4, %c7_i32_162 : i32
    %678 = vector.broadcast %677 : i32 to vector<8x1xi32>
    %679 = arith.cmpi slt, %678, %3 : vector<8x1xi32>
    %cst_169 = arith.constant 0.000000e+00 : f32
    %680 = vector.shape_cast %679 : vector<8x1xi1> to vector<8x1xi1>
    %681 = vector.broadcast %680 : vector<8x1xi1> to vector<8x128xi1>
    %682 = vector.broadcast %cst_169 : f32 to vector<8x128xf32>
    %683 = arith.select %681, %676, %682 : vector<8x128xi1>, vector<8x128xf32>
    %684 = arith.index_cast %646 : i32 to index
    %c0_170 = arith.constant 0 : index
    %685 = vector.load %arg17[%684, %c0_170] : memref<64x128xf32, #tpu.memory_space<vmem>>, vector<8x128xf32>
    tpu.vector_store %arg17[%684, %c0_170], %683 {strides = array<i32>} : memref<64x128xf32, #tpu.memory_space<vmem>>, vector<8x128xf32>,
    %c8_i32_171 = arith.constant 8 : i32
    %c0_172 = arith.constant 0 : index
    %c0_173 = arith.constant 0 : index
    %686 = vector.load %arg15[%c0_172, %c0_173] : memref<8x128xf32, #tpu.memory_space<vmem>>, vector<8x128xf32>
    tpu.vector_store %arg15[%c0_172, %c0_173], %676 {strides = array<i32>} : memref<8x128xf32, #tpu.memory_space<vmem>>, vector<8x128xf32>,
    %c0_174 = arith.constant 0 : index
    %c0_175 = arith.constant 0 : index
    %687 = vector.load %arg17[%c0_174, %c0_175] : memref<64x128xf32, #tpu.memory_space<vmem>>, vector<64x128xf32>
    %c0_176 = arith.constant 0 : index
    %c0_177 = arith.constant 0 : index
    %688 = vector.load %arg11[%c0_176, %c0_177] : memref<128x128xf32, #tpu.memory_space<vmem>>, vector<128x128xf32>
    %cst_178 = arith.constant dense<0.000000e+00> : vector<64x128xf32>
    %689 = tpu.matmul %687, %688, %cst_178 {dimension_numbers = #tpu.dot_dimension_numbers<[1], [0], [0], [1], [0, 0, 1, 1], [], []>} : vector<64x128xf32>, vector<128x128xf32>, vector<64x128xf32> -> vector<64x128xf32>
    %c0_179 = arith.constant 0 : index
    %c0_180 = arith.constant 0 : index
    %690 = vector.load %arg12[%c0_179, %c0_180] : memref<1x128xf32, #tpu.memory_space<vmem>>, vector<1x128xf32>
    %691 = vector.broadcast %690 : vector<1x128xf32> to vector<64x128xf32>
    %692 = arith.addf %689, %691 : vector<64x128xf32>
    %c0_181 = arith.constant 0 : index
    %c0_182 = arith.constant 0 : index
    %693 = vector.load %arg13[%c0_181, %c0_182] : memref<64x128xf32, #tpu.memory_space<vmem>>, vector<64x128xf32>
    tpu.vector_store %arg13[%c0_181, %c0_182], %692 {strides = array<i32>} : memref<64x128xf32, #tpu.memory_space<vmem>>, vector<64x128xf32>,
    return
  }
  func.func @transform_0(%arg0: i32) -> (i32, i32) {
    %c0_i32 = arith.constant 0 : i32
    %c0_i32_0 = arith.constant 0 : i32
    return %arg0, %c0_i32 : i32, i32
  }
  func.func @transform_1(%arg0: i32) -> (i32, i32) {
    %c0_i32 = arith.constant 0 : i32
    %c0_i32_0 = arith.constant 0 : i32
    %c0_i32_1 = arith.constant 0 : i32
    return %c0_i32, %c0_i32_0 : i32, i32
  }
  func.func @transform_2(%arg0: i32) -> (i32, i32) {
    %c0_i32 = arith.constant 0 : i32
    %c0_i32_0 = arith.constant 0 : i32
    %c0_i32_1 = arith.constant 0 : i32
    return %c0_i32, %c0_i32_0 : i32, i32
  }
  func.func @transform_3(%arg0: i32) -> (i32, i32) {
    %c0_i32 = arith.constant 0 : i32
    %c0_i32_0 = arith.constant 0 : i32
    %c0_i32_1 = arith.constant 0 : i32
    return %c0_i32, %c0_i32_0 : i32, i32
  }
  func.func @transform_4(%arg0: i32) -> (i32, i32) {
    %c0_i32 = arith.constant 0 : i32
    %c0_i32_0 = arith.constant 0 : i32
    %c0_i32_1 = arith.constant 0 : i32
    return %c0_i32, %c0_i32_0 : i32, i32
  }
  func.func @transform_5(%arg0: i32) -> (i32, i32) {
    %c0_i32 = arith.constant 0 : i32
    %c0_i32_0 = arith.constant 0 : i32
    %c0_i32_1 = arith.constant 0 : i32
    return %c0_i32, %c0_i32_0 : i32, i32
  }
  func.func @transform_6(%arg0: i32) -> (i32, i32) {
    %c0_i32 = arith.constant 0 : i32
    %c0_i32_0 = arith.constant 0 : i32
    %c0_i32_1 = arith.constant 0 : i32
    return %c0_i32, %c0_i32_0 : i32, i32
  }
  func.func @transform_7(%arg0: i32) -> (i32, i32) {
    %c0_i32 = arith.constant 0 : i32
    %c0_i32_0 = arith.constant 0 : i32
    %c0_i32_1 = arith.constant 0 : i32
    return %c0_i32, %c0_i32_0 : i32, i32
  }
  func.func @transform_8(%arg0: i32) -> (i32, i32) {
    %c0_i32 = arith.constant 0 : i32
    %c0_i32_0 = arith.constant 0 : i32
    %c0_i32_1 = arith.constant 0 : i32
    return %c0_i32, %c0_i32_0 : i32, i32
  }
  func.func @transform_9(%arg0: i32) -> (i32, i32) {
    %c0_i32 = arith.constant 0 : i32
    %c0_i32_0 = arith.constant 0 : i32
    %c0_i32_1 = arith.constant 0 : i32
    return %c0_i32, %c0_i32_0 : i32, i32
  }
  func.func @transform_10(%arg0: i32) -> (i32, i32) {
    %c0_i32 = arith.constant 0 : i32
    %c0_i32_0 = arith.constant 0 : i32
    %c0_i32_1 = arith.constant 0 : i32
    return %c0_i32, %c0_i32_0 : i32, i32
  }
  func.func @transform_11(%arg0: i32) -> (i32, i32) {
    %c0_i32 = arith.constant 0 : i32
    %c0_i32_0 = arith.constant 0 : i32
    %c0_i32_1 = arith.constant 0 : i32
    return %c0_i32, %c0_i32_0 : i32, i32
  }
  func.func @transform_12(%arg0: i32) -> (i32, i32) {
    %c0_i32 = arith.constant 0 : i32
    %c0_i32_0 = arith.constant 0 : i32
    return %arg0, %c0_i32 : i32, i32
  }
}

</mosaic_0001>

<bundles_post_ra>
// kernel: vae_decoder_forward.1
= control target key start
LH: loop header
LB: loop body
LE: loop exit
PB: predicated region body
PF: predicated region fallthrough
CT: control target
= control target key end

     0   :  { %v8033_v3 = vmov 0.0   ;;  %vm5097_vm0 = vmmov 0   ;;  %s8020_s2 = inlined_call_operand.vmem [shape: f32[128,384], index: 2, kind: input, shape index: {}]   ;;  %s8021_s3 = inlined_call_operand.vmem [shape: f32[128,384], index: 3, kind: input, shape index: {}]   ;;  %s8022_s0 = inlined_call_operand.vmem [shape: f32[64,128], index: 0, kind: input, shape index: {}]   ;;  %s8023_s4 = inlined_call_operand.vmem [shape: f32[1,384], index: 4, kind: input, shape index: {}]   ;;  %s8024_s5 = inlined_call_operand.vmem [shape: f32[1,128], index: 5, kind: input, shape index: {}]   ;;  %s8025_s1 = inlined_call_operand.vmem [shape: s32[8,1], index: 1, kind: input, shape index: {}]   ;;  %s8026_s6 = inlined_call_operand.vmem [shape: f32[128,384], index: 6, kind: input, shape index: {}]   ;;  %s8027_s7 = inlined_call_operand.vmem [shape: f32[128,384], index: 7, kind: input, shape index: {}]   ;;  %s8028_s8 = inlined_call_operand.vmem [shape: f32[1,384], index: 8, kind: input, shape index: {}]   ;;  %s8029_s9 = inlined_call_operand.vmem [shape: f32[1,128], index: 9, kind: input, shape index: {}]   ;;  %s8030_s10 = inlined_call_operand.vmem [shape: f32[128,128], index: 10, kind: input, shape index: {}]   ;;  %s8031_s11 = inlined_call_operand.vmem [shape: f32[1,128], index: 11, kind: input, shape index: {}]   ;;  %s8032_s12 = inlined_call_operand.vmem [shape: f32[64,128], index: 12, kind: output, shape index: {}]  }
   0x1   :  { %v95_v0 = vld [vmem:[%s8020_s2 + $0x170] sm:$0xff]  ;;  %v94_v1 = vld [vmem:[%s8020_s2 + $0x168] sm:$0xff]  ;;  %v92_v2 = vld [vmem:[%s8020_s2 + $0x158] sm:$0xff]  ;;  %241 = vmatprep.mubr.f32.mxu1 %v8033_v3  ;;  %490 = vmatprep.mubr.f32.mxu0 %v8033_v3 }
   0x2   :  { %177 = vmatprep.subr.mxu1 %v95_v0  ;;  %v5178_v4 = vld [vmem:[%s8021_s3 + $0x170] sm:$0xff]  ;;  %v5186_v6 = vld [vmem:[%s8021_s3 + $0x168] sm:$0xff]  ;;  %v89_v7 = vld [vmem:[%s8020_s2 + $0x140] sm:$0xff] }
   0x3   :  { %8109 = vst [vmem:[#allocation6_spill] sm:$0xff] %v5178_v4  ;;  %v91_v5 = vld [vmem:[%s8020_s2 + $0x150] sm:$0xff]  ;;  %178 = vmatpush1.msra.mxu1 %v94_v1  ;;  %426 = vmatprep.subr.mxu0 %v5178_v4  ;;  %v5195_v8 = vld [vmem:[%s8021_s3 + $0x158] sm:$0xff]  ;;  %v5209_v11 = vld [vmem:[%s8021_s3 + $0x140] sm:$0xff] }
   0x4   :  { %179 = vmatprep.subr.mxu1 %v92_v2  ;;  %427 = vmatpush1.msra.mxu0 %v5186_v6  ;;  %v88_v9 = vld [vmem:[%s8020_s2 + $0x138] sm:$0xff]  ;;  %v5204_v10 = vld [vmem:[%s8021_s3 + $0x150] sm:$0xff]  ;;  %v86_v12 = vld [vmem:[%s8020_s2 + $0x128] sm:$0xff] }
   0x5   :  { %180 = vmatpush1.msra.mxu1 %v91_v5  ;;  %428 = vmatprep.subr.mxu0 %v5195_v8  ;;  %v5218_v13 = vld [vmem:[%s8021_s3 + $0x138] sm:$0xff]  ;;  %v85_v14 = vld [vmem:[%s8020_s2 + $0x120] sm:$0xff]  ;;  %v5227_v15 = vld [vmem:[%s8021_s3 + $0x128] sm:$0xff] }
   0x6   :  { %181 = vmatprep.subr.mxu1 %v89_v7  ;;  %429 = vmatpush1.msra.mxu0 %v5204_v10  ;;  %v83_v16 = vld [vmem:[%s8020_s2 + $0x110] sm:$0xff]  ;;  %v5236_v17 = vld [vmem:[%s8021_s3 + $0x120] sm:$0xff]  ;;  %v82_v18 = vld [vmem:[%s8020_s2 + $0x108] sm:$0xff] }
   0x7   :  { %182 = vmatpush1.msra.mxu1 %v88_v9  ;;  %430 = vmatprep.subr.mxu0 %v5209_v11  ;;  %v5245_v19 = vld [vmem:[%s8021_s3 + $0x110] sm:$0xff]  ;;  %v80_v20 = vld [vmem:[%s8020_s2 + $0xf8] sm:$0xff]  ;;  %v5254_v21 = vld [vmem:[%s8021_s3 + $0x108] sm:$0xff] }
   0x8   :  { %183 = vmatprep.subr.mxu1 %v86_v12  ;;  %431 = vmatpush1.msra.mxu0 %v5218_v13  ;;  %v79_v22 = vld [vmem:[%s8020_s2 + $0xf0] sm:$0xff]  ;;  %v5263_v23 = vld [vmem:[%s8021_s3 + $0xf8] sm:$0xff]  ;;  %v77_v24 = vld [vmem:[%s8020_s2 + $0xe0] sm:$0xff] }
   0x9   :  { %184 = vmatpush1.msra.mxu1 %v85_v14  ;;  %432 = vmatprep.subr.mxu0 %v5227_v15  ;;  %v5272_v25 = vld [vmem:[%s8021_s3 + $0xf0] sm:$0xff]  ;;  %v76_v26 = vld [vmem:[%s8020_s2 + $0xd8] sm:$0xff]  ;;  %v5281_v27 = vld [vmem:[%s8021_s3 + $0xe0] sm:$0xff] }
   0xa   :  { %185 = vmatprep.subr.mxu1 %v83_v16  ;;  %433 = vmatpush1.msra.mxu0 %v5236_v17  ;;  %v74_v28 = vld [vmem:[%s8020_s2 + $0xc8] sm:$0xff]  ;;  %v5290_v29 = vld [vmem:[%s8021_s3 + $0xd8] sm:$0xff]  ;;  %v73_v30 = vld [vmem:[%s8020_s2 + $0xc0] sm:$0xff] }
   0xb   :  { %186 = vmatpush1.msra.mxu1 %v82_v18  ;;  %434 = vmatprep.subr.mxu0 %v5245_v19  ;;  %v5299_v31 = vld [vmem:[%s8021_s3 + $0xc8] sm:$0xff]  ;;  %v71_v32 = vld [vmem:[%s8020_s2 + $0xb0] sm:$0xff]  ;;  %v5308_v33 = vld [vmem:[%s8021_s3 + $0xc0] sm:$0xff] }
   0xc   :  { %187 = vmatprep.subr.mxu1 %v80_v20  ;;  %435 = vmatpush1.msra.mxu0 %v5254_v21  ;;  %v70_v34 = vld [vmem:[%s8020_s2 + $0xa8] sm:$0xff]  ;;  %v5317_v35 = vld [vmem:[%s8021_s3 + $0xb0] sm:$0xff]  ;;  %v68_v36 = vld [vmem:[%s8020_s2 + $0x98] sm:$0xff] }
   0xd   :  { %188 = vmatpush1.msra.mxu1 %v79_v22  ;;  %436 = vmatprep.subr.mxu0 %v5263_v23  ;;  %v5326_v37 = vld [vmem:[%s8021_s3 + $0xa8] sm:$0xff]  ;;  %v67_v38 = vld [vmem:[%s8020_s2 + $0x90] sm:$0xff]  ;;  %v5335_v39 = vld [vmem:[%s8021_s3 + $0x98] sm:$0xff] }
   0xe   :  { %189 = vmatprep.subr.mxu1 %v77_v24  ;;  %437 = vmatpush1.msra.mxu0 %v5272_v25  ;;  %v65_v40 = vld [vmem:[%s8020_s2 + $0x80] sm:$0xff]  ;;  %v5344_v41 = vld [vmem:[%s8021_s3 + $0x90] sm:$0xff]  ;;  %v64_v42 = vld [vmem:[%s8020_s2 + $0x78] sm:$0xff] }
   0xf   :  { %190 = vmatpush1.msra.mxu1 %v76_v26  ;;  %438 = vmatprep.subr.mxu0 %v5281_v27  ;;  %v5353_v43 = vld [vmem:[%s8021_s3 + $0x80] sm:$0xff]  ;;  %v62_v44 = vld [vmem:[%s8020_s2 + $0x68] sm:$0xff]  ;;  %v5362_v45 = vld [vmem:[%s8021_s3 + $0x78] sm:$0xff] }
  0x10   :  { %191 = vmatprep.subr.mxu1 %v74_v28  ;;  %439 = vmatpush1.msra.mxu0 %v5290_v29  ;;  %v61_v46 = vld [vmem:[%s8020_s2 + $0x60] sm:$0xff]  ;;  %v5371_v47 = vld [vmem:[%s8021_s3 + $0x68] sm:$0xff]  ;;  %v59_v48 = vld [vmem:[%s8020_s2 + $0x50] sm:$0xff] }
  0x11   :  { %192 = vmatpush1.msra.mxu1 %v73_v30  ;;  %440 = vmatprep.subr.mxu0 %v5299_v31  ;;  %v5380_v49 = vld [vmem:[%s8021_s3 + $0x60] sm:$0xff]  ;;  %v58_v50 = vld [vmem:[%s8020_s2 + $0x48] sm:$0xff]  ;;  %v5389_v51 = vld [vmem:[%s8021_s3 + $0x50] sm:$0xff] }
  0x12   :  { %193 = vmatprep.subr.mxu1 %v71_v32  ;;  %441 = vmatpush1.msra.mxu0 %v5308_v33  ;;  %v56_v52 = vld [vmem:[%s8020_s2 + $0x38] sm:$0xff]  ;;  %v5398_v53 = vld [vmem:[%s8021_s3 + $0x48] sm:$0xff]  ;;  %v55_v54 = vld [vmem:[%s8020_s2 + $0x30] sm:$0xff] }
  0x13   :  { %194 = vmatpush1.msra.mxu1 %v70_v34  ;;  %442 = vmatprep.subr.mxu0 %v5317_v35  ;;  %v5407_v55 = vld [vmem:[%s8021_s3 + $0x38] sm:$0xff]  ;;  %v53_v56 = vld [vmem:[%s8020_s2 + $0x20] sm:$0xff]  ;;  %v5416_v57 = vld [vmem:[%s8021_s3 + $0x30] sm:$0xff] }
  0x14   :  { %195 = vmatprep.subr.mxu1 %v68_v36  ;;  %443 = vmatpush1.msra.mxu0 %v5326_v37  ;;  %v52_v58 = vld [vmem:[%s8020_s2 + $0x18] sm:$0xff]  ;;  %v5425_v59 = vld [vmem:[%s8021_s3 + $0x20] sm:$0xff]  ;;  %v50_v60 = vld [vmem:[%s8020_s2 + $0x8] sm:$0xff] }
  0x15   :  { %196 = vmatpush1.msra.mxu1 %v67_v38  ;;  %444 = vmatprep.subr.mxu0 %v5335_v39  ;;  %v5434_v61 = vld [vmem:[%s8021_s3 + $0x18] sm:$0xff]  ;;  %v49_v62 = vld [vmem:[%s8020_s2] sm:$0xff]  ;;  %v5443_v63 = vld [vmem:[%s8021_s3 + $0x8] sm:$0xff] }
  0x16   :  { %197 = vmatprep.subr.mxu1 %v65_v40  ;;  %445 = vmatpush1.msra.mxu0 %v5344_v41  ;;  %8110 = vst [vmem:[#allocation7_spill] sm:$0xff] %v5443_v63  ;;  %v5449_v0 = vld [vmem:[%s8022_s0] sm:$0xff]  ;;  %v96_v1 = vld [vmem:[%s8020_s2 + $0x178] sm:$0xff]  ;;  %v5469_v7 = vld [vmem:[%s8022_s0 + $0x8] sm:$0xff] }
  0x17   :  { %198 = vmatpush1.msra.mxu1 %v64_v42  ;;  %446 = vmatprep.subr.mxu0 %v5353_v43  ;;  %v5458_v2 = vld [vmem:[%s8021_s3] sm:$0xff]  ;;  %v90_v9 = vld [vmem:[%s8020_s2 + $0x148] sm:$0xff]  ;;  %v87_v12 = vld [vmem:[%s8020_s2 + $0x130] sm:$0xff] }
  0x18   :  { %199 = vmatprep.subr.mxu1 %v62_v44  ;;  %447 = vmatpush1.msra.mxu0 %v5362_v45  ;;  %8111 = vst [vmem:[#allocation8_spill] sm:$0xff] %v5458_v2  ;;  %v93_v5 = vld [vmem:[%s8020_s2 + $0x160] sm:$0xff]  ;;  %v5484_v14 = vld [vmem:[%s8022_s0 + $0x10] sm:$0xff]  ;;  %v84_v16 = vld [vmem:[%s8020_s2 + $0x118] sm:$0xff] }
  0x19   :  { %200 = vmatpush1.msra.mxu1 %v61_v46  ;;  %448 = vmatprep.subr.mxu0 %v5371_v47  ;;  %v81_v18 = vld [vmem:[%s8020_s2 + $0x100] sm:$0xff]  ;;  %v5499_v20 = vld [vmem:[%s8022_s0 + $0x18] sm:$0xff]  ;;  %v78_v22 = vld [vmem:[%s8020_s2 + $0xe8] sm:$0xff] }
  0x1a   :  { %201 = vmatprep.subr.mxu1 %v59_v48  ;;  %449 = vmatpush1.msra.mxu0 %v5380_v49  ;;  %v75_v24 = vld [vmem:[%s8020_s2 + $0xd0] sm:$0xff]  ;;  %v157_v26 = vld [vmem:[%s8022_s0 + $0x20] sm:$0xff]  ;;  %v72_v28 = vld [vmem:[%s8020_s2 + $0xb8] sm:$0xff] }
  0x1b   :  { %202 = vmatpush1.msra.mxu1 %v58_v50  ;;  %450 = vmatprep.subr.mxu0 %v5389_v51  ;;  %v69_v30 = vld [vmem:[%s8020_s2 + $0xa0] sm:$0xff]  ;;  %v158_v32 = vld [vmem:[%s8022_s0 + $0x28] sm:$0xff]  ;;  %v63_v36 = vld [vmem:[%s8020_s2 + $0x70] sm:$0xff] }
  0x1c   :  { %203 = vmatprep.subr.mxu1 %v56_v52  ;;  %451 = vmatpush1.msra.mxu0 %v5398_v53  ;;  %v66_v34 = vld [vmem:[%s8020_s2 + $0x88] sm:$0xff]  ;;  %v159_v38 = vld [vmem:[%s8022_s0 + $0x30] sm:$0xff]  ;;  %v60_v40 = vld [vmem:[%s8020_s2 + $0x58] sm:$0xff] }
  0x1d   :  { %204 = vmatpush1.msra.mxu1 %v55_v54  ;;  %452 = vmatprep.subr.mxu0 %v5407_v55  ;;  %v57_v42 = vld [vmem:[%s8020_s2 + $0x40] sm:$0xff]  ;;  %v160_v44 = vld [vmem:[%s8022_s0 + $0x38] sm:$0xff]  ;;  %v54_v46 = vld [vmem:[%s8020_s2 + $0x28] sm:$0xff] }
  0x1e   :  { %205 = vmatprep.subr.mxu1 %v53_v56  ;;  %453 = vmatpush1.msra.mxu0 %v5416_v57  ;;  %v51_v48 = vld [vmem:[%s8020_s2 + $0x10] sm:$0xff]  ;;  %v5562_v50 = vld [vmem:[%s8021_s3 + $0x178] sm:$0xff]  ;;  %v5571_v52 = vld [vmem:[%s8021_s3 + $0x160] sm:$0xff] }
  0x1f   :  { %206 = vmatpush1.msra.mxu1 %v52_v58  ;;  %454 = vmatprep.subr.mxu0 %v5425_v59  ;;  %v5579_v54 = vld [vmem:[%s8021_s3 + $0x148] sm:$0xff]  ;;  %v5588_v56 = vld [vmem:[%s8021_s3 + $0x130] sm:$0xff]  ;;  %v5596_v58 = vld [vmem:[%s8021_s3 + $0x118] sm:$0xff] }
  0x20   :  { %207 = vmatprep.subr.mxu1 %v50_v60  ;;  %455 = vmatpush1.msra.mxu0 %v5434_v61  ;;  %v5605_v60 = vld [vmem:[%s8021_s3 + $0x100] sm:$0xff] }
  0x21   :  { %208 = vmatpush1.msra.mxu1 %v49_v62  ;;  %456 = vmatprep.subr.mxu0 %v5443_v63  ;;  %v5612_v62 = vld [vmem:[%s8021_s3 + $0xe8] sm:$0xff] }
  0x22   :  { %242 = vmatmul.mubr.f32.vlgmr.msra.gmra.mxu1 %v5449_v0  ;;  %4141 = vmatprep.subr.mxu1 %v96_v1 }
  0x23   :  { %4142 = vmatpush3.msra.mxu1 %v96_v1  ;;  %457 = vmatpush1.msra.mxu0 %v5458_v2  ;;  %v5630_v1 = vld [vmem:[%s8021_s3 + $0xb8] sm:$0xff] }
  0x24   :  { %4143 = vmatprep.subr.mxu1 %v93_v5  ;;  %491 = vmatmul.mubr.f32.vlgmr.msra.gmra.mxu0 %v8033_v3 }
  0x25   :  { %247 = vmatprep.mubr.f32.mxu1 %v8033_v3  ;;  %4144 = vmatpush3.msra.mxu1 %v93_v5  ;;  %v5639_v5 = vld [vmem:[%s8021_s3 + $0xa0] sm:$0xff] }
  0x26   :  { %248 = vmatmul.mubr.f32.gmra.mxu1 %v5469_v7  ;;  %4145 = vmatprep.subr.mxu1 %v90_v9 }
  0x27   :  { %4146 = vmatpush3.msra.mxu1 %v90_v9  ;;  %253 = vmatprep.mubr.f32.mxu1 %v8033_v3  ;;  %v5657_v9 = vld [vmem:[%s8021_s3 + $0x70] sm:$0xff] }
  0x28   :  { %4147 = vmatprep.subr.mxu1 %v87_v12  ;;  %604 = vmatprep.subr.mxu0 %v5178_v4 }
  0x29   :  { %4148 = vmatpush3.msra.mxu1 %v87_v12  ;;  %605 = vmatpush1.msra.mxu0 %v5186_v6  ;;  %v5666_v12 = vld [vmem:[%s8021_s3 + $0x58] sm:$0xff] }
  0x2a   :  { %254 = vmatmul.mubr.f32.gmra.mxu1 %v5484_v14  ;;  %4149 = vmatprep.subr.mxu1 %v84_v16 }
  0x2b   :  { %4150 = vmatpush3.msra.mxu1 %v84_v16  ;;  %259 = vmatprep.mubr.f32.mxu1 %v8033_v3  ;;  %v5684_v16 = vld [vmem:[%s8021_s3 + $0x28] sm:$0xff] }
  0x2c   :  { %4151 = vmatprep.subr.mxu1 %v81_v18  ;;  %606 = vmatprep.subr.mxu0 %v5195_v8  ;;  %8112 = vst [vmem:[#allocation9_spill] sm:$0xff] %v5684_v16 }
  0x2d   :  { %4152 = vmatpush3.msra.mxu1 %v81_v18  ;;  %607 = vmatpush1.msra.mxu0 %v5204_v10  ;;  %v5693_v18 = vld [vmem:[%s8021_s3 + $0x10] sm:$0xff] }
  0x2e   :  { %260 = vmatmul.mubr.f32.gmra.mxu1 %v5499_v20  ;;  %4153 = vmatprep.subr.mxu1 %v78_v22  ;;  %8113 = vst [vmem:[#allocation10_spill] sm:$0xff] %v5693_v18 }
  0x2f   :  { %4154 = vmatpush3.msra.mxu1 %v78_v22  ;;  %265 = vmatprep.mubr.f32.mxu1 %v8033_v3 }
  0x30   :  { %4155 = vmatprep.subr.mxu1 %v75_v24  ;;  %608 = vmatprep.subr.mxu0 %v5209_v11 }
  0x31   :  { %4156 = vmatpush3.msra.mxu1 %v75_v24  ;;  %609 = vmatpush1.msra.mxu0 %v5218_v13 }
  0x32   :  { %266 = vmatmul.mubr.f32.gmra.mxu1 %v157_v26  ;;  %4157 = vmatprep.subr.mxu1 %v72_v28 }
  0x33   :  { %4158 = vmatpush3.msra.mxu1 %v72_v28  ;;  %271 = vmatprep.mubr.f32.mxu1 %v8033_v3 }
  0x34   :  { %4159 = vmatprep.subr.mxu1 %v69_v30  ;;  %610 = vmatprep.subr.mxu0 %v5227_v15 }
  0x35   :  { %4160 = vmatpush3.msra.mxu1 %v69_v30  ;;  %611 = vmatpush1.msra.mxu0 %v5236_v17 }
  0x36   :  { %272 = vmatmul.mubr.f32.gmra.mxu1 %v158_v32  ;;  %4161 = vmatprep.subr.mxu1 %v66_v34 }
  0x37   :  { %4162 = vmatpush3.msra.mxu1 %v66_v34  ;;  %277 = vmatprep.mubr.f32.mxu1 %v8033_v3 }
  0x38   :  { %4163 = vmatprep.subr.mxu1 %v63_v36  ;;  %612 = vmatprep.subr.mxu0 %v5245_v19 }
  0x39   :  { %4164 = vmatpush3.msra.mxu1 %v63_v36  ;;  %613 = vmatpush1.msra.mxu0 %v5254_v21 }
  0x3a   :  { %278 = vmatmul.mubr.f32.gmra.mxu1 %v159_v38  ;;  %4165 = vmatprep.subr.mxu1 %v60_v40 }
  0x3b   :  { %4166 = vmatpush3.msra.mxu1 %v60_v40  ;;  %283 = vmatprep.mubr.f32.mxu1 %v8033_v3 }
  0x3c   :  { %4167 = vmatprep.subr.mxu1 %v57_v42  ;;  %614 = vmatprep.subr.mxu0 %v5263_v23 }
  0x3d   :  { %4168 = vmatpush3.msra.mxu1 %v57_v42  ;;  %615 = vmatpush1.msra.mxu0 %v5272_v25 }
  0x3e   :  { %284 = vmatmul.mubr.f32.gmra.mxu1 %v160_v44  ;;  %4169 = vmatprep.subr.mxu1 %v54_v46 }
  0x3f   :  { %4170 = vmatpush3.msra.mxu1 %v54_v46  ;;  %4173 = vmatprep.mubr.f32.mxu1 %v5449_v0  ;;  %v5621_v0 = vld [vmem:[%s8021_s3 + $0xd0] sm:$0xff] }
  0x40   :  { %4171 = vmatprep.subr.mxu1 %v51_v48  ;;  %616 = vmatprep.subr.mxu0 %v5281_v27 }
  0x41   :  { %4172 = vmatpush3.msra.mxu1 %v51_v48  ;;  %617 = vmatpush1.msra.mxu0 %v5290_v29 }
  0x42   :  { %4174 = vmatmul.mubr.f32.vlgmr.msra.gmra.mxu1 %v5469_v7  ;;  %4185 = vmatprep.subr.mxu1 %v8033_v3  ;;  %v5648_v7 = vld [vmem:[%s8021_s3 + $0x88] sm:$0xff] }
  0x43   :  { %4186 = vmatpush3.msra.mxu1 %v5562_v50  ;;  %4176 = vmatprep.mubr.f32.mxu1 %v5484_v14  ;;  %v5675_v14 = vld [vmem:[%s8021_s3 + $0x40] sm:$0xff] }
  0x44   :  { %4187 = vmatprep.subr.mxu1 %v8033_v3  ;;  %618 = vmatprep.subr.mxu0 %v5299_v31 }
  0x45   :  { %4188 = vmatpush3.msra.mxu1 %v5571_v52  ;;  %619 = vmatpush1.msra.mxu0 %v5308_v33 }
  0x46   :  { %4189 = vmatprep.subr.mxu1 %v8033_v3  ;;  %4177 = vmatmul.mubr.f32.gmra.mxu1 %v5499_v20  ;;  %v162_v20 = vlaneseq }
  0x47   :  { %4190 = vmatpush3.msra.mxu1 %v5579_v54  ;;  %4179 = vmatprep.mubr.f32.mxu1 %v157_v26  ;;  %v145_v26 = vld [vmem:[%s8023_s4] sm:$0x7] }
  0x48   :  { %4191 = vmatprep.subr.mxu1 %v8033_v3  ;;  %620 = vmatprep.subr.mxu0 %v5317_v35  ;;  %v5734_v22 = vshrl.u32 %v162_v20, 7 }
  0x49   :  { %4192 = vmatpush3.msra.mxu1 %v5588_v56  ;;  %621 = vmatpush1.msra.mxu0 %v5326_v37 }
  0x4a   :  { %4193 = vmatprep.subr.mxu1 %v8033_v3  ;;  %4180 = vmatmul.mubr.f32.gmra.mxu1 %v158_v32  ;;  %8114 = vst [vmem:[#allocation11_spill] sm:$0xff] %v5734_v22  ;;  %v8040_v24 = vsub.s32 0, %v5734_v22  ;;  %v8045_v30 = vsub.s32 1, %v5734_v22 }
  0x4b   :  { %4194 = vmatpush3.msra.mxu1 %v5596_v58  ;;  %4182 = vmatprep.mubr.f32.mxu1 %v159_v38 }
  0x4c   :  { %4195 = vmatprep.subr.mxu1 %v8033_v3  ;;  %622 = vmatprep.subr.mxu0 %v5335_v39  ;;  %v165_v34 = vrot.slane %v145_v26, %v8040_v24  ;;  %v169_v38 = vrot.slane %v145_v26, %v8045_v30 }
  0x4d   :  { %4196 = vmatpush3.msra.mxu1 %v5605_v60  ;;  %623 = vmatpush1.msra.mxu0 %v5344_v41 }
  0x4e   :  { %4197 = vmatprep.subr.mxu1 %v8033_v3  ;;  %4183 = vmatmul.mubr.f32.gmra.mxu1 %v160_v44 }
  0x4f   :  { %4198 = vmatpush3.msra.mxu1 %v5612_v62  ;;  %4217 = vmatprep.mubr.msk.f32.mxu1 %vm5097_vm0, %v8033_v3 }
  0x50   :  { %4199 = vmatprep.subr.mxu1 %v8033_v3  ;;  %624 = vmatprep.subr.mxu0 %v5353_v43 }
  0x51   :  { %4200 = vmatpush3.msra.mxu1 %v5621_v0  ;;  %625 = vmatpush1.msra.mxu0 %v5362_v45 }
  0x52   :  { %4201 = vmatprep.subr.mxu1 %v8033_v3  ;;  %626 = vmatprep.subr.mxu0 %v5371_v47 }
  0x53   :  { %4202 = vmatpush3.msra.mxu1 %v5630_v1  ;;  %627 = vmatpush1.msra.mxu0 %v5380_v49 }
  0x54   :  { %4203 = vmatprep.subr.mxu1 %v8033_v3  ;;  %628 = vmatprep.subr.mxu0 %v5389_v51 }
  0x55   :  { %4204 = vmatpush3.msra.mxu1 %v5639_v5  ;;  %629 = vmatpush1.msra.mxu0 %v5398_v53 }
  0x56   :  { %4205 = vmatprep.subr.mxu1 %v8033_v3  ;;  %630 = vmatprep.subr.mxu0 %v5407_v55 }
  0x57   :  { %4206 = vmatpush3.msra.mxu1 %v5648_v7  ;;  %631 = vmatpush1.msra.mxu0 %v5416_v57 }
  0x58   :  { %4207 = vmatprep.subr.mxu1 %v8033_v3  ;;  %632 = vmatprep.subr.mxu0 %v5425_v59 }
  0x59   :  { %4208 = vmatpush3.msra.mxu1 %v5657_v9  ;;  %633 = vmatpush1.msra.mxu0 %v5434_v61 }
  0x5a   :  { %4209 = vmatprep.subr.mxu1 %v8033_v3  ;;  %634 = vmatprep.subr.mxu0 %v5443_v63 }
  0x5b   :  { %4210 = vmatpush3.msra.mxu1 %v5666_v12  ;;  %635 = vmatpush1.msra.mxu0 %v5458_v2 }
  0x5c   :  { %4211 = vmatprep.subr.mxu1 %v8033_v3  ;;  %668 = vmatprep.mubr.f32.mxu0 %v8033_v3 }
  0x5d   :  { %4212 = vmatpush3.msra.mxu1 %v5675_v14  ;;  %784 = vmatprep.subr.mxu0 %v5178_v4 }
  0x5e   :  { %4213 = vmatprep.subr.mxu1 %v8033_v3 }
  0x5f   :  { %4214 = vmatpush3.msra.mxu1 %v5684_v16 }
  0x60   :  { %4215 = vmatprep.subr.mxu1 %v8033_v3 }
  0x61   :  { %4216 = vmatpush3.msra.mxu1 %v5693_v18 }
  0x62   :  { %4218 = vmatmul.mubr.f32.vlgmr.msra.gmra.mxu1 %v8033_v3  ;;  %4220 = vmatprep.subr.mxu1 %v8033_v3 }
  0x63   :  { %4221 = vmatpush3.msra.mxu1 %v5562_v50  ;;  %4252 = vmatprep.mubr.msk.f32.mxu1 %vm5097_vm0, %v8033_v3 }
  0x64   :  { %4222 = vmatprep.subr.mxu1 %v8033_v3 }
  0x65   :  { %4223 = vmatpush3.msra.mxu1 %v5571_v52 }
  0x66   :  { %4224 = vmatprep.subr.mxu1 %v8033_v3 }
  0x67   :  { %4225 = vmatpush3.msra.mxu1 %v5579_v54 }
  0x68   :  { %4226 = vmatprep.subr.mxu1 %v8033_v3 }
  0x69   :  { %4227 = vmatpush3.msra.mxu1 %v5588_v56 }
  0x6a   :  { %4228 = vmatprep.subr.mxu1 %v8033_v3 }
  0x6b   :  { %4229 = vmatpush3.msra.mxu1 %v5596_v58 }
  0x6c   :  { %4230 = vmatprep.subr.mxu1 %v8033_v3 }
  0x6d   :  { %4231 = vmatpush3.msra.mxu1 %v5605_v60 }
  0x6e   :  { %4232 = vmatprep.subr.mxu1 %v8033_v3 }
  0x6f   :  { %4233 = vmatpush3.msra.mxu1 %v5612_v62 }
  0x70   :  { %4234 = vmatprep.subr.mxu1 %v8033_v3 }
  0x71   :  { %4235 = vmatpush3.msra.mxu1 %v5621_v0 }
  0x72   :  { %4236 = vmatprep.subr.mxu1 %v8033_v3 }
  0x73   :  { %4237 = vmatpush3.msra.mxu1 %v5630_v1 }
  0x74   :  { %4238 = vmatprep.subr.mxu1 %v8033_v3 }
  0x75   :  { %4239 = vmatpush3.msra.mxu1 %v5639_v5 }
  0x76   :  { %4240 = vmatprep.subr.mxu1 %v8033_v3 }
  0x77   :  { %4241 = vmatpush3.msra.mxu1 %v5648_v7 }
  0x78   :  { %4242 = vmatprep.subr.mxu1 %v8033_v3 }
  0x79   :  { %4243 = vmatpush3.msra.mxu1 %v5657_v9 }
  0x7a   :  { %4244 = vmatprep.subr.mxu1 %v8033_v3 }
  0x7b   :  { %4245 = vmatpush3.msra.mxu1 %v5666_v12 }
  0x7c   :  { %4246 = vmatprep.subr.mxu1 %v8033_v3 }
  0x7d   :  { %4247 = vmatpush3.msra.mxu1 %v5675_v14 }
  0x7e   :  { %4248 = vmatprep.subr.mxu1 %v8033_v3 }
  0x7f   :  { %4249 = vmatpush3.msra.mxu1 %v5684_v16 }
  0x80   :  { %4250 = vmatprep.subr.mxu1 %v8033_v3 }
  0x81   :  { %4251 = vmatpush3.msra.mxu1 %v5693_v18 }
  0x82   :  { %4255 = vmatprep.subr.mxu1 %v8033_v3 }
  0xe2   :  { %v243_v28 = vpop.f32.mrf.mxu1 }
  0xe4   :  { %v245_v32 = vpop.f32.mrf.mxu1 }
  0xe6   :  { %v249_v36 = vpop.f32.mrf.mxu1 }
  0xe7   :  { %v5745_v40 = vadd.f32 %v249_v36, %v165_v34 }
  0xe8   :  { %v251_v42 = vpop.f32.mrf.mxu1 }
  0xe9   :  { %8115 = vst [vmem:[#allocation12_spill] sm:$0xff] %v5745_v40  ;;  %v5747_v44 = vadd.f32 %v251_v42, %v169_v38 }
  0xea   :  { %v255_v46 = vpop.f32.mrf.mxu1 }
  0xeb   :  { %8116 = vst [vmem:[#allocation13_spill] sm:$0xff] %v5747_v44  ;;  %v5749_v48 = vadd.f32 %v255_v46, %v165_v34  ;;  %v244_v44 = vadd.f32 %v243_v28, %v165_v34  ;;  %v492_v46 = vpop.f32.mrf.mxu0 }
  0xec   :  { %v257_v20 = vpop.f32.mrf.mxu1 }
  0xed   :  { %8117 = vst [vmem:[#allocation14_spill] sm:$0xff] %v5749_v48  ;;  %v5751_v3 = vadd.f32 %v257_v20, %v169_v38 }
  0xee   :  { %v261_v4 = vpop.f32.mrf.mxu1 }
  0xef   :  { %8118 = vst [vmem:[#allocation15_spill] sm:$0xff] %v5751_v3  ;;  %v5753_v18 = vadd.f32 %v261_v4, %v165_v34  ;;  %v567_v4 = vadd.f32 %v492_v46, %v244_v44  ;;  %v246_v46 = vadd.f32 %v245_v32, %v169_v38 }
  0xf0   :  { %v263_v2 = vpop.f32.mrf.mxu1 }
  0xf1   :  { %8119 = vst [vmem:[#allocation16_spill] sm:$0xff] %v5753_v18  ;;  %v5755_v24 = vadd.f32 %v263_v2, %v169_v38  ;;  %v8048_v2 = vsub.s32 2, %v5734_v22 }
  0xf2   :  { %v267_v63 = vpop.f32.mrf.mxu1 }
  0xf3   :  { %8120 = vst [vmem:[#allocation17_spill] sm:$0xff] %v5755_v24  ;;  %v5757_v16 = vadd.f32 %v267_v63, %v165_v34  ;;  %v173_v28 = vrot.slane %v145_v26, %v8048_v2 }
  0xf4   :  { %v269_v36 = vpop.f32.mrf.mxu1 }
  0xf5   :  { %8121 = vst [vmem:[#allocation18_spill] sm:$0xff] %v5757_v16  ;;  %v5759_v30 = vadd.f32 %v269_v36, %v169_v38  ;;  %v3731_v36 = vmul.f32 -1.442695, %v567_v4 }
  0xf6   :  { %v273_v42 = vpop.f32.mrf.mxu1 }
  0xf7   :  { %8122 = vst [vmem:[#allocation19_spill] sm:$0xff] %v5759_v30  ;;  %v5761_v40 = vadd.f32 %v273_v42, %v165_v34  ;;  %4838 = vpow2.f32 %v3731_v36 }
  0xf8   :  { %v275_v48 = vpop.f32.mrf.mxu1 }
  0xf9   :  { %8123 = vst [vmem:[#allocation20_spill] sm:$0xff] %v5761_v40  ;;  %v5763_v20 = vadd.f32 %v275_v48, %v169_v38 }
  0xfa   :  { %v279_v3 = vpop.f32.mrf.mxu1 }
  0xfb   :  { %8124 = vst [vmem:[#allocation21_spill] sm:$0xff] %v5763_v20  ;;  %v5765_v18 = vadd.f32 %v279_v3, %v165_v34 }
  0xfc   :  { %v281_v24 = vpop.f32.mrf.mxu1 }
  0xfd   :  { %8125 = vst [vmem:[#allocation22_spill] sm:$0xff] %v5765_v18  ;;  %v5768_v63 = vadd.f32 %v281_v24, %v169_v38  ;;  %v494_v18 = vpop.f32.mrf.mxu0 }
  0xfe   :  { %v285_v16 = vpop.f32.mrf.mxu1  ;;  %v574_v4 = vadd.f32 %v494_v18, %v246_v46 }
  0xff   :  { %8126 = vst [vmem:[#allocation23_spill] sm:$0xff] %v5768_v63  ;;  %v5770_v30 = vadd.f32 %v285_v16, %v165_v34 }
 0x100   :  { %v287_v42 = vpop.f32.mrf.mxu1 }
 0x101   :  { %8127 = vst [vmem:[#allocation24_spill] sm:$0xff] %v5770_v30  ;;  %v5774_v40 = vadd.f32 %v287_v42, %v169_v38  ;;  %v3732_v42 = vmul.f32 -1.442695, %v574_v4 }
 0x102   :  { %v4175_v48 = vpop.f32.mrf.mxu1 }
 0x103   :  { %8128 = vst [vmem:[#allocation25_spill] sm:$0xff] %v5774_v40  ;;  %v5776_v44 = vadd.f32 %v4175_v48, %v173_v28  ;;  %4840 = vpow2.f32 %v3732_v42 }
 0x104   :  { %v356_v3 = vpop.f32.mrf.mxu1  ;;  %v4839_v40 = vpop.eup %4838 }
 0x106   :  { %v4178_v20 = vpop.f32.mrf.mxu1 }
 0x107   :  { %v5778_v24 = vadd.f32 %v4178_v20, %v173_v28  ;;  %v571_v20 = vadd.f32 1.0, %v4839_v40 }
 0x108   :  { %v366_v63 = vpop.f32.mrf.mxu1 }
 0x109   :  { %8129 = vst [vmem:[#allocation26_spill] sm:$0xff] %v5778_v24  ;;  %v5780_v16 = vadd.f32 %v366_v63, %v173_v28  ;;  %4842 = vrcp.f32 %v571_v20  ;;  %v5793_v63 = vld [vmem:[%s8024_s5] ss:$0 sm:$0xff] }
 0x10a   :  { %v4181_v34 = vpop.f32.mrf.mxu1 }
 0x10b   :  { %8130 = vst [vmem:[#allocation27_spill] sm:$0xff] %v5780_v16  ;;  %v5782_v22 = vadd.f32 %v4181_v34, %v173_v28 }
 0x10c   :  { %v376_v26 = vpop.f32.mrf.mxu1 }
 0x10d   :  { %8131 = vst [vmem:[#allocation28_spill] sm:$0xff] %v5782_v22  ;;  %v5784_v2 = vadd.f32 %v376_v26, %v173_v28 }
 0x10e   :  { %v4184_v36 = vpop.f32.mrf.mxu1 }
 0x10f   :  { %8132 = vst [vmem:[#allocation29_spill] sm:$0xff] %v5784_v2  ;;  %v5786_v48 = vadd.f32 %v4184_v36, %v173_v28 }
 0x110   :  { %v386_v32 = vpop.f32.mrf.mxu1  ;;  %v4841_v18 = vpop.eup %4840 }
 0x111   :  { %8133 = vst [vmem:[#allocation30_spill] sm:$0xff] %v5786_v48  ;;  %v5788_v38 = vadd.f32 %v386_v32, %v173_v28  ;;  %v578_v46 = vadd.f32 1.0, %v4841_v18  ;;  %v357_v48 = vadd.f32 %v356_v3, %v173_v28  ;;  %v8136_v28 = vmov 0.0   ;;  %v8139_v3 = vld [vmem:[#allocation8_spill] sm:$0xff] }
 0x113   :  { %8134 = vst [vmem:[#allocation31_spill] sm:$0xff] %v5788_v38  ;;  %4844 = vrcp.f32 %v578_v46 }
 0x116   :  { %v4843_v26 = vpop.eup %4842 }
 0x120   :  { %v4845_v32 = vpop.eup %4844 }
 0x121   :  { %v585_v40 = vsub.f32 1.0, %v4845_v32  ;;  %v587_v22 = vmul.f32 0.0, %v4845_v32  ;;  %v8143_v32 = vld [vmem:[#allocation13_spill] sm:$0xff] }
 0x122   :  { %v563_v4 = vpop.f32.mrf.mxu1 }
 0x123   :  { %v581_v34 = vadd.f32 %v5793_v63, %v563_v4  ;;  %v8142_v4 = vld [vmem:[#allocation12_spill] sm:$0xff] }
 0x124   :  { %v4219_v36 = vpop.f32.mrf.mxu1 }
 0x125   :  { %v582_v30 = vmul.f32 %v4843_v26, %v581_v34 }
 0x127   :  { %v583_v42 = vadd.f32 %v582_v30, %v357_v48  ;;  %v8138_v30 = vld [vmem:[#allocation7_spill] sm:$0xff]  ;;  %v8140_v48 = vld [vmem:[#allocation10_spill] sm:$0xff] }
 0x129   :  { %4846 = vtanh.f32 %v583_v42 }
 0x136   :  { %v4847_v20 = vpop.eup %4846 }
 0x137   :  { %v586_v38 = vmul.f32 %v4847_v20, %v585_v40 }
 0x139   :  { %v5796_v2 = vadd.f32 %v587_v22, %v586_v38  ;;  %v8137_v22 = vld [vmem:[#allocation9_spill] sm:$0xff]  ;;  %v8141_v38 = vld [vmem:[#allocation6_spill] sm:$0xff] }
 0x13b   :  { %8135 = vst [vmem:[#allocation32_spill] sm:$0xff] %v5796_v2  ;;  %669 = vmatmul.mubr.f32.vlgmr.msra.gmra.mxu0 %v5796_v2  ;;  %4253 = vmatmul.mubr.f32.vlgmr.msra.gmra.mxu1 %v5796_v2 }
 0x13c   :  { %785 = vmatpush1.msra.mxu0 %v5186_v6  ;;  %4256 = vmatpush3.msra.mxu1 %v5562_v50 }
 0x13d   :  { %786 = vmatprep.subr.mxu0 %v5195_v8  ;;  %4257 = vmatprep.subr.mxu1 %v8136_v28 }
 0x13e   :  { %787 = vmatpush1.msra.mxu0 %v5204_v10  ;;  %4258 = vmatpush3.msra.mxu1 %v5571_v52 }
 0x13f   :  { %788 = vmatprep.subr.mxu0 %v5209_v11  ;;  %4259 = vmatprep.subr.mxu1 %v8136_v28 }
 0x140   :  { %789 = vmatpush1.msra.mxu0 %v5218_v13  ;;  %4260 = vmatpush3.msra.mxu1 %v5579_v54 }
 0x141   :  { %790 = vmatprep.subr.mxu0 %v5227_v15  ;;  %4261 = vmatprep.subr.mxu1 %v8136_v28 }
 0x142   :  { %791 = vmatpush1.msra.mxu0 %v5236_v17  ;;  %4262 = vmatpush3.msra.mxu1 %v5588_v56 }
 0x143   :  { %792 = vmatprep.subr.mxu0 %v5245_v19  ;;  %4263 = vmatprep.subr.mxu1 %v8136_v28 }
 0x144   :  { %793 = vmatpush1.msra.mxu0 %v5254_v21  ;;  %4264 = vmatpush3.msra.mxu1 %v5596_v58 }
 0x145   :  { %794 = vmatprep.subr.mxu0 %v5263_v23  ;;  %4265 = vmatprep.subr.mxu1 %v8136_v28 }
 0x146   :  { %795 = vmatpush1.msra.mxu0 %v5272_v25  ;;  %4266 = vmatpush3.msra.mxu1 %v5605_v60 }
 0x147   :  { %796 = vmatprep.subr.mxu0 %v5281_v27  ;;  %4267 = vmatprep.subr.mxu1 %v8136_v28 }
 0x148   :  { %797 = vmatpush1.msra.mxu0 %v5290_v29  ;;  %4268 = vmatpush3.msra.mxu1 %v5612_v62 }
 0x149   :  { %798 = vmatprep.subr.mxu0 %v5299_v31  ;;  %4269 = vmatprep.subr.mxu1 %v8136_v28 }
 0x14a   :  { %799 = vmatpush1.msra.mxu0 %v5308_v33  ;;  %4270 = vmatpush3.msra.mxu1 %v5621_v0 }
 0x14b   :  { %800 = vmatprep.subr.mxu0 %v5317_v35  ;;  %4271 = vmatprep.subr.mxu1 %v8136_v28 }
 0x14c   :  { %801 = vmatpush1.msra.mxu0 %v5326_v37  ;;  %4272 = vmatpush3.msra.mxu1 %v5630_v1 }
 0x14d   :  { %802 = vmatprep.subr.mxu0 %v5335_v39  ;;  %4273 = vmatprep.subr.mxu1 %v8136_v28 }
 0x14e   :  { %803 = vmatpush1.msra.mxu0 %v5344_v41  ;;  %4274 = vmatpush3.msra.mxu1 %v5639_v5 }
 0x14f   :  { %804 = vmatprep.subr.mxu0 %v5353_v43  ;;  %4275 = vmatprep.subr.mxu1 %v8136_v28 }
 0x150   :  { %805 = vmatpush1.msra.mxu0 %v5362_v45  ;;  %4276 = vmatpush3.msra.mxu1 %v5648_v7 }
 0x151   :  { %806 = vmatprep.subr.mxu0 %v5371_v47  ;;  %4277 = vmatprep.subr.mxu1 %v8136_v28 }
 0x152   :  { %807 = vmatpush1.msra.mxu0 %v5380_v49  ;;  %4278 = vmatpush3.msra.mxu1 %v5657_v9 }
 0x153   :  { %808 = vmatprep.subr.mxu0 %v5389_v51  ;;  %4279 = vmatprep.subr.mxu1 %v8136_v28 }
 0x154   :  { %809 = vmatpush1.msra.mxu0 %v5398_v53  ;;  %4280 = vmatpush3.msra.mxu1 %v5666_v12 }
 0x155   :  { %810 = vmatprep.subr.mxu0 %v5407_v55  ;;  %4281 = vmatprep.subr.mxu1 %v8136_v28 }
 0x156   :  { %811 = vmatpush1.msra.mxu0 %v5416_v57  ;;  %4282 = vmatpush3.msra.mxu1 %v5675_v14 }
 0x157   :  { %812 = vmatprep.subr.mxu0 %v5425_v59  ;;  %4283 = vmatprep.subr.mxu1 %v8136_v28 }
 0x158   :  { %813 = vmatpush1.msra.mxu0 %v5434_v61  ;;  %4284 = vmatpush3.msra.mxu1 %v8137_v22 }
 0x159   :  { %814 = vmatprep.subr.mxu0 %v8138_v30  ;;  %4285 = vmatprep.subr.mxu1 %v8136_v28 }
 0x15a   :  { %815 = vmatpush1.msra.mxu0 %v8139_v3  ;;  %848 = vmatprep.mubr.f32.mxu0 %v8136_v28 }
 0x15b   :  { %4286 = vmatpush3.msra.mxu1 %v8140_v48  ;;  %4287 = vmatprep.mubr.msk.f32.mxu1 %vm5097_vm0, %v8136_v28 }
 0x15c   :  { %964 = vmatprep.subr.mxu0 %v8141_v38  ;;  %4290 = vmatprep.subr.mxu1 %v8136_v28 }
 0x1fb   :  { %v670_v18 = vpop.f32.mrf.mxu0  ;;  %v741_v46 = vpop.f32.mrf.mxu1 }
 0x1fc   :  { %v745_v34 = vadd.f32 %v670_v18, %v8142_v4  ;;  %v759_v38 = vadd.f32 %v5793_v63, %v741_v46  ;;  %v6002_v46 = vld [vmem:[%s8021_s3 + $0x120] sm:$0xff] }
 0x1fd   :  { %v4254_v26 = vpop.f32.mrf.mxu1  ;;  %v672_v42 = vpop.f32.mrf.mxu0 }
 0x1fe   :  { %v3734_v36 = vmul.f32 -1.442695, %v745_v34  ;;  %v752_v40 = vadd.f32 %v672_v42, %v8143_v32 }
 0x200   :  { %4848 = vpow2.f32 %v3734_v36  ;;  %v3735_v20 = vmul.f32 -1.442695, %v752_v40  ;;  %v6009_v40 = vld [vmem:[%s8021_s3 + $0x110] sm:$0xff] }
 0x202   :  { %4850 = vpow2.f32 %v3735_v20  ;;  %v6016_v20 = vld [vmem:[%s8021_s3 + $0x108] sm:$0xff] }
 0x20d   :  { %v4849_v24 = vpop.eup %4848 }
 0x20e   :  { %v749_v16 = vadd.f32 1.0, %v4849_v24  ;;  %v5960_v24 = vld [vmem:[%s8021_s3 + $0x168] sm:$0xff] }
 0x20f   :  { %v4851_v48 = vpop.eup %4850 }
 0x210   :  { %4852 = vrcp.f32 %v749_v16  ;;  %v756_v3 = vadd.f32 1.0, %v4851_v48  ;;  %v5967_v16 = vld [vmem:[%s8021_s3 + $0x158] sm:$0xff]  ;;  %v5995_v48 = vld [vmem:[%s8021_s3 + $0x128] sm:$0xff] }
 0x212   :  { %4854 = vrcp.f32 %v756_v3  ;;  %v5988_v3 = vld [vmem:[%s8021_s3 + $0x138] sm:$0xff] }
 0x21d   :  { %v4853_v30 = vpop.eup %4852 }
 0x21e   :  { %v760_v22 = vmul.f32 %v4853_v30, %v759_v38  ;;  %v5981_v30 = vld [vmem:[%s8021_s3 + $0x140] sm:$0xff]  ;;  %v6023_v38 = vld [vmem:[%s8021_s3 + $0xf8] sm:$0xff] }
 0x21f   :  { %v4855_v4 = vpop.eup %4854 }
 0x220   :  { %v761_v18 = vadd.f32 %v760_v22, %v5776_v44  ;;  %v763_v34 = vsub.f32 1.0, %v4855_v4  ;;  %v765_v42 = vmul.f32 %v4855_v4, %v5796_v2  ;;  %v5974_v22 = vld [vmem:[%s8021_s3 + $0x150] sm:$0xff]  ;;  %v6037_v4 = vld [vmem:[%s8021_s3 + $0xe0] sm:$0xff] }
 0x222   :  { %4856 = vtanh.f32 %v761_v18  ;;  %v6030_v18 = vld [vmem:[%s8021_s3 + $0xf0] sm:$0xff] }
 0x22f   :  { %v4857_v26 = vpop.eup %4856 }
 0x230   :  { %v764_v36 = vmul.f32 %v4857_v26, %v763_v34  ;;  %v6044_v34 = vld [vmem:[%s8021_s3 + $0xd8] sm:$0xff]  ;;  %v6051_v26 = vld [vmem:[%s8021_s3 + $0xc8] sm:$0xff] }
 0x232   :  { %v5872_v32 = vadd.f32 %v765_v42, %v764_v36  ;;  %v6058_v36 = vld [vmem:[%s8021_s3 + $0xc0] sm:$0xff]  ;;  %v6065_v42 = vld [vmem:[%s8021_s3 + $0xb0] sm:$0xff] }
 0x234   :  { %8144 = vst [vmem:[#allocation6_spill] sm:$0xff] %v5872_v32  ;;  %849 = vmatmul.mubr.f32.vlgmr.msra.gmra.mxu0 %v5872_v32  ;;  %4288 = vmatmul.mubr.f32.vlgmr.msra.gmra.mxu1 %v5872_v32 }
 0x235   :  { %965 = vmatpush1.msra.mxu0 %v5186_v6  ;;  %4291 = vmatpush3.msra.mxu1 %v5562_v50  ;;  %v8145_v6 = vld [vmem:[#allocation9_spill] sm:$0xff] }
 0x236   :  { %966 = vmatprep.subr.mxu0 %v5195_v8  ;;  %4292 = vmatprep.subr.mxu1 %v8136_v28  ;;  %v8146_v8 = vld [vmem:[#allocation7_spill] sm:$0xff] }
 0x237   :  { %967 = vmatpush1.msra.mxu0 %v5204_v10  ;;  %4293 = vmatpush3.msra.mxu1 %v5571_v52  ;;  %v8147_v10 = vld [vmem:[#allocation8_spill] sm:$0xff] }
 0x238   :  { %968 = vmatprep.subr.mxu0 %v5209_v11  ;;  %4294 = vmatprep.subr.mxu1 %v8136_v28  ;;  %v8148_v11 = vld [vmem:[#allocation10_spill] sm:$0xff] }
 0x239   :  { %969 = vmatpush1.msra.mxu0 %v5218_v13  ;;  %4295 = vmatpush3.msra.mxu1 %v5579_v54  ;;  %v5944_v13 = vld [vmem:[%s8021_s3 + $0x170] sm:$0xff] }
 0x23a   :  { %970 = vmatprep.subr.mxu0 %v5227_v15  ;;  %4296 = vmatprep.subr.mxu1 %v8136_v28  ;;  %8149 = vst [vmem:[#allocation12_spill] sm:$0xff] %v5944_v13 }
 0x23b   :  { %971 = vmatpush1.msra.mxu0 %v5236_v17  ;;  %4297 = vmatpush3.msra.mxu1 %v5588_v56 }
 0x23c   :  { %972 = vmatprep.subr.mxu0 %v5245_v19  ;;  %4298 = vmatprep.subr.mxu1 %v8136_v28  ;;  %v8150_v19 = vld [vmem:[#allocation14_spill] sm:$0xff] }
 0x23d   :  { %973 = vmatpush1.msra.mxu0 %v5254_v21  ;;  %4299 = vmatpush3.msra.mxu1 %v5596_v58 }
 0x23e   :  { %974 = vmatprep.subr.mxu0 %v5263_v23  ;;  %4300 = vmatprep.subr.mxu1 %v8136_v28 }
 0x23f   :  { %975 = vmatpush1.msra.mxu0 %v5272_v25  ;;  %4301 = vmatpush3.msra.mxu1 %v5605_v60 }
 0x240   :  { %976 = vmatprep.subr.mxu0 %v5281_v27  ;;  %4302 = vmatprep.subr.mxu1 %v8136_v28 }
 0x241   :  { %977 = vmatpush1.msra.mxu0 %v5290_v29  ;;  %4303 = vmatpush3.msra.mxu1 %v5612_v62  ;;  %v8151_v29 = vld [vmem:[#allocation15_spill] sm:$0xff] }
 0x242   :  { %978 = vmatprep.subr.mxu0 %v5299_v31  ;;  %4304 = vmatprep.subr.mxu1 %v8136_v28 }
 0x243   :  { %979 = vmatpush1.msra.mxu0 %v5308_v33  ;;  %4305 = vmatpush3.msra.mxu1 %v5621_v0 }
 0x244   :  { %980 = vmatprep.subr.mxu0 %v5317_v35  ;;  %4306 = vmatprep.subr.mxu1 %v8136_v28 }
 0x245   :  { %981 = vmatpush1.msra.mxu0 %v5326_v37  ;;  %4307 = vmatpush3.msra.mxu1 %v5630_v1 }
 0x246   :  { %982 = vmatprep.subr.mxu0 %v5335_v39  ;;  %4308 = vmatprep.subr.mxu1 %v8136_v28 }
 0x247   :  { %983 = vmatpush1.msra.mxu0 %v5344_v41  ;;  %4309 = vmatpush3.msra.mxu1 %v5639_v5 }
 0x248   :  { %984 = vmatprep.subr.mxu0 %v5353_v43  ;;  %4310 = vmatprep.subr.mxu1 %v8136_v28 }
 0x249   :  { %985 = vmatpush1.msra.mxu0 %v5362_v45  ;;  %4311 = vmatpush3.msra.mxu1 %v5648_v7 }
 0x24a   :  { %986 = vmatprep.subr.mxu0 %v5371_v47  ;;  %4312 = vmatprep.subr.mxu1 %v8136_v28 }
 0x24b   :  { %987 = vmatpush1.msra.mxu0 %v5380_v49  ;;  %4313 = vmatpush3.msra.mxu1 %v5657_v9  ;;  %v8152_v49 = vld [vmem:[#allocation27_spill] sm:$0xff] }
 0x24c   :  { %988 = vmatprep.subr.mxu0 %v5389_v51  ;;  %4314 = vmatprep.subr.mxu1 %v8136_v28 }
 0x24d   :  { %989 = vmatpush1.msra.mxu0 %v5398_v53  ;;  %4315 = vmatpush3.msra.mxu1 %v5666_v12 }
 0x24e   :  { %990 = vmatprep.subr.mxu0 %v5407_v55  ;;  %4316 = vmatprep.subr.mxu1 %v8136_v28 }
 0x24f   :  { %991 = vmatpush1.msra.mxu0 %v5416_v57  ;;  %4317 = vmatpush3.msra.mxu1 %v5675_v14 }
 0x250   :  { %992 = vmatprep.subr.mxu0 %v5425_v59  ;;  %4318 = vmatprep.subr.mxu1 %v8136_v28 }
 0x251   :  { %993 = vmatpush1.msra.mxu0 %v5434_v61  ;;  %4319 = vmatpush3.msra.mxu1 %v8145_v6 }
 0x252   :  { %994 = vmatprep.subr.mxu0 %v8146_v8  ;;  %4320 = vmatprep.subr.mxu1 %v8136_v28  ;;  %v6072_v8 = vld [vmem:[%s8021_s3 + $0xa8] sm:$0xff] }
 0x253   :  { %995 = vmatpush1.msra.mxu0 %v8147_v10  ;;  %1028 = vmatprep.mubr.f32.mxu0 %v8136_v28  ;;  %v6079_v10 = vld [vmem:[%s8021_s3 + $0x98] sm:$0xff] }
 0x254   :  { %4321 = vmatpush3.msra.mxu1 %v8148_v11  ;;  %4322 = vmatprep.mubr.msk.f32.mxu1 %vm5097_vm0, %v8136_v28 }
 0x255   :  { %1144 = vmatprep.subr.mxu0 %v5944_v13  ;;  %4325 = vmatprep.subr.mxu1 %v8136_v28 }
 0x2f4   :  { %v850_v15 = vpop.f32.mrf.mxu0  ;;  %v921_v17 = vpop.f32.mrf.mxu1 }
 0x2f5   :  { %v925_v21 = vadd.f32 %v850_v15, %v8150_v19  ;;  %v939_v43 = vadd.f32 %v5793_v63, %v921_v17  ;;  %v6086_v15 = vld [vmem:[%s8021_s3 + $0x90] sm:$0xff]  ;;  %v6093_v17 = vld [vmem:[%s8021_s3 + $0x80] sm:$0xff]  ;;  %v6100_v19 = vld [vmem:[%s8021_s3 + $0x78] sm:$0xff] }
 0x2f6   :  { %v4289_v23 = vpop.f32.mrf.mxu1  ;;  %v852_v27 = vpop.f32.mrf.mxu0 }
 0x2f7   :  { %v3737_v25 = vmul.f32 -1.442695, %v925_v21  ;;  %v932_v31 = vadd.f32 %v852_v27, %v8151_v29  ;;  %v6107_v21 = vld [vmem:[%s8021_s3 + $0x68] sm:$0xff]  ;;  %v6114_v23 = vld [vmem:[%s8021_s3 + $0x60] sm:$0xff]  ;;  %v6135_v29 = vld [vmem:[%s8021_s3 + $0x38] sm:$0xff] }
 0x2f8   :  { %v6128_v27 = vld [vmem:[%s8021_s3 + $0x48] sm:$0xff] }
 0x2f9   :  { %4858 = vpow2.f32 %v3737_v25  ;;  %v3738_v33 = vmul.f32 -1.442695, %v932_v31  ;;  %v6121_v25 = vld [vmem:[%s8021_s3 + $0x50] sm:$0xff] }
 0x2fa   :  { %v6142_v31 = vld [vmem:[%s8021_s3 + $0x30] sm:$0xff] }
 0x2fb   :  { %4860 = vpow2.f32 %v3738_v33  ;;  %v6149_v33 = vld [vmem:[%s8021_s3 + $0x20] sm:$0xff] }
 0x306   :  { %v4859_v35 = vpop.eup %4858 }
 0x307   :  { %v929_v37 = vadd.f32 1.0, %v4859_v35  ;;  %v6156_v35 = vld [vmem:[%s8021_s3 + $0x18] sm:$0xff] }
 0x308   :  { %v4861_v39 = vpop.eup %4860 }
 0x309   :  { %4862 = vrcp.f32 %v929_v37  ;;  %v936_v41 = vadd.f32 1.0, %v4861_v39  ;;  %v6163_v37 = vld [vmem:[%s8021_s3 + $0x8] sm:$0xff]  ;;  %v6170_v39 = vld [vmem:[%s8021_s3] sm:$0xff] }
 0x30a   :  { %8154 = vst [vmem:[#allocation7_spill] sm:$0xff] %v6163_v37  ;;  %8155 = vst [vmem:[#allocation8_spill] sm:$0xff] %v6170_v39 }
 0x30b   :  { %4864 = vrcp.f32 %v936_v41 }
 0x316   :  { %v4863_v45 = vpop.eup %4862 }
 0x317   :  { %v940_v47 = vmul.f32 %v4863_v45, %v939_v43  ;;  %v8156_v45 = vld [vmem:[#allocation16_spill] sm:$0xff] }
 0x318   :  { %v4865_v53 = vpop.eup %4864 }
 0x319   :  { %v941_v51 = vadd.f32 %v940_v47, %v8152_v49  ;;  %v943_v55 = vsub.f32 1.0, %v4865_v53  ;;  %v945_v61 = vmul.f32 %v4865_v53, %v5872_v32 }
 0x31b   :  { %4866 = vtanh.f32 %v941_v51 }
 0x328   :  { %v4867_v57 = vpop.eup %4866 }
 0x329   :  { %v944_v59 = vmul.f32 %v4867_v57, %v943_v55  ;;  %v8157_v55 = vld [vmem:[#allocation17_spill] sm:$0xff] }
 0x32b   :  { %v5953_v44 = vadd.f32 %v945_v61, %v944_v59 }
 0x32d   :  { %8153 = vst [vmem:[#allocation13_spill] sm:$0xff] %v5953_v44  ;;  %1029 = vmatmul.mubr.f32.vlgmr.msra.gmra.mxu0 %v5953_v44  ;;  %4323 = vmatmul.mubr.f32.vlgmr.msra.gmra.mxu1 %v5953_v44 }
 0x32e   :  { %1145 = vmatpush1.msra.mxu0 %v5960_v24  ;;  %4326 = vmatpush3.msra.mxu1 %v5562_v50 }
 0x32f   :  { %1146 = vmatprep.subr.mxu0 %v5967_v16  ;;  %4327 = vmatprep.subr.mxu1 %v8136_v28 }
 0x330   :  { %1147 = vmatpush1.msra.mxu0 %v5974_v22  ;;  %4328 = vmatpush3.msra.mxu1 %v5571_v52 }
 0x331   :  { %1148 = vmatprep.subr.mxu0 %v5981_v30  ;;  %4329 = vmatprep.subr.mxu1 %v8136_v28 }
 0x332   :  { %1149 = vmatpush1.msra.mxu0 %v5988_v3  ;;  %4330 = vmatpush3.msra.mxu1 %v5579_v54 }
 0x333   :  { %1150 = vmatprep.subr.mxu0 %v5995_v48  ;;  %4331 = vmatprep.subr.mxu1 %v8136_v28 }
 0x334   :  { %1151 = vmatpush1.msra.mxu0 %v6002_v46  ;;  %4332 = vmatpush3.msra.mxu1 %v5588_v56 }
 0x335   :  { %1152 = vmatprep.subr.mxu0 %v6009_v40  ;;  %4333 = vmatprep.subr.mxu1 %v8136_v28 }
 0x336   :  { %1153 = vmatpush1.msra.mxu0 %v6016_v20  ;;  %4334 = vmatpush3.msra.mxu1 %v5596_v58 }
 0x337   :  { %1154 = vmatprep.subr.mxu0 %v6023_v38  ;;  %4335 = vmatprep.subr.mxu1 %v8136_v28 }
 0x338   :  { %1155 = vmatpush1.msra.mxu0 %v6030_v18  ;;  %4336 = vmatpush3.msra.mxu1 %v5605_v60 }
 0x339   :  { %1156 = vmatprep.subr.mxu0 %v6037_v4  ;;  %4337 = vmatprep.subr.mxu1 %v8136_v28 }
 0x33a   :  { %1157 = vmatpush1.msra.mxu0 %v6044_v34  ;;  %4338 = vmatpush3.msra.mxu1 %v5612_v62 }
 0x33b   :  { %1158 = vmatprep.subr.mxu0 %v6051_v26  ;;  %4339 = vmatprep.subr.mxu1 %v8136_v28 }
 0x33c   :  { %1159 = vmatpush1.msra.mxu0 %v6058_v36  ;;  %4340 = vmatpush3.msra.mxu1 %v5621_v0 }
 0x33d   :  { %1160 = vmatprep.subr.mxu0 %v6065_v42  ;;  %4341 = vmatprep.subr.mxu1 %v8136_v28 }
 0x33e   :  { %1161 = vmatpush1.msra.mxu0 %v6072_v8  ;;  %4342 = vmatpush3.msra.mxu1 %v5630_v1 }
 0x33f   :  { %1162 = vmatprep.subr.mxu0 %v6079_v10  ;;  %4343 = vmatprep.subr.mxu1 %v8136_v28 }
 0x340   :  { %1163 = vmatpush1.msra.mxu0 %v6086_v15  ;;  %4344 = vmatpush3.msra.mxu1 %v5639_v5 }
 0x341   :  { %1164 = vmatprep.subr.mxu0 %v6093_v17  ;;  %4345 = vmatprep.subr.mxu1 %v8136_v28 }
 0x342   :  { %1165 = vmatpush1.msra.mxu0 %v6100_v19  ;;  %4346 = vmatpush3.msra.mxu1 %v5648_v7 }
 0x343   :  { %1166 = vmatprep.subr.mxu0 %v6107_v21  ;;  %4347 = vmatprep.subr.mxu1 %v8136_v28 }
 0x344   :  { %1167 = vmatpush1.msra.mxu0 %v6114_v23  ;;  %4348 = vmatpush3.msra.mxu1 %v5657_v9 }
 0x345   :  { %1168 = vmatprep.subr.mxu0 %v6121_v25  ;;  %4349 = vmatprep.subr.mxu1 %v8136_v28 }
 0x346   :  { %1169 = vmatpush1.msra.mxu0 %v6128_v27  ;;  %4350 = vmatpush3.msra.mxu1 %v5666_v12 }
 0x347   :  { %1170 = vmatprep.subr.mxu0 %v6135_v29  ;;  %4351 = vmatprep.subr.mxu1 %v8136_v28 }
 0x348   :  { %1171 = vmatpush1.msra.mxu0 %v6142_v31  ;;  %4352 = vmatpush3.msra.mxu1 %v5675_v14 }
 0x349   :  { %1172 = vmatprep.subr.mxu0 %v6149_v33  ;;  %4353 = vmatprep.subr.mxu1 %v8136_v28 }
 0x34a   :  { %1173 = vmatpush1.msra.mxu0 %v6156_v35  ;;  %4354 = vmatpush3.msra.mxu1 %v8145_v6  ;;  %v8158_v6 = vld [vmem:[#allocation26_spill] sm:$0xff] }
 0x34b   :  { %1174 = vmatprep.subr.mxu0 %v6163_v37  ;;  %4355 = vmatprep.subr.mxu1 %v8136_v28 }
 0x34c   :  { %1175 = vmatpush1.msra.mxu0 %v6170_v39  ;;  %1208 = vmatprep.mubr.f32.mxu0 %v8136_v28 }
 0x34d   :  { %4356 = vmatpush3.msra.mxu1 %v8148_v11  ;;  %4357 = vmatprep.mubr.msk.f32.mxu1 %vm5097_vm0, %v8136_v28 }
 0x34e   :  { %1324 = vmatprep.subr.mxu0 %v5944_v13  ;;  %4360 = vmatprep.subr.mxu1 %v8136_v28 }
 0x3ed   :  { %v1030_v41 = vpop.f32.mrf.mxu0  ;;  %v1101_v43 = vpop.f32.mrf.mxu1 }
 0x3ee   :  { %v1105_v47 = vadd.f32 %v1030_v41, %v8156_v45  ;;  %v1119_v13 = vadd.f32 %v5793_v63, %v1101_v43 }
 0x3ef   :  { %v4324_v49 = vpop.f32.mrf.mxu1  ;;  %v1032_v53 = vpop.f32.mrf.mxu0 }
 0x3f0   :  { %v3740_v51 = vmul.f32 -1.442695, %v1105_v47  ;;  %v1112_v57 = vadd.f32 %v1032_v53, %v8157_v55 }
 0x3f2   :  { %4868 = vpow2.f32 %v3740_v51  ;;  %v3741_v59 = vmul.f32 -1.442695, %v1112_v57  ;;  %v8167_v57 = vld [vmem:[#allocation29_spill] sm:$0xff] }
 0x3f4   :  { %4870 = vpow2.f32 %v3741_v59 }
 0x3ff   :  { %v4869_v61 = vpop.eup %4868 }
 0x400   :  { %v1109_v32 = vadd.f32 1.0, %v4869_v61 }
 0x401   :  { %v4871_v2 = vpop.eup %4870 }
 0x402   :  { %4872 = vrcp.f32 %v1109_v32  ;;  %v1116_v11 = vadd.f32 1.0, %v4871_v2 }
 0x404   :  { %4874 = vrcp.f32 %v1116_v11 }
 0x40f   :  { %v4873_v39 = vpop.eup %4872 }
 0x410   :  { %v1120_v37 = vmul.f32 %v4873_v39, %v1119_v13 }
 0x411   :  { %v4875_v45 = vpop.eup %4874 }
 0x412   :  { %v1121_v41 = vadd.f32 %v1120_v37, %v8158_v6  ;;  %v1123_v47 = vsub.f32 1.0, %v4875_v45  ;;  %v1125_v53 = vmul.f32 %v4875_v45, %v5953_v44 }
 0x414   :  { %4876 = vtanh.f32 %v1121_v41 }
 0x421   :  { %v4877_v49 = vpop.eup %4876 }
 0x422   :  { %v1124_v51 = vmul.f32 %v4877_v49, %v1123_v47 }
 0x424   :  { %v6184_v55 = vadd.f32 %v1125_v53, %v1124_v51  ;;  %v6268_v53 = vld [vmem:[%s8021_s3 + $0x178] sm:$0xff] }
 0x426   :  { %8159 = vst [vmem:[#allocation14_spill] sm:$0xff] %v6184_v55  ;;  %1209 = vmatmul.mubr.f32.vlgmr.msra.gmra.mxu0 %v6184_v55  ;;  %4358 = vmatmul.mubr.f32.vlgmr.msra.gmra.mxu1 %v6184_v55 }
 0x427   :  { %1325 = vmatpush1.msra.mxu0 %v5960_v24  ;;  %4361 = vmatpush3.msra.mxu1 %v5562_v50  ;;  %v8160_v50 = vld [vmem:[#allocation9_spill] sm:$0xff] }
 0x428   :  { %1326 = vmatprep.subr.mxu0 %v5967_v16  ;;  %4362 = vmatprep.subr.mxu1 %v8136_v28 }
 0x429   :  { %1327 = vmatpush1.msra.mxu0 %v5974_v22  ;;  %4363 = vmatpush3.msra.mxu1 %v5571_v52  ;;  %v8161_v52 = vld [vmem:[#allocation7_spill] sm:$0xff] }
 0x42a   :  { %1328 = vmatprep.subr.mxu0 %v5981_v30  ;;  %4364 = vmatprep.subr.mxu1 %v8136_v28 }
 0x42b   :  { %1329 = vmatpush1.msra.mxu0 %v5988_v3  ;;  %4365 = vmatpush3.msra.mxu1 %v5579_v54  ;;  %v8162_v54 = vld [vmem:[#allocation8_spill] sm:$0xff] }
 0x42c   :  { %1330 = vmatprep.subr.mxu0 %v5995_v48  ;;  %4366 = vmatprep.subr.mxu1 %v8136_v28 }
 0x42d   :  { %1331 = vmatpush1.msra.mxu0 %v6002_v46  ;;  %4367 = vmatpush3.msra.mxu1 %v5588_v56  ;;  %v8163_v56 = vld [vmem:[#allocation10_spill] sm:$0xff] }
 0x42e   :  { %1332 = vmatprep.subr.mxu0 %v6009_v40  ;;  %4368 = vmatprep.subr.mxu1 %v8136_v28 }
 0x42f   :  { %1333 = vmatpush1.msra.mxu0 %v6016_v20  ;;  %4369 = vmatpush3.msra.mxu1 %v5596_v58  ;;  %v8164_v58 = vld [vmem:[#allocation12_spill] sm:$0xff] }
 0x430   :  { %1334 = vmatprep.subr.mxu0 %v6023_v38  ;;  %4370 = vmatprep.subr.mxu1 %v8136_v28 }
 0x431   :  { %1335 = vmatpush1.msra.mxu0 %v6030_v18  ;;  %4371 = vmatpush3.msra.mxu1 %v5605_v60 }
 0x432   :  { %1336 = vmatprep.subr.mxu0 %v6037_v4  ;;  %4372 = vmatprep.subr.mxu1 %v8136_v28 }
 0x433   :  { %1337 = vmatpush1.msra.mxu0 %v6044_v34  ;;  %4373 = vmatpush3.msra.mxu1 %v5612_v62 }
 0x434   :  { %1338 = vmatprep.subr.mxu0 %v6051_v26  ;;  %4374 = vmatprep.subr.mxu1 %v8136_v28 }
 0x435   :  { %1339 = vmatpush1.msra.mxu0 %v6058_v36  ;;  %4375 = vmatpush3.msra.mxu1 %v5621_v0  ;;  %v8165_v0 = vld [vmem:[#allocation18_spill] sm:$0xff] }
 0x436   :  { %1340 = vmatprep.subr.mxu0 %v6065_v42  ;;  %4376 = vmatprep.subr.mxu1 %v8136_v28 }
 0x437   :  { %1341 = vmatpush1.msra.mxu0 %v6072_v8  ;;  %4377 = vmatpush3.msra.mxu1 %v5630_v1 }
 0x438   :  { %1342 = vmatprep.subr.mxu0 %v6079_v10  ;;  %4378 = vmatprep.subr.mxu1 %v8136_v28 }
 0x439   :  { %1343 = vmatpush1.msra.mxu0 %v6086_v15  ;;  %4379 = vmatpush3.msra.mxu1 %v5639_v5 }
 0x43a   :  { %1344 = vmatprep.subr.mxu0 %v6093_v17  ;;  %4380 = vmatprep.subr.mxu1 %v8136_v28 }
 0x43b   :  { %1345 = vmatpush1.msra.mxu0 %v6100_v19  ;;  %4381 = vmatpush3.msra.mxu1 %v5648_v7 }
 0x43c   :  { %1346 = vmatprep.subr.mxu0 %v6107_v21  ;;  %4382 = vmatprep.subr.mxu1 %v8136_v28 }
 0x43d   :  { %1347 = vmatpush1.msra.mxu0 %v6114_v23  ;;  %4383 = vmatpush3.msra.mxu1 %v5657_v9 }
 0x43e   :  { %1348 = vmatprep.subr.mxu0 %v6121_v25  ;;  %4384 = vmatprep.subr.mxu1 %v8136_v28 }
 0x43f   :  { %1349 = vmatpush1.msra.mxu0 %v6128_v27  ;;  %4385 = vmatpush3.msra.mxu1 %v5666_v12  ;;  %v8166_v12 = vld [vmem:[#allocation19_spill] sm:$0xff] }
 0x440   :  { %1350 = vmatprep.subr.mxu0 %v6135_v29  ;;  %4386 = vmatprep.subr.mxu1 %v8136_v28 }
 0x441   :  { %1351 = vmatpush1.msra.mxu0 %v6142_v31  ;;  %4387 = vmatpush3.msra.mxu1 %v5675_v14 }
 0x442   :  { %1352 = vmatprep.subr.mxu0 %v6149_v33  ;;  %4388 = vmatprep.subr.mxu1 %v8136_v28 }
 0x443   :  { %1353 = vmatpush1.msra.mxu0 %v6156_v35  ;;  %4389 = vmatpush3.msra.mxu1 %v8160_v50  ;;  %v6277_v50 = vld [vmem:[%s8021_s3 + $0x160] sm:$0xff] }
 0x444   :  { %1354 = vmatprep.subr.mxu0 %v8161_v52  ;;  %4390 = vmatprep.subr.mxu1 %v8136_v28 }
 0x445   :  { %1355 = vmatpush1.msra.mxu0 %v8162_v54  ;;  %1388 = vmatprep.mubr.f32.mxu0 %v8136_v28 }
 0x446   :  { %4391 = vmatpush3.msra.mxu1 %v8163_v56  ;;  %4392 = vmatprep.mubr.msk.f32.mxu1 %vm5097_vm0, %v8136_v28  ;;  %v6286_v56 = vld [vmem:[%s8021_s3 + $0x148] sm:$0xff] }
 0x447   :  { %1504 = vmatprep.subr.mxu0 %v8164_v58  ;;  %4395 = vmatprep.subr.mxu1 %v8136_v28 }
 0x4e6   :  { %v1210_v60 = vpop.f32.mrf.mxu0  ;;  %v1281_v62 = vpop.f32.mrf.mxu1 }
 0x4e7   :  { %v1285_v1 = vadd.f32 %v1210_v60, %v8165_v0  ;;  %v1299_v37 = vadd.f32 %v5793_v63, %v1281_v62  ;;  %v6295_v60 = vld [vmem:[%s8021_s3 + $0x130] sm:$0xff]  ;;  %v6304_v62 = vld [vmem:[%s8021_s3 + $0x118] sm:$0xff]  ;;  %v6313_v0 = vld [vmem:[%s8021_s3 + $0x100] sm:$0xff] }
 0x4e8   :  { %v4359_v5 = vpop.f32.mrf.mxu1  ;;  %v1212_v9 = vpop.f32.mrf.mxu0 }
 0x4e9   :  { %v3743_v7 = vmul.f32 -1.442695, %v1285_v1  ;;  %v1292_v14 = vadd.f32 %v1212_v9, %v8166_v12  ;;  %v6322_v1 = vld [vmem:[%s8021_s3 + $0xe8] sm:$0xff]  ;;  %v6331_v5 = vld [vmem:[%s8021_s3 + $0xd0] sm:$0xff]  ;;  %v6349_v9 = vld [vmem:[%s8021_s3 + $0xa0] sm:$0xff] }
 0x4ea   :  { %v6358_v12 = vld [vmem:[%s8021_s3 + $0x88] sm:$0xff] }
 0x4eb   :  { %4878 = vpow2.f32 %v3743_v7  ;;  %v3744_v2 = vmul.f32 -1.442695, %v1292_v14  ;;  %v6340_v7 = vld [vmem:[%s8021_s3 + $0xb8] sm:$0xff]  ;;  %v6367_v14 = vld [vmem:[%s8021_s3 + $0x70] sm:$0xff] }
 0x4ed   :  { %4880 = vpow2.f32 %v3744_v2  ;;  %v6376_v2 = vld [vmem:[%s8021_s3 + $0x58] sm:$0xff] }
 0x4f8   :  { %v4879_v32 = vpop.eup %4878 }
 0x4f9   :  { %v1289_v6 = vadd.f32 1.0, %v4879_v32  ;;  %v6385_v32 = vld [vmem:[%s8021_s3 + $0x40] sm:$0xff] }
 0x4fa   :  { %v4881_v11 = vpop.eup %4880 }
 0x4fb   :  { %4882 = vrcp.f32 %v1289_v6  ;;  %v1296_v13 = vadd.f32 1.0, %v4881_v11  ;;  %v6394_v6 = vld [vmem:[%s8021_s3 + $0x28] sm:$0xff]  ;;  %v6404_v11 = vld [vmem:[%s8021_s3 + $0x10] sm:$0xff] }
 0x4fc   :  { %8168 = vst [vmem:[#allocation15_spill] sm:$0xff] %v6394_v6  ;;  %8169 = vst [vmem:[#allocation27_spill] sm:$0xff] %v6404_v11 }
 0x4fd   :  { %4884 = vrcp.f32 %v1296_v13  ;;  %v8068_v13 = vmov 0  }
 0x4fe   :  { %4836 = vset.pattern.permute.xlu0 %v8068_v13  ;;  %4837 = vset.pattern.permute.xlu1 %v8068_v13 }
 0x508   :  { %v4883_v39 = vpop.eup %4882 }
 0x509   :  { %v1300_v43 = vmul.f32 %v4883_v39, %v1299_v37  ;;  %v6415_v37 = vld [vmem:[%s8025_s1] sm:$0xff] }
 0x50a   :  { %v4885_v61 = vpop.eup %4884  ;;  %8170 = vst [vmem:[#allocation16_spill] sm:$0xff] %v6415_v37  ;;  %vm3733_vm1 = vcmp.gt.s32.totalorder %v6415_v37, 0  ;;  %vm3739_vm2 = vcmp.gt.s32.totalorder %v6415_v37, 2  ;;  %vm3736_vm3 = vcmp.gt.s32.totalorder %v6415_v37, 1  ;;  %vm3742_vm4 = vcmp.gt.s32.totalorder %v6415_v37, 3 }
 0x50b   :  { %v1301_v59 = vadd.f32 %v1300_v43, %v8167_v57  ;;  %v1303_v41 = vsub.f32 1.0, %v4885_v61  ;;  %v1305_v49 = vmul.f32 %v4885_v61, %v6184_v55  ;;  %v950_v39 = vsel %vm3739_vm2, 1, %v8068_v13 }
 0x50c   :  { %952 = vperm.xlu1 %4837, %v950_v39   ;;  %v770_v43 = vsel %vm3736_vm3, 1, %v8068_v13  ;;  %v1130_v57 = vsel %vm3742_vm4, 1, %v8068_v13  ;;  %vm3745_vm5 = vcmp.gt.s32.totalorder %v6415_v37, 4  ;;  %vm3748_vm6 = vcmp.gt.s32.totalorder %v6415_v37, 5 }
 0x50d   :  { %4886 = vtanh.f32 %v1301_v59  ;;  %v1310_v59 = vsel %vm3745_vm5, 1, %v8068_v13  ;;  %v1490_v61 = vsel %vm3748_vm6, 1, %v8068_v13  ;;  %vm3751_vm7 = vcmp.gt.s32.totalorder %v6415_v37, 6 }
 0x510   :  { %1132 = vperm.xlu1 %4837, %v1130_v57  }
 0x514   :  { %1492 = vperm.xlu1 %4837, %v1490_v61  }
 0x51a   :  { %v4887_v45 = vpop.eup %4886 }
 0x51b   :  { %v1304_v47 = vmul.f32 %v4887_v45, %v1303_v41  ;;  %v1670_v41 = vsel %vm3751_vm7, 1, %v8068_v13 }
 0x51d   :  { %v6260_v51 = vadd.f32 %v1305_v49, %v1304_v47  ;;  %v8171_v49 = vld [vmem:[#allocation20_spill] sm:$0xff] }
 0x51f   :  { %1389 = vmatmul.mubr.f32.vlgmr.msra.gmra.mxu0 %v6260_v51  ;;  %4393 = vmatmul.mubr.f32.vlgmr.msra.gmra.mxu1 %v6260_v51 }
 0x520   :  { %1505 = vmatpush1.msra.mxu0 %v5960_v24  ;;  %4396 = vmatpush3.msra.mxu1 %v6268_v53 }
 0x521   :  { %1506 = vmatprep.subr.mxu0 %v5967_v16  ;;  %4397 = vmatprep.subr.mxu1 %v8136_v28 }
 0x522   :  { %1507 = vmatpush1.msra.mxu0 %v5974_v22  ;;  %4398 = vmatpush3.msra.mxu1 %v6277_v50 }
 0x523   :  { %1508 = vmatprep.subr.mxu0 %v5981_v30  ;;  %4399 = vmatprep.subr.mxu1 %v8136_v28 }
 0x524   :  { %1509 = vmatpush1.msra.mxu0 %v5988_v3  ;;  %4400 = vmatpush3.msra.mxu1 %v6286_v56 }
 0x525   :  { %1510 = vmatprep.subr.mxu0 %v5995_v48  ;;  %4401 = vmatprep.subr.mxu1 %v8136_v28 }
 0x526   :  { %1511 = vmatpush1.msra.mxu0 %v6002_v46  ;;  %4402 = vmatpush3.msra.mxu1 %v6295_v60 }
 0x527   :  { %1512 = vmatprep.subr.mxu0 %v6009_v40  ;;  %4403 = vmatprep.subr.mxu1 %v8136_v28 }
 0x528   :  { %1513 = vmatpush1.msra.mxu0 %v6016_v20  ;;  %4404 = vmatpush3.msra.mxu1 %v6304_v62 }
 0x529   :  { %1514 = vmatprep.subr.mxu0 %v6023_v38  ;;  %4405 = vmatprep.subr.mxu1 %v8136_v28 }
 0x52a   :  { %1515 = vmatpush1.msra.mxu0 %v6030_v18  ;;  %4406 = vmatpush3.msra.mxu1 %v6313_v0 }
 0x52b   :  { %1516 = vmatprep.subr.mxu0 %v6037_v4  ;;  %4407 = vmatprep.subr.mxu1 %v8136_v28 }
 0x52c   :  { %1517 = vmatpush1.msra.mxu0 %v6044_v34  ;;  %4408 = vmatpush3.msra.mxu1 %v6322_v1 }
 0x52d   :  { %1518 = vmatprep.subr.mxu0 %v6051_v26  ;;  %4409 = vmatprep.subr.mxu1 %v8136_v28 }
 0x52e   :  { %1519 = vmatpush1.msra.mxu0 %v6058_v36  ;;  %4410 = vmatpush3.msra.mxu1 %v6331_v5 }
 0x52f   :  { %1520 = vmatprep.subr.mxu0 %v6065_v42  ;;  %4411 = vmatprep.subr.mxu1 %v8136_v28 }
 0x530   :  { %1521 = vmatpush1.msra.mxu0 %v6072_v8  ;;  %4412 = vmatpush3.msra.mxu1 %v6340_v7 }
 0x531   :  { %1522 = vmatprep.subr.mxu0 %v6079_v10  ;;  %4413 = vmatprep.subr.mxu1 %v8136_v28 }
 0x532   :  { %1523 = vmatpush1.msra.mxu0 %v6086_v15  ;;  %4414 = vmatpush3.msra.mxu1 %v6349_v9 }
 0x533   :  { %1524 = vmatprep.subr.mxu0 %v6093_v17  ;;  %4415 = vmatprep.subr.mxu1 %v8136_v28 }
 0x534   :  { %1525 = vmatpush1.msra.mxu0 %v6100_v19  ;;  %4416 = vmatpush3.msra.mxu1 %v6358_v12 }
 0x535   :  { %1526 = vmatprep.subr.mxu0 %v6107_v21  ;;  %4417 = vmatprep.subr.mxu1 %v8136_v28 }
 0x536   :  { %1527 = vmatpush1.msra.mxu0 %v6114_v23  ;;  %4418 = vmatpush3.msra.mxu1 %v6367_v14 }
 0x537   :  { %1528 = vmatprep.subr.mxu0 %v6121_v25  ;;  %4419 = vmatprep.subr.mxu1 %v8136_v28 }
 0x538   :  { %1529 = vmatpush1.msra.mxu0 %v6128_v27  ;;  %4420 = vmatpush3.msra.mxu1 %v6376_v2 }
 0x539   :  { %1530 = vmatprep.subr.mxu0 %v6135_v29  ;;  %4421 = vmatprep.subr.mxu1 %v8136_v28 }
 0x53a   :  { %1531 = vmatpush1.msra.mxu0 %v6142_v31  ;;  %4422 = vmatpush3.msra.mxu1 %v6385_v32 }
 0x53b   :  { %1532 = vmatprep.subr.mxu0 %v6149_v33  ;;  %4423 = vmatprep.subr.mxu1 %v8136_v28 }
 0x53c   :  { %1533 = vmatpush1.msra.mxu0 %v6156_v35  ;;  %4424 = vmatpush3.msra.mxu1 %v6394_v6  ;;  %v8173_v6 = vld [vmem:[#allocation28_spill] sm:$0xff] }
 0x53d   :  { %1534 = vmatprep.subr.mxu0 %v8161_v52  ;;  %4425 = vmatprep.subr.mxu1 %v8136_v28 }
 0x53e   :  { %1535 = vmatpush1.msra.mxu0 %v8162_v54  ;;  %1568 = vmatprep.mubr.f32.mxu0 %v8136_v28 }
 0x53f   :  { %4426 = vmatpush3.msra.mxu1 %v6404_v11  ;;  %4427 = vmatprep.mubr.msk.f32.mxu1 %vm5097_vm0, %v8136_v28 }
 0x540   :  { %1684 = vmatprep.subr.mxu0 %v8164_v58  ;;  %4430 = vmatprep.subr.mxu1 %v8136_v28  ;;  %v591_v58 = vsel %vm3733_vm1, 1, %v8068_v13 }
 0x541   :  { %593 = vperm.xlu0 %4836, %v591_v58  }
 0x545   :  { %772 = vperm.xlu0 %4836, %v770_v43   ;;  %v8172_v43 = vld [vmem:[#allocation21_spill] sm:$0xff] }
 0x549   :  { %1312 = vperm.xlu0 %4836, %v1310_v59  }
 0x54d   :  { %1672 = vperm.xlu0 %4836, %v1670_v41  }
 0x5df   :  { %v1390_v45 = vpop.f32.mrf.mxu0  ;;  %v1461_v47 = vpop.f32.mrf.mxu1 }
 0x5e0   :  { %v1465_v58 = vadd.f32 %v1390_v45, %v8171_v49  ;;  %v1479_v13 = vadd.f32 %v5793_v63, %v1461_v47  ;;  %v8174_v63 = vld [vmem:[#allocation15_spill] sm:$0xff] }
 0x5e1   :  { %v4394_v39 = vpop.f32.mrf.mxu1  ;;  %v1392_v44 = vpop.f32.mrf.mxu0  ;;  %v1892_v47 = vld [vmem:[%s8026_s6 + $0x108] sm:$0xff] }
 0x5e2   :  { %v3746_v55 = vmul.f32 -1.442695, %v1465_v58  ;;  %v1472_v57 = vadd.f32 %v1392_v44, %v8172_v43  ;;  %v1890_v43 = vld [vmem:[%s8026_s6 + $0xf8] sm:$0xff] }
 0x5e4   :  { %4888 = vpow2.f32 %v3746_v55  ;;  %v3747_v11 = vmul.f32 -1.442695, %v1472_v57  ;;  %v1891_v57 = vld [vmem:[%s8026_s6 + $0x100] sm:$0xff] }
 0x5e6   :  { %4890 = vpow2.f32 %v3747_v11 }
 0x5f1   :  { %v4889_v54 = vpop.eup %4888 }
 0x5f2   :  { %v1469_v52 = vadd.f32 1.0, %v4889_v54 }
 0x5f3   :  { %v4891_v59 = vpop.eup %4890 }
 0x5f4   :  { %4892 = vrcp.f32 %v1469_v52  ;;  %v1476_v61 = vadd.f32 1.0, %v4891_v59  ;;  %v1889_v59 = vld [vmem:[%s8026_s6 + $0xf0] sm:$0xff] }
 0x5f6   :  { %4894 = vrcp.f32 %v1476_v61  ;;  %v1887_v61 = vld [vmem:[%s8026_s6 + $0xe0] sm:$0xff] }
 0x601   :  { %v4893_v41 = vpop.eup %4892 }
 0x602   :  { %v1480_v37 = vmul.f32 %v4893_v41, %v1479_v13  ;;  %v1893_v13 = vld [vmem:[%s8026_s6 + $0x110] sm:$0xff]  ;;  %v1888_v41 = vld [vmem:[%s8026_s6 + $0xe8] sm:$0xff] }
 0x603   :  { %v4895_v49 = vpop.eup %4894 }
 0x604   :  { %v1481_v45 = vadd.f32 %v1480_v37, %v8173_v6  ;;  %v1483_v58 = vsub.f32 1.0, %v4895_v49  ;;  %v1485_v44 = vmul.f32 %v4895_v49, %v6260_v51  ;;  %v1895_v6 = vld [vmem:[%s8026_s6 + $0x120] sm:$0xff]  ;;  %v1894_v37 = vld [vmem:[%s8026_s6 + $0x118] sm:$0xff]  ;;  %v1884_v49 = vld [vmem:[%s8026_s6 + $0xc8] sm:$0xff] }
 0x606   :  { %4896 = vtanh.f32 %v1481_v45  ;;  %v1886_v45 = vld [vmem:[%s8026_s6 + $0xd8] sm:$0xff] }
 0x613   :  { %v4897_v55 = vpop.eup %4896 }
 0x614   :  { %v1484_v39 = vmul.f32 %v4897_v55, %v1483_v58  ;;  %v1885_v58 = vld [vmem:[%s8026_s6 + $0xd0] sm:$0xff]  ;;  %v1883_v55 = vld [vmem:[%s8026_s6 + $0xc0] sm:$0xff] }
 0x616   :  { %v6437_v11 = vadd.f32 %v1485_v44, %v1484_v39  ;;  %v1881_v39 = vld [vmem:[%s8026_s6 + $0xb0] sm:$0xff]  ;;  %v1882_v44 = vld [vmem:[%s8026_s6 + $0xb8] sm:$0xff] }
 0x618   :  { %1569 = vmatmul.mubr.f32.vlgmr.msra.gmra.mxu0 %v6437_v11  ;;  %4428 = vmatmul.mubr.f32.vlgmr.msra.gmra.mxu1 %v6437_v11 }
 0x619   :  { %1685 = vmatpush1.msra.mxu0 %v5960_v24  ;;  %4431 = vmatpush3.msra.mxu1 %v6268_v53  ;;  %v8175_v24 = vld [vmem:[#allocation7_spill] sm:$0xff] }
 0x61a   :  { %1686 = vmatprep.subr.mxu0 %v5967_v16  ;;  %4432 = vmatprep.subr.mxu1 %v8136_v28  ;;  %v8176_v16 = vld [vmem:[#allocation8_spill] sm:$0xff] }
 0x61b   :  { %1687 = vmatpush1.msra.mxu0 %v5974_v22  ;;  %4433 = vmatpush3.msra.mxu1 %v6277_v50  ;;  %v8177_v22 = vld [vmem:[#allocation27_spill] sm:$0xff] }
 0x61c   :  { %1688 = vmatprep.subr.mxu0 %v5981_v30  ;;  %4434 = vmatprep.subr.mxu1 %v8136_v28  ;;  %v1905_v30 = vld [vmem:[%s8026_s6 + $0x170] sm:$0xff] }
 0x61d   :  { %1689 = vmatpush1.msra.mxu0 %v5988_v3  ;;  %4435 = vmatpush3.msra.mxu1 %v6286_v56  ;;  %v1906_v3 = vld [vmem:[%s8026_s6 + $0x178] sm:$0xff]  ;;  %v6524_v56 = vpop.permute.xlu0 %593 }
 0x61e   :  { %1690 = vmatprep.subr.mxu0 %v5995_v48  ;;  %4436 = vmatprep.subr.mxu1 %v8136_v28  ;;  %v8178_v48 = vld [vmem:[#allocation16_spill] sm:$0xff]  ;;  %8183 = vst [vmem:[#allocation17_spill] sm:$0xff] %v6524_v56  ;;  %vm595_vm9 = vcmp.eq.s32.totalorder %v6524_v56, 1 }
 0x61f   :  { %1691 = vmatpush1.msra.mxu0 %v6002_v46  ;;  %4437 = vmatpush3.msra.mxu1 %v6295_v60  ;;  %vm3754_vm8 = vcmp.gt.s32.totalorder %v8178_v48, 7  ;;  %v8179_v46 = vmov 0   ;;  %v1874_v48 = vld [vmem:[%s8026_s6 + $0x78] sm:$0xff] }
 0x620   :  { %1692 = vmatprep.subr.mxu0 %v6009_v40  ;;  %4438 = vmatprep.subr.mxu1 %v8136_v28  ;;  %v1850_v40 = vsel %vm3754_vm8, 1, %v8179_v46  ;;  %v1872_v46 = vld [vmem:[%s8026_s6 + $0x68] sm:$0xff] }
 0x621   :  { %1693 = vmatpush1.msra.mxu0 %v6016_v20  ;;  %4439 = vmatpush3.msra.mxu1 %v6304_v62  ;;  %v1904_v62 = vld [vmem:[%s8026_s6 + $0x168] sm:$0xff] }
 0x622   :  { %1694 = vmatprep.subr.mxu0 %v6023_v38  ;;  %4440 = vmatprep.subr.mxu1 %v8136_v28 }
 0x623   :  { %1695 = vmatpush1.msra.mxu0 %v6030_v18  ;;  %4441 = vmatpush3.msra.mxu1 %v6313_v0  ;;  %v8180_v18 = vld [vmem:[#allocation22_spill] sm:$0xff]  ;;  %v1902_v0 = vld [vmem:[%s8026_s6 + $0x158] sm:$0xff] }
 0x624   :  { %1696 = vmatprep.subr.mxu0 %v6037_v4  ;;  %4442 = vmatprep.subr.mxu1 %v8136_v28 }
 0x625   :  { %1697 = vmatpush1.msra.mxu0 %v6044_v34  ;;  %4443 = vmatpush3.msra.mxu1 %v6322_v1  ;;  %v1903_v1 = vld [vmem:[%s8026_s6 + $0x160] sm:$0xff] }
 0x626   :  { %1698 = vmatprep.subr.mxu0 %v6051_v26  ;;  %4444 = vmatprep.subr.mxu1 %v8136_v28 }
 0x627   :  { %1699 = vmatpush1.msra.mxu0 %v6058_v36  ;;  %4445 = vmatpush3.msra.mxu1 %v6331_v5  ;;  %v1901_v5 = vld [vmem:[%s8026_s6 + $0x150] sm:$0xff] }
 0x628   :  { %1700 = vmatprep.subr.mxu0 %v6065_v42  ;;  %4446 = vmatprep.subr.mxu1 %v8136_v28  ;;  %v8181_v42 = vld [vmem:[#allocation23_spill] sm:$0xff] }
 0x629   :  { %1701 = vmatpush1.msra.mxu0 %v6072_v8  ;;  %4447 = vmatpush3.msra.mxu1 %v6340_v7  ;;  %v1899_v7 = vld [vmem:[%s8026_s6 + $0x140] sm:$0xff] }
 0x62a   :  { %1702 = vmatprep.subr.mxu0 %v6079_v10  ;;  %4448 = vmatprep.subr.mxu1 %v8136_v28 }
 0x62b   :  { %1703 = vmatpush1.msra.mxu0 %v6086_v15  ;;  %4449 = vmatpush3.msra.mxu1 %v6349_v9  ;;  %v1900_v9 = vld [vmem:[%s8026_s6 + $0x148] sm:$0xff] }
 0x62c   :  { %1704 = vmatprep.subr.mxu0 %v6093_v17  ;;  %4450 = vmatprep.subr.mxu1 %v8136_v28 }
 0x62d   :  { %1705 = vmatpush1.msra.mxu0 %v6100_v19  ;;  %4451 = vmatpush3.msra.mxu1 %v6358_v12  ;;  %v1898_v12 = vld [vmem:[%s8026_s6 + $0x138] sm:$0xff] }
 0x62e   :  { %1706 = vmatprep.subr.mxu0 %v6107_v21  ;;  %4452 = vmatprep.subr.mxu1 %v8136_v28 }
 0x62f   :  { %1707 = vmatpush1.msra.mxu0 %v6114_v23  ;;  %4453 = vmatpush3.msra.mxu1 %v6367_v14  ;;  %v6519_v23 = vld [vmem:[%s8024_s5] ss:$0 sm:$0xff]  ;;  %v8184_v14 = vld [vmem:[#allocation32_spill] sm:$0xff] }
 0x630   :  { %1708 = vmatprep.subr.mxu0 %v6121_v25  ;;  %4454 = vmatprep.subr.mxu1 %v8136_v28 }
 0x631   :  { %1709 = vmatpush1.msra.mxu0 %v6128_v27  ;;  %4455 = vmatpush3.msra.mxu1 %v6376_v2  ;;  %v1896_v2 = vld [vmem:[%s8026_s6 + $0x128] sm:$0xff] }
 0x632   :  { %1710 = vmatprep.subr.mxu0 %v6135_v29  ;;  %4456 = vmatprep.subr.mxu1 %v8136_v28 }
 0x633   :  { %1711 = vmatpush1.msra.mxu0 %v6142_v31  ;;  %4457 = vmatpush3.msra.mxu1 %v6385_v32  ;;  %v8182_v31 = vld [vmem:[#allocation31_spill] sm:$0xff]  ;;  %v1897_v32 = vld [vmem:[%s8026_s6 + $0x130] sm:$0xff] }
 0x634   :  { %1712 = vmatprep.subr.mxu0 %v6149_v33  ;;  %4458 = vmatprep.subr.mxu1 %v8136_v28 }
 0x635   :  { %1713 = vmatpush1.msra.mxu0 %v6156_v35  ;;  %4459 = vmatpush3.msra.mxu1 %v8174_v63  ;;  %v1880_v63 = vld [vmem:[%s8026_s6 + $0xa8] sm:$0xff] }
 0x636   :  { %1714 = vmatprep.subr.mxu0 %v8175_v24  ;;  %4460 = vmatprep.subr.mxu1 %v8136_v28  ;;  %v1878_v24 = vld [vmem:[%s8026_s6 + $0x98] sm:$0xff] }
 0x637   :  { %1715 = vmatpush1.msra.mxu0 %v8176_v16  ;;  %4461 = vmatpush3.msra.mxu1 %v8177_v22  ;;  %v1879_v16 = vld [vmem:[%s8026_s6 + $0xa0] sm:$0xff]  ;;  %v1877_v22 = vld [vmem:[%s8026_s6 + $0x90] sm:$0xff] }
 0x638   :  { %1748 = vmatprep.mubr.f32.mxu0 %v8136_v28  ;;  %4462 = vmatprep.mubr.msk.f32.mxu1 %vm5097_vm0, %v8136_v28 }
 0x639   :  { %1987 = vmatprep.subr.mxu0 %v1905_v30  ;;  %4465 = vmatprep.subr.mxu1 %v1906_v3  ;;  %v1875_v30 = vld [vmem:[%s8026_s6 + $0x80] sm:$0xff] }
 0x63a   :  { %1852 = vperm.xlu1 %4837, %v1850_v40   ;;  %v1873_v40 = vld [vmem:[%s8026_s6 + $0x70] sm:$0xff] }
 0x6d8   :  { %v1570_v20 = vpop.f32.mrf.mxu0  ;;  %v1641_v38 = vpop.f32.mrf.mxu1 }
 0x6d9   :  { %v1645_v4 = vadd.f32 %v1570_v20, %v8180_v18  ;;  %v1659_v25 = vadd.f32 %v6519_v23, %v1641_v38  ;;  %v1871_v20 = vld [vmem:[%s8026_s6 + $0x60] sm:$0xff]  ;;  %v1869_v38 = vld [vmem:[%s8026_s6 + $0x50] sm:$0xff]  ;;  %v1870_v18 = vld [vmem:[%s8026_s6 + $0x58] sm:$0xff] }
 0x6da   :  { %v4429_v34 = vpop.f32.mrf.mxu1  ;;  %v1572_v36 = vpop.f32.mrf.mxu0 }
 0x6db   :  { %v3749_v26 = vmul.f32 -1.442695, %v1645_v4  ;;  %v1652_v8 = vadd.f32 %v1572_v36, %v8181_v42  ;;  %v1868_v4 = vld [vmem:[%s8026_s6 + $0x48] sm:$0xff]  ;;  %v1866_v34 = vld [vmem:[%s8026_s6 + $0x38] sm:$0xff]  ;;  %v1867_v36 = vld [vmem:[%s8026_s6 + $0x40] sm:$0xff] }
 0x6dc   :  { %v1865_v42 = vld [vmem:[%s8026_s6 + $0x30] sm:$0xff] }
 0x6dd   :  { %4898 = vpow2.f32 %v3749_v26  ;;  %v3750_v10 = vmul.f32 -1.442695, %v1652_v8  ;;  %v6648_v26 = vpop.permute.xlu1 %952  ;;  %v6656_v8 = vpop.permute.xlu0 %772 }
 0x6de   :  { %8185 = vst [vmem:[#allocation26_spill] sm:$0xff] %v6648_v26  ;;  %8186 = vst [vmem:[#allocation9_spill] sm:$0xff] %v6656_v8  ;;  %vm774_vm10 = vcmp.eq.s32.totalorder %v6656_v8, 1  ;;  %vm954_vm11 = vcmp.eq.s32.totalorder %v6648_v26, 1 }
 0x6df   :  { %4900 = vpow2.f32 %v3750_v10  ;;  %v1863_v10 = vld [vmem:[%s8026_s6 + $0x20] sm:$0xff] }
 0x6ea   :  { %v4899_v15 = vpop.eup %4898 }
 0x6eb   :  { %v1649_v17 = vadd.f32 1.0, %v4899_v15  ;;  %v1864_v15 = vld [vmem:[%s8026_s6 + $0x28] sm:$0xff] }
 0x6ec   :  { %v4901_v19 = vpop.eup %4900 }
 0x6ed   :  { %4902 = vrcp.f32 %v1649_v17  ;;  %v1656_v21 = vadd.f32 1.0, %v4901_v19  ;;  %v1862_v17 = vld [vmem:[%s8026_s6 + $0x18] sm:$0xff]  ;;  %v1860_v19 = vld [vmem:[%s8026_s6 + $0x8] sm:$0xff] }
 0x6ef   :  { %4904 = vrcp.f32 %v1656_v21  ;;  %v1861_v21 = vld [vmem:[%s8026_s6 + $0x10] sm:$0xff] }
 0x6fa   :  { %v4903_v27 = vpop.eup %4902 }
 0x6fb   :  { %v1660_v29 = vmul.f32 %v4903_v27, %v1659_v25  ;;  %v1859_v25 = vld [vmem:[%s8026_s6] sm:$0xff]  ;;  %v6676_v27 = vpop.permute.xlu1 %1132 }
 0x6fc   :  { %v4905_v35 = vpop.eup %4904  ;;  %8187 = vst [vmem:[#allocation10_spill] sm:$0xff] %v6676_v27  ;;  %vm1134_vm12 = vcmp.eq.s32.totalorder %v6676_v27, 1 }
 0x6fd   :  { %v1661_v33 = vadd.f32 %v1660_v29, %v8182_v31  ;;  %v1663_v52 = vsub.f32 1.0, %v4905_v35  ;;  %v1665_v50 = vmul.f32 %v4905_v35, %v6437_v11  ;;  %v6679_v29 = vpop.permute.xlu0 %1312  ;;  %v8189_v31 = vld [vmem:[#allocation6_spill] sm:$0xff] }
 0x6fe   :  { %8188 = vst [vmem:[#allocation12_spill] sm:$0xff] %v6679_v29  ;;  %vm1314_vm13 = vcmp.eq.s32.totalorder %v6679_v29, 1 }
 0x6ff   :  { %4906 = vtanh.f32 %v1661_v33  ;;  %v8190_v33 = vld [vmem:[#allocation13_spill] sm:$0xff]  ;;  %v6695_v35 = vpop.permute.xlu1 %1492 }
 0x700   :  { %8191 = vst [vmem:[#allocation18_spill] sm:$0xff] %v6695_v35  ;;  %vm1494_vm14 = vcmp.eq.s32.totalorder %v6695_v35, 1  ;;  %v8201_v35 = vld [vmem:[#allocation25_spill] sm:$0xff] }
 0x70c   :  { %v4907_v54 = vpop.eup %4906 }
 0x70d   :  { %v1664_v53 = vmul.f32 %v4907_v54, %v1663_v52  ;;  %v6698_v52 = vpop.permute.xlu0 %1672  ;;  %v8193_v54 = vld [vmem:[#allocation14_spill] sm:$0xff] }
 0x70e   :  { %8192 = vst [vmem:[#allocation19_spill] sm:$0xff] %v6698_v52  ;;  %vm1674_vm15 = vcmp.eq.s32.totalorder %v6698_v52, 1 }
 0x70f   :  { %v6526_v60 = vadd.f32 %v1665_v50, %v1664_v53  ;;  %v6741_v53 = vld [vmem:[%s8027_s7 + $0x170] sm:$0xff] }
 0x710   :  { %8194 = vst [vmem:[#allocation29_spill] sm:$0xff] %v6741_v53  ;;  %v6759_v50 = vld [vmem:[%s8027_s7 + $0x150] sm:$0xff] }
 0x711   :  { %1749 = vmatmul.mubr.f32.vlgmr.msra.gmra.mxu0 %v6526_v60  ;;  %4463 = vmatmul.mubr.f32.vlgmr.msra.gmra.mxu1 %v6526_v60 }
 0x712   :  { %1988 = vmatpush1.msra.mxu0 %v1904_v62  ;;  %4466 = vmatpush3.msra.mxu1 %v1906_v3  ;;  %v1876_v3 = vld [vmem:[%s8026_s6 + $0x88] sm:$0xff]  ;;  %v6765_v62 = vld [vmem:[%s8027_s7 + $0x140] sm:$0xff] }
 0x713   :  { %1989 = vmatprep.subr.mxu0 %v1902_v0  ;;  %4467 = vmatprep.subr.mxu1 %v1903_v1  ;;  %v6771_v0 = vld [vmem:[%s8027_s7 + $0x138] sm:$0xff] }
 0x714   :  { %4497 = vmatprep.mubr.msk.f32.mxu1 %vm595_vm9, %v8184_v14  ;;  %1990 = vmatpush1.msra.mxu0 %v1901_v5  ;;  %v6783_v5 = vld [vmem:[%s8027_s7 + $0x120] sm:$0xff] }
 0x715   :  { %4468 = vmatpush3.msra.mxu1 %v1903_v1  ;;  %1991 = vmatprep.subr.mxu0 %v1899_v7  ;;  %v6777_v1 = vld [vmem:[%s8027_s7 + $0x128] sm:$0xff]  ;;  %v6789_v7 = vld [vmem:[%s8027_s7 + $0x110] sm:$0xff] }
 0x716   :  { %4469 = vmatprep.subr.mxu1 %v1900_v9  ;;  %1992 = vmatpush1.msra.mxu0 %v1898_v12  ;;  %v6801_v12 = vld [vmem:[%s8027_s7 + $0xf8] sm:$0xff] }
 0x717   :  { %4470 = vmatpush3.msra.mxu1 %v1900_v9  ;;  %1993 = vmatprep.subr.mxu0 %v1896_v2  ;;  %v6795_v9 = vld [vmem:[%s8027_s7 + $0x108] sm:$0xff]  ;;  %v6813_v2 = vld [vmem:[%s8027_s7 + $0xe0] sm:$0xff] }
 0x718   :  { %4471 = vmatprep.subr.mxu1 %v1897_v32  ;;  %1994 = vmatpush1.msra.mxu0 %v1895_v6  ;;  %v6825_v6 = vld [vmem:[%s8027_s7 + $0xc8] sm:$0xff] }
 0x719   :  { %4472 = vmatpush3.msra.mxu1 %v1897_v32  ;;  %1995 = vmatprep.subr.mxu0 %v1893_v13  ;;  %v6819_v32 = vld [vmem:[%s8027_s7 + $0xd8] sm:$0xff]  ;;  %v6831_v13 = vld [vmem:[%s8027_s7 + $0xc0] sm:$0xff] }
 0x71a   :  { %4473 = vmatprep.subr.mxu1 %v1894_v37  ;;  %1996 = vmatpush1.msra.mxu0 %v1892_v47  ;;  %v6843_v47 = vld [vmem:[%s8027_s7 + $0xa8] sm:$0xff] }
 0x71b   :  { %4474 = vmatpush3.msra.mxu1 %v1894_v37  ;;  %1997 = vmatprep.subr.mxu0 %v1890_v43  ;;  %v6837_v37 = vld [vmem:[%s8027_s7 + $0xb0] sm:$0xff]  ;;  %v6849_v43 = vld [vmem:[%s8027_s7 + $0x98] sm:$0xff] }
 0x71c   :  { %4475 = vmatprep.subr.mxu1 %v1891_v57  ;;  %1998 = vmatpush1.msra.mxu0 %v1889_v59  ;;  %v6861_v59 = vld [vmem:[%s8027_s7 + $0x80] sm:$0xff] }
 0x71d   :  { %4476 = vmatpush3.msra.mxu1 %v1891_v57  ;;  %1999 = vmatprep.subr.mxu0 %v1887_v61  ;;  %v6855_v57 = vld [vmem:[%s8027_s7 + $0x90] sm:$0xff]  ;;  %v6867_v61 = vld [vmem:[%s8027_s7 + $0x78] sm:$0xff] }
 0x71e   :  { %4477 = vmatprep.subr.mxu1 %v1888_v41  ;;  %2000 = vmatpush1.msra.mxu0 %v1886_v45  ;;  %v6879_v45 = vld [vmem:[%s8027_s7 + $0x60] sm:$0xff] }
 0x71f   :  { %4478 = vmatpush3.msra.mxu1 %v1888_v41  ;;  %2001 = vmatprep.subr.mxu0 %v1884_v49  ;;  %v6873_v41 = vld [vmem:[%s8027_s7 + $0x68] sm:$0xff]  ;;  %v6885_v49 = vld [vmem:[%s8027_s7 + $0x50] sm:$0xff] }
 0x720   :  { %4479 = vmatprep.subr.mxu1 %v1885_v58  ;;  %2002 = vmatpush1.msra.mxu0 %v1883_v55  ;;  %v6897_v55 = vld [vmem:[%s8027_s7 + $0x38] sm:$0xff] }
 0x721   :  { %4480 = vmatpush3.msra.mxu1 %v1885_v58  ;;  %2003 = vmatprep.subr.mxu0 %v1881_v39  ;;  %v6891_v58 = vld [vmem:[%s8027_s7 + $0x48] sm:$0xff]  ;;  %v6903_v39 = vld [vmem:[%s8027_s7 + $0x30] sm:$0xff] }
 0x722   :  { %4481 = vmatprep.subr.mxu1 %v1882_v44  ;;  %2004 = vmatpush1.msra.mxu0 %v1880_v63  ;;  %v6915_v63 = vld [vmem:[%s8027_s7 + $0x18] sm:$0xff] }
 0x723   :  { %4482 = vmatpush3.msra.mxu1 %v1882_v44  ;;  %2005 = vmatprep.subr.mxu0 %v1878_v24  ;;  %v6909_v44 = vld [vmem:[%s8027_s7 + $0x20] sm:$0xff]  ;;  %8195 = vst [vmem:[#allocation20_spill] sm:$0xff] %v6915_v63  ;;  %v6921_v24 = vld [vmem:[%s8027_s7 + $0x8] sm:$0xff] }
 0x724   :  { %4483 = vmatprep.subr.mxu1 %v1879_v16  ;;  %2006 = vmatpush1.msra.mxu0 %v1877_v22  ;;  %8196 = vst [vmem:[#allocation21_spill] sm:$0xff] %v6921_v24  ;;  %v6931_v22 = vld [vmem:[%s8027_s7 + $0x178] sm:$0xff] }
 0x725   :  { %4484 = vmatpush3.msra.mxu1 %v1879_v16  ;;  %2007 = vmatprep.subr.mxu0 %v1875_v30  ;;  %v6926_v16 = vld [vmem:[%s8027_s7] sm:$0xff] }
 0x726   :  { %4485 = vmatprep.subr.mxu1 %v1876_v3  ;;  %2008 = vmatpush1.msra.mxu0 %v1874_v48  ;;  %8197 = vst [vmem:[#allocation28_spill] sm:$0xff] %v6926_v16  ;;  %v6938_v30 = vld [vmem:[%s8027_s7 + $0x160] sm:$0xff]  ;;  %v6953_v48 = vld [vmem:[%s8027_s7 + $0x130] sm:$0xff] }
 0x727   :  { %4486 = vmatpush3.msra.mxu1 %v1876_v3  ;;  %2009 = vmatprep.subr.mxu0 %v1872_v46  ;;  %v6945_v3 = vld [vmem:[%s8027_s7 + $0x148] sm:$0xff]  ;;  %v6960_v46 = vld [vmem:[%s8027_s7 + $0x118] sm:$0xff] }
 0x728   :  { %4487 = vmatprep.subr.mxu1 %v1873_v40  ;;  %2010 = vmatpush1.msra.mxu0 %v1871_v20  ;;  %v6974_v20 = vld [vmem:[%s8027_s7 + $0xe8] sm:$0xff] }
 0x729   :  { %4488 = vmatpush3.msra.mxu1 %v1873_v40  ;;  %2011 = vmatprep.subr.mxu0 %v1869_v38  ;;  %v6967_v40 = vld [vmem:[%s8027_s7 + $0x100] sm:$0xff]  ;;  %v6981_v38 = vld [vmem:[%s8027_s7 + $0xd0] sm:$0xff] }
 0x72a   :  { %4489 = vmatprep.subr.mxu1 %v1870_v18  ;;  %2012 = vmatpush1.msra.mxu0 %v1868_v4  ;;  %v6995_v4 = vld [vmem:[%s8027_s7 + $0xa0] sm:$0xff] }
 0x72b   :  { %4490 = vmatpush3.msra.mxu1 %v1870_v18  ;;  %2013 = vmatprep.subr.mxu0 %v1866_v34  ;;  %v6988_v18 = vld [vmem:[%s8027_s7 + $0xb8] sm:$0xff]  ;;  %v7002_v34 = vld [vmem:[%s8027_s7 + $0x88] sm:$0xff] }
 0x72c   :  { %4491 = vmatprep.subr.mxu1 %v1867_v36  ;;  %2014 = vmatpush1.msra.mxu0 %v1865_v42  ;;  %v7016_v42 = vld [vmem:[%s8027_s7 + $0x58] sm:$0xff] }
 0x72d   :  { %4492 = vmatpush3.msra.mxu1 %v1867_v36  ;;  %2015 = vmatprep.subr.mxu0 %v1863_v10  ;;  %v7009_v36 = vld [vmem:[%s8027_s7 + $0x70] sm:$0xff]  ;;  %v7023_v10 = vld [vmem:[%s8027_s7 + $0x40] sm:$0xff] }
 0x72e   :  { %4493 = vmatprep.subr.mxu1 %v1864_v15  ;;  %2016 = vmatpush1.msra.mxu0 %v1862_v17  ;;  %v7037_v17 = vld [vmem:[%s8027_s7 + $0x10] sm:$0xff] }
 0x72f   :  { %4494 = vmatpush3.msra.mxu1 %v1864_v15  ;;  %2017 = vmatprep.subr.mxu0 %v1860_v19  ;;  %v7030_v15 = vld [vmem:[%s8027_s7 + $0x28] sm:$0xff]  ;;  %8199 = vst [vmem:[#allocation7_spill] sm:$0xff] %v7037_v17 }
 0x730   :  { %4495 = vmatprep.subr.mxu1 %v1861_v21  ;;  %2018 = vmatpush1.msra.mxu0 %v1859_v25  ;;  %8198 = vst [vmem:[#allocation15_spill] sm:$0xff] %v7030_v15  ;;  %v8200_v25 = vld [vmem:[#allocation24_spill] sm:$0xff] }
 0x731   :  { %2051 = vmatprep.mubr.f32.mxu0 %v8136_v28  ;;  %4496 = vmatpush3.msra.mxu1 %v1861_v21 }
 0x732   :  { %3773 = vmatmul.mubr.msk.f32.vlgmr.msra.gmra.mxu0 %vm595_vm9, %v8184_v14  ;;  %4498 = vmatmul.mubr.msk.f32.vlgmr.msra.gmra.mxu1 %vm774_vm10, %v8189_v31  ;;  %v6807_v14 = vld [vmem:[%s8027_s7 + $0xf0] sm:$0xff] }
 0x733   :  { %4500 = vmatprep.mubr.msk.f32.mxu1 %vm954_vm11, %v8190_v33  ;;  %2057 = vmatprep.mubr.f32.mxu0 %v8136_v28 }
 0x734   :  { %4509 = vmatprep.subr.mxu1 %v8136_v28  ;;  %2233 = vmatprep.subr.mxu0 %v6741_v53 }
 0x735   :  { %4510 = vmatpush3.msra.mxu1 %v6931_v22 }
 0x736   :  { %3774 = vmatmul.mubr.msk.f32.gmra.mxu0 %vm774_vm10, %v8189_v31  ;;  %4501 = vmatmul.mubr.msk.f32.gmra.mxu1 %vm1134_vm12, %v8193_v54 }
 0x737   :  { %4503 = vmatprep.mubr.msk.f32.mxu1 %vm1314_vm13, %v6260_v51  ;;  %2063 = vmatprep.mubr.f32.mxu0 %v8136_v28 }
 0x738   :  { %4511 = vmatprep.subr.mxu1 %v8136_v28 }
 0x739   :  { %4512 = vmatpush3.msra.mxu1 %v6938_v30 }
 0x73a   :  { %3775 = vmatmul.mubr.msk.f32.gmra.mxu0 %vm954_vm11, %v8190_v33  ;;  %4504 = vmatmul.mubr.msk.f32.gmra.mxu1 %vm1494_vm14, %v6437_v11 }
 0x73b   :  { %4506 = vmatprep.mubr.msk.f32.mxu1 %vm1674_vm15, %v6526_v60  ;;  %2069 = vmatprep.mubr.f32.mxu0 %v8136_v28 }
 0x73c   :  { %4513 = vmatprep.subr.mxu1 %v8136_v28 }
 0x73d   :  { %4514 = vmatpush3.msra.mxu1 %v6945_v3 }
 0x73e   :  { %3776 = vmatmul.mubr.msk.f32.gmra.mxu0 %vm1134_vm12, %v8193_v54  ;;  %4515 = vmatprep.subr.mxu1 %v8136_v28 }
 0x73f   :  { %2075 = vmatprep.mubr.f32.mxu0 %v8136_v28  ;;  %4516 = vmatpush3.msra.mxu1 %v6953_v48 }
 0x740   :  { %4517 = vmatprep.subr.mxu1 %v8136_v28 }
 0x741   :  { %4518 = vmatpush3.msra.mxu1 %v6960_v46 }
 0x742   :  { %3777 = vmatmul.mubr.msk.f32.gmra.mxu0 %vm1314_vm13, %v6260_v51  ;;  %v6747_v51 = vld [vmem:[%s8027_s7 + $0x168] sm:$0xff]  ;;  %4519 = vmatprep.subr.mxu1 %v8136_v28 }
 0x743   :  { %2081 = vmatprep.mubr.f32.mxu0 %v8136_v28  ;;  %2234 = vmatpush1.msra.mxu0 %v6747_v51 }
 0x744   :  { %4520 = vmatpush3.msra.mxu1 %v6967_v40 }
 0x745   :  { %4521 = vmatprep.subr.mxu1 %v8136_v28 }
 0x746   :  { %3778 = vmatmul.mubr.msk.f32.gmra.mxu0 %vm1494_vm14, %v6437_v11  ;;  %v6753_v11 = vld [vmem:[%s8027_s7 + $0x158] sm:$0xff]  ;;  %4522 = vmatpush3.msra.mxu1 %v6974_v20 }
 0x747   :  { %2087 = vmatprep.mubr.f32.mxu0 %v8136_v28  ;;  %2235 = vmatprep.subr.mxu0 %v6753_v11 }
 0x748   :  { %2236 = vmatpush1.msra.mxu0 %v6759_v50  ;;  %4523 = vmatprep.subr.mxu1 %v8136_v28 }
 0x749   :  { %2237 = vmatprep.subr.mxu0 %v6765_v62  ;;  %4524 = vmatpush3.msra.mxu1 %v6981_v38 }
 0x74a   :  { %3779 = vmatmul.mubr.msk.f32.gmra.mxu0 %vm1674_vm15, %v6526_v60  ;;  %4525 = vmatprep.subr.mxu1 %v8136_v28 }
 0x74b   :  { %2093 = vmatprep.mubr.f32.mxu0 %v8136_v28  ;;  %2238 = vmatpush1.msra.mxu0 %v6771_v0 }
 0x74c   :  { %2239 = vmatprep.subr.mxu0 %v6777_v1  ;;  %4526 = vmatpush3.msra.mxu1 %v6988_v18 }
 0x74d   :  { %2240 = vmatpush1.msra.mxu0 %v6783_v5  ;;  %4527 = vmatprep.subr.mxu1 %v8136_v28 }
 0x74e   :  { %2241 = vmatprep.subr.mxu0 %v6789_v7  ;;  %4528 = vmatpush3.msra.mxu1 %v6995_v4 }
 0x74f   :  { %2242 = vmatpush1.msra.mxu0 %v6795_v9  ;;  %4529 = vmatprep.subr.mxu1 %v8136_v28 }
 0x750   :  { %2243 = vmatprep.subr.mxu0 %v6801_v12  ;;  %4530 = vmatpush3.msra.mxu1 %v7002_v34 }
 0x751   :  { %2244 = vmatpush1.msra.mxu0 %v6807_v14  ;;  %4531 = vmatprep.subr.mxu1 %v8136_v28 }
 0x752   :  { %2245 = vmatprep.subr.mxu0 %v6813_v2  ;;  %4532 = vmatpush3.msra.mxu1 %v7009_v36 }
 0x753   :  { %2246 = vmatpush1.msra.mxu0 %v6819_v32  ;;  %4533 = vmatprep.subr.mxu1 %v8136_v28 }
 0x754   :  { %2247 = vmatprep.subr.mxu0 %v6825_v6  ;;  %4534 = vmatpush3.msra.mxu1 %v7016_v42 }
 0x755   :  { %2248 = vmatpush1.msra.mxu0 %v6831_v13  ;;  %4535 = vmatprep.subr.mxu1 %v8136_v28 }
 0x756   :  { %2249 = vmatprep.subr.mxu0 %v6837_v37  ;;  %4536 = vmatpush3.msra.mxu1 %v7023_v10 }
 0x757   :  { %2250 = vmatpush1.msra.mxu0 %v6843_v47  ;;  %4537 = vmatprep.subr.mxu1 %v8136_v28 }
 0x758   :  { %2251 = vmatprep.subr.mxu0 %v6849_v43  ;;  %4538 = vmatpush3.msra.mxu1 %v7030_v15  ;;  %v8202_v15 = vld [vmem:[#allocation30_spill] sm:$0xff] }
 0x759   :  { %2252 = vmatpush1.msra.mxu0 %v6855_v57  ;;  %4539 = vmatprep.subr.mxu1 %v8136_v28 }
 0x75a   :  { %2253 = vmatprep.subr.mxu0 %v6861_v59  ;;  %4540 = vmatpush3.msra.mxu1 %v7037_v17 }
 0x75b   :  { %2254 = vmatpush1.msra.mxu0 %v6867_v61  ;;  %4544 = vmatprep.subr.mxu1 %v8136_v28 }
 0x75c   :  { %2255 = vmatprep.subr.mxu0 %v6873_v41 }
 0x75d   :  { %2256 = vmatpush1.msra.mxu0 %v6879_v45 }
 0x75e   :  { %2257 = vmatprep.subr.mxu0 %v6885_v49 }
 0x75f   :  { %2258 = vmatpush1.msra.mxu0 %v6891_v58 }
 0x760   :  { %2259 = vmatprep.subr.mxu0 %v6897_v55 }
 0x761   :  { %2260 = vmatpush1.msra.mxu0 %v6903_v39 }
 0x762   :  { %2261 = vmatprep.subr.mxu0 %v6909_v44 }
 0x763   :  { %2262 = vmatpush1.msra.mxu0 %v6915_v63 }
 0x764   :  { %2263 = vmatprep.subr.mxu0 %v6921_v24 }
 0x765   :  { %2264 = vmatpush1.msra.mxu0 %v6926_v16 }
 0x766   :  { %2401 = vmatprep.subr.mxu0 %v6741_v53 }
 0x7d1   :  { %v1750_v19 = vpop.f32.mrf.mxu0  ;;  %v1821_v21 = vpop.f32.mrf.mxu1 }
 0x7d2   :  { %v1825_v31 = vadd.f32 %v1750_v19, %v8200_v25  ;;  %v1839_v17 = vadd.f32 %v6519_v23, %v1821_v21  ;;  %v8204_v23 = vld [vmem:[#allocation15_spill] sm:$0xff] }
 0x7d3   :  { %v4464_v33 = vpop.f32.mrf.mxu1  ;;  %v1752_v52 = vpop.f32.mrf.mxu0 }
 0x7d4   :  { %v3752_v54 = vmul.f32 -1.442695, %v1825_v31  ;;  %v1832_v29 = vadd.f32 %v1752_v52, %v8201_v35  ;;  %v8208_v35 = vld [vmem:[#allocation29_spill] sm:$0xff] }
 0x7d6   :  { %4908 = vpow2.f32 %v3752_v54  ;;  %v3753_v27 = vmul.f32 -1.442695, %v1832_v29  ;;  %v7047_v54 = vpop.permute.xlu1 %1852 }
 0x7d7   :  { %8203 = vst [vmem:[#allocation8_spill] sm:$0xff] %v7047_v54  ;;  %vm1854_vm1 = vcmp.eq.s32.totalorder %v7047_v54, 1 }
 0x7d8   :  { %4910 = vpow2.f32 %v3753_v27 }
 0x7e3   :  { %v4909_v26 = vpop.eup %4908 }
 0x7e4   :  { %v1829_v8 = vadd.f32 1.0, %v4909_v26 }
 0x7e5   :  { %v4911_v56 = vpop.eup %4910 }
 0x7e6   :  { %4912 = vrcp.f32 %v1829_v8  ;;  %v1836_v53 = vadd.f32 1.0, %v4911_v56  ;;  %v8205_v56 = vld [vmem:[#allocation21_spill] sm:$0xff]  ;;  %v8207_v8 = vld [vmem:[#allocation7_spill] sm:$0xff] }
 0x7e8   :  { %4914 = vrcp.f32 %v1836_v53 }
 0x7f2   :  { %v2053_v52 = vpop.f32.mrf.mxu0 }
 0x7f3   :  { %v4913_v16 = vpop.eup %4912 }
 0x7f4   :  { %v1840_v24 = vmul.f32 %v4913_v16, %v1839_v17  ;;  %v2055_v53 = vpop.f32.mrf.mxu0 }
 0x7f5   :  { %v4915_v25 = vpop.eup %4914 }
 0x7f6   :  { %v1841_v19 = vadd.f32 %v1840_v24, %v8202_v15  ;;  %v1843_v31 = vsub.f32 1.0, %v4915_v25  ;;  %v1845_v27 = vmul.f32 %v4915_v25, %v6526_v60  ;;  %v8206_v60 = vld [vmem:[#allocation28_spill] sm:$0xff]  ;;  %v7127_v24 = vpop.f32.mrf.mxu0  ;;  %v7139_v25 = vpop.f32.mrf.mxu1 }
 0x7f7   :  { %8209 = vst [vmem:[#allocation27_spill] sm:$0xff] %v7127_v24  ;;  %8215 = vst [vmem:[#allocation6_spill] sm:$0xff] %v7139_v25 }
 0x7f8   :  { %4916 = vtanh.f32 %v1841_v19  ;;  %v7129_v16 = vpop.f32.mrf.mxu0 }
 0x7f9   :  { %8210 = vst [vmem:[#allocation16_spill] sm:$0xff] %v7129_v16 }
 0x7fa   :  { %v7131_v15 = vpop.f32.mrf.mxu0 }
 0x7fb   :  { %8211 = vst [vmem:[#allocation22_spill] sm:$0xff] %v7131_v15 }
 0x7fc   :  { %v7133_v17 = vpop.f32.mrf.mxu0 }
 0x7fd   :  { %8212 = vst [vmem:[#allocation23_spill] sm:$0xff] %v7133_v17 }
 0x7fe   :  { %v7135_v21 = vpop.f32.mrf.mxu0 }
 0x7ff   :  { %8213 = vst [vmem:[#allocation31_spill] sm:$0xff] %v7135_v21 }
 0x800   :  { %v7137_v19 = vpop.f32.mrf.mxu0 }
 0x801   :  { %8214 = vst [vmem:[#allocation32_spill] sm:$0xff] %v7137_v19  ;;  %v1955_v19 = vld [vmem:[%s8028_s8] sm:$0x7] }
 0x805   :  { %v4917_v33 = vpop.eup %4916 }
 0x806   :  { %v1844_v29 = vmul.f32 %v4917_v33, %v1843_v31  ;;  %v7141_v31 = vpop.f32.mrf.mxu0  ;;  %v2166_v33 = vpop.f32.mrf.mxu1 }
 0x807   :  { %8216 = vst [vmem:[#allocation13_spill] sm:$0xff] %v7141_v31 }
 0x808   :  { %v1846_v26 = vadd.f32 %v1845_v27, %v1844_v29  ;;  %v7143_v29 = vpop.f32.mrf.mxu0  ;;  %v7145_v27 = vpop.f32.mrf.mxu1 }
 0x809   :  { %8217 = vst [vmem:[#allocation14_spill] sm:$0xff] %v7143_v29  ;;  %8218 = vst [vmem:[#allocation24_spill] sm:$0xff] %v7145_v27  ;;  %v8226_v29 = vld [vmem:[#allocation11_spill] sm:$0xff] }
 0x80a   :  { %3780 = vmatmul.mubr.msk.f32.gmra.mxu0 %vm1854_vm1, %v1846_v26  ;;  %4507 = vmatmul.mubr.msk.f32.gmra.mxu1 %vm1854_vm1, %v1846_v26  ;;  %v7147_v26 = vpop.f32.mrf.mxu0  ;;  %v7149_v54 = vpop.f32.mrf.mxu1  ;;  %v8227_v27 = vsub.s32 0, %v8226_v29 }
 0x80b   :  { %2297 = vmatprep.mubr.f32.mxu0 %v8136_v28  ;;  %4541 = vmatprep.mubr.msk.f32.mxu1 %vm5097_vm0, %v8136_v28  ;;  %8219 = vst [vmem:[#allocation25_spill] sm:$0xff] %v7147_v26  ;;  %8220 = vst [vmem:[#allocation30_spill] sm:$0xff] %v7149_v54 }
 0x80c   :  { %v7151_v15 = vpop.f32.mrf.mxu0  ;;  %v7153_v17 = vpop.f32.mrf.mxu1  ;;  %v7166_v16 = vrot.slane %v1955_v19, %v8227_v27 }
 0x80d   :  { %8221 = vst [vmem:[#allocation33_spill] sm:$0xff] %v7151_v15  ;;  %8222 = vst [vmem:[#allocation34_spill] sm:$0xff] %v7153_v17 }
 0x80e   :  { %2298 = vmatmul.mubr.f32.vlgmr.msra.gmra.mxu0 %v8136_v28  ;;  %4542 = vmatmul.mubr.f32.vlgmr.msra.gmra.mxu1 %v8136_v28  ;;  %v7155_v21 = vpop.f32.mrf.mxu0  ;;  %v7160_v31 = vpop.f32.mrf.mxu1  ;;  %8228 = vst [vmem:[#allocation11_spill] sm:$0xff] %v7166_v16 }
 0x80f   :  { %2402 = vmatpush1.msra.mxu0 %v6747_v51  ;;  %4545 = vmatpush3.msra.mxu1 %v6931_v22  ;;  %8223 = vst [vmem:[#allocation35_spill] sm:$0xff] %v7155_v21  ;;  %8224 = vst [vmem:[#allocation36_spill] sm:$0xff] %v7160_v31  ;;  %v2054_v21 = vadd.f32 %v2053_v52, %v7166_v16  ;;  %v8233_v31 = vsub.s32 1, %v8226_v29  ;;  %v7185_v16 = vld [vmem:[%s8029_s9] ss:$0 sm:$0xff] }
 0x810   :  { %2403 = vmatprep.subr.mxu0 %v6753_v11  ;;  %4546 = vmatprep.subr.mxu1 %v8136_v28  ;;  %v7162_v25 = vpop.f32.mrf.mxu0 }
 0x811   :  { %2404 = vmatpush1.msra.mxu0 %v6759_v50  ;;  %4547 = vmatpush3.msra.mxu1 %v6938_v30  ;;  %8225 = vst [vmem:[#allocation37_spill] sm:$0xff] %v7162_v25 }
 0x812   :  { %2405 = vmatprep.subr.mxu0 %v6765_v62  ;;  %4548 = vmatprep.subr.mxu1 %v8136_v28 }
 0x813   :  { %2406 = vmatpush1.msra.mxu0 %v6771_v0  ;;  %4549 = vmatpush3.msra.mxu1 %v6945_v3 }
 0x814   :  { %2407 = vmatprep.subr.mxu0 %v6777_v1  ;;  %4550 = vmatprep.subr.mxu1 %v8136_v28 }
 0x815   :  { %2408 = vmatpush1.msra.mxu0 %v6783_v5  ;;  %4551 = vmatpush3.msra.mxu1 %v6953_v48 }
 0x816   :  { %2409 = vmatprep.subr.mxu0 %v6789_v7  ;;  %4552 = vmatprep.subr.mxu1 %v8136_v28 }
 0x817   :  { %2410 = vmatpush1.msra.mxu0 %v6795_v9  ;;  %4553 = vmatpush3.msra.mxu1 %v6960_v46 }
 0x818   :  { %2411 = vmatprep.subr.mxu0 %v6801_v12  ;;  %4554 = vmatprep.subr.mxu1 %v8136_v28 }
 0x819   :  { %2412 = vmatpush1.msra.mxu0 %v6807_v14  ;;  %4555 = vmatpush3.msra.mxu1 %v6967_v40 }
 0x81a   :  { %2413 = vmatprep.subr.mxu0 %v6813_v2  ;;  %4556 = vmatprep.subr.mxu1 %v8136_v28 }
 0x81b   :  { %2414 = vmatpush1.msra.mxu0 %v6819_v32  ;;  %4557 = vmatpush3.msra.mxu1 %v6974_v20 }
 0x81c   :  { %2415 = vmatprep.subr.mxu0 %v6825_v6  ;;  %4558 = vmatprep.subr.mxu1 %v8136_v28 }
 0x81d   :  { %2416 = vmatpush1.msra.mxu0 %v6831_v13  ;;  %4559 = vmatpush3.msra.mxu1 %v6981_v38 }
 0x81e   :  { %2417 = vmatprep.subr.mxu0 %v6837_v37  ;;  %4560 = vmatprep.subr.mxu1 %v8136_v28 }
 0x81f   :  { %2418 = vmatpush1.msra.mxu0 %v6843_v47  ;;  %4561 = vmatpush3.msra.mxu1 %v6988_v18 }
 0x820   :  { %2419 = vmatprep.subr.mxu0 %v6849_v43  ;;  %4562 = vmatprep.subr.mxu1 %v8136_v28 }
 0x821   :  { %2420 = vmatpush1.msra.mxu0 %v6855_v57  ;;  %4563 = vmatpush3.msra.mxu1 %v6995_v4 }
 0x822   :  { %2421 = vmatprep.subr.mxu0 %v6861_v59  ;;  %4564 = vmatprep.subr.mxu1 %v8136_v28 }
 0x823   :  { %2422 = vmatpush1.msra.mxu0 %v6867_v61  ;;  %4565 = vmatpush3.msra.mxu1 %v7002_v34 }
 0x824   :  { %2423 = vmatprep.subr.mxu0 %v6873_v41  ;;  %4566 = vmatprep.subr.mxu1 %v8136_v28 }
 0x825   :  { %2424 = vmatpush1.msra.mxu0 %v6879_v45  ;;  %4567 = vmatpush3.msra.mxu1 %v7009_v36 }
 0x826   :  { %2425 = vmatprep.subr.mxu0 %v6885_v49  ;;  %4568 = vmatprep.subr.mxu1 %v8136_v28 }
 0x827   :  { %2426 = vmatpush1.msra.mxu0 %v6891_v58  ;;  %4569 = vmatpush3.msra.mxu1 %v7016_v42 }
 0x828   :  { %2427 = vmatprep.subr.mxu0 %v6897_v55  ;;  %4570 = vmatprep.subr.mxu1 %v8136_v28 }
 0x829   :  { %2428 = vmatpush1.msra.mxu0 %v6903_v39  ;;  %4571 = vmatpush3.msra.mxu1 %v7023_v10 }
 0x82a   :  { %2429 = vmatprep.subr.mxu0 %v6909_v44  ;;  %4572 = vmatprep.subr.mxu1 %v8136_v28 }
 0x82b   :  { %2430 = vmatpush1.msra.mxu0 %v6915_v63  ;;  %4573 = vmatpush3.msra.mxu1 %v8204_v23 }
 0x82c   :  { %2431 = vmatprep.subr.mxu0 %v8205_v56  ;;  %4574 = vmatprep.subr.mxu1 %v8136_v28 }
 0x82d   :  { %2432 = vmatpush1.msra.mxu0 %v8206_v60  ;;  %2465 = vmatprep.mubr.f32.mxu0 %v8136_v28 }
 0x82e   :  { %4575 = vmatpush3.msra.mxu1 %v8207_v8  ;;  %4576 = vmatprep.mubr.msk.f32.mxu1 %vm5097_vm0, %v8136_v28  ;;  %v7179_v8 = vrot.slane %v1955_v19, %v8233_v31 }
 0x82f   :  { %2569 = vmatprep.subr.mxu0 %v8208_v35  ;;  %4579 = vmatprep.subr.mxu1 %v8136_v28 }
 0x830   :  { %8234 = vst [vmem:[#allocation42_spill] sm:$0xff] %v7179_v8 }
 0x8ca   :  { %v7168_v26 = vpop.f32.mrf.mxu0  ;;  %v7170_v54 = vpop.f32.mrf.mxu1 }
 0x8cb   :  { %8229 = vst [vmem:[#allocation38_spill] sm:$0xff] %v7168_v26  ;;  %8230 = vst [vmem:[#allocation39_spill] sm:$0xff] %v7170_v54  ;;  %v2056_v26 = vadd.f32 %v2055_v53, %v7179_v8 }
 0x8cc   :  { %v7172_v15 = vpop.f32.mrf.mxu0  ;;  %v7174_v17 = vpop.f32.mrf.mxu1 }
 0x8cd   :  { %8231 = vst [vmem:[#allocation40_spill] sm:$0xff] %v7172_v15  ;;  %8232 = vst [vmem:[#allocation41_spill] sm:$0xff] %v7174_v17 }
 0x8ce   :  { %v2299_v24 = vpop.f32.mrf.mxu0  ;;  %v2370_v35 = vpop.f32.mrf.mxu1 }
 0x8cf   :  { %v2374_v25 = vadd.f32 %v2299_v24, %v2054_v21  ;;  %v8235_v24 = vsub.s32 2, %v8226_v29  ;;  %v8240_v29 = vld [vmem:[#allocation7_spill] sm:$0xff] }
 0x8d0   :  { %v4543_v60 = vpop.f32.mrf.mxu1  ;;  %v2301_v56 = vpop.f32.mrf.mxu0 }
 0x8d1   :  { %v3756_v27 = vmul.f32 -1.442695, %v2374_v25  ;;  %v2381_v54 = vadd.f32 %v2301_v56, %v2056_v26  ;;  %v2388_v60 = vadd.f32 %v7185_v16, %v2370_v35  ;;  %v7190_v21 = vrot.slane %v1955_v19, %v8235_v24  ;;  %v8237_v35 = vld [vmem:[#allocation15_spill] sm:$0xff]  ;;  %v8238_v19 = vld [vmem:[#allocation21_spill] sm:$0xff] }
 0x8d3   :  { %4918 = vpow2.f32 %v3756_v27  ;;  %v3757_v23 = vmul.f32 -1.442695, %v2381_v54  ;;  %v2167_v54 = vadd.f32 %v2166_v33, %v7190_v21  ;;  %v8239_v33 = vld [vmem:[#allocation28_spill] sm:$0xff] }
 0x8d5   :  { %4920 = vpow2.f32 %v3757_v23 }
 0x8e0   :  { %v4919_v15 = vpop.eup %4918 }
 0x8e1   :  { %v2378_v17 = vadd.f32 1.0, %v4919_v15 }
 0x8e2   :  { %v4921_v52 = vpop.eup %4920 }
 0x8e3   :  { %4922 = vrcp.f32 %v2378_v17  ;;  %v2385_v31 = vadd.f32 1.0, %v4921_v52  ;;  %v8241_v52 = vld [vmem:[#allocation29_spill] sm:$0xff] }
 0x8e5   :  { %4924 = vrcp.f32 %v2385_v31  ;;  %v8242_v31 = vld [vmem:[#allocation11_spill] sm:$0xff] }
 0x8f0   :  { %v4923_v53 = vpop.eup %4922 }
 0x8f1   :  { %v2389_v23 = vmul.f32 %v4923_v53, %v2388_v60  ;;  %v8243_v60 = vld [vmem:[#allocation27_spill] sm:$0xff] }
 0x8f2   :  { %v4925_v15 = vpop.eup %4924  ;;  %v2060_v24 = vadd.f32 %v8243_v60, %v8242_v31 }
 0x8f3   :  { %v2390_v56 = vadd.f32 %v2389_v23, %v2167_v54  ;;  %v2392_v17 = vsub.f32 1.0, %v4925_v15  ;;  %v2394_v27 = vmul.f32 0.0, %v4925_v15 }
 0x8f5   :  { %4926 = vtanh.f32 %v2390_v56 }
 0x902   :  { %v4927_v25 = vpop.eup %4926 }
 0x903   :  { %v2393_v26 = vmul.f32 %v4927_v25, %v2392_v17  ;;  %v8244_v25 = vld [vmem:[#allocation42_spill] sm:$0xff] }
 0x905   :  { %v7193_v8 = vadd.f32 %v2394_v27, %v2393_v26  ;;  %v8245_v26 = vld [vmem:[#allocation16_spill] sm:$0xff] }
 0x906   :  { %v2062_v27 = vadd.f32 %v8245_v26, %v8244_v25 }
 0x907   :  { %8236 = vst [vmem:[#allocation43_spill] sm:$0xff] %v7193_v8  ;;  %2466 = vmatmul.mubr.f32.vlgmr.msra.gmra.mxu0 %v7193_v8  ;;  %4577 = vmatmul.mubr.f32.vlgmr.msra.gmra.mxu1 %v7193_v8 }
 0x908   :  { %2570 = vmatpush1.msra.mxu0 %v6747_v51  ;;  %4580 = vmatpush3.msra.mxu1 %v6931_v22 }
 0x909   :  { %2571 = vmatprep.subr.mxu0 %v6753_v11  ;;  %4581 = vmatprep.subr.mxu1 %v8136_v28 }
 0x90a   :  { %2572 = vmatpush1.msra.mxu0 %v6759_v50  ;;  %4582 = vmatpush3.msra.mxu1 %v6938_v30 }
 0x90b   :  { %2573 = vmatprep.subr.mxu0 %v6765_v62  ;;  %4583 = vmatprep.subr.mxu1 %v8136_v28 }
 0x90c   :  { %2574 = vmatpush1.msra.mxu0 %v6771_v0  ;;  %4584 = vmatpush3.msra.mxu1 %v6945_v3 }
 0x90d   :  { %2575 = vmatprep.subr.mxu0 %v6777_v1  ;;  %4585 = vmatprep.subr.mxu1 %v8136_v28 }
 0x90e   :  { %2576 = vmatpush1.msra.mxu0 %v6783_v5  ;;  %4586 = vmatpush3.msra.mxu1 %v6953_v48 }
 0x90f   :  { %2577 = vmatprep.subr.mxu0 %v6789_v7  ;;  %4587 = vmatprep.subr.mxu1 %v8136_v28 }
 0x910   :  { %2578 = vmatpush1.msra.mxu0 %v6795_v9  ;;  %4588 = vmatpush3.msra.mxu1 %v6960_v46 }
 0x911   :  { %2579 = vmatprep.subr.mxu0 %v6801_v12  ;;  %4589 = vmatprep.subr.mxu1 %v8136_v28 }
 0x912   :  { %2580 = vmatpush1.msra.mxu0 %v6807_v14  ;;  %4590 = vmatpush3.msra.mxu1 %v6967_v40 }
 0x913   :  { %2581 = vmatprep.subr.mxu0 %v6813_v2  ;;  %4591 = vmatprep.subr.mxu1 %v8136_v28 }
 0x914   :  { %2582 = vmatpush1.msra.mxu0 %v6819_v32  ;;  %4592 = vmatpush3.msra.mxu1 %v6974_v20 }
 0x915   :  { %2583 = vmatprep.subr.mxu0 %v6825_v6  ;;  %4593 = vmatprep.subr.mxu1 %v8136_v28 }
 0x916   :  { %2584 = vmatpush1.msra.mxu0 %v6831_v13  ;;  %4594 = vmatpush3.msra.mxu1 %v6981_v38 }
 0x917   :  { %2585 = vmatprep.subr.mxu0 %v6837_v37  ;;  %4595 = vmatprep.subr.mxu1 %v8136_v28 }
 0x918   :  { %2586 = vmatpush1.msra.mxu0 %v6843_v47  ;;  %4596 = vmatpush3.msra.mxu1 %v6988_v18 }
 0x919   :  { %2587 = vmatprep.subr.mxu0 %v6849_v43  ;;  %4597 = vmatprep.subr.mxu1 %v8136_v28 }
 0x91a   :  { %2588 = vmatpush1.msra.mxu0 %v6855_v57  ;;  %4598 = vmatpush3.msra.mxu1 %v6995_v4 }
 0x91b   :  { %2589 = vmatprep.subr.mxu0 %v6861_v59  ;;  %4599 = vmatprep.subr.mxu1 %v8136_v28 }
 0x91c   :  { %2590 = vmatpush1.msra.mxu0 %v6867_v61  ;;  %4600 = vmatpush3.msra.mxu1 %v7002_v34 }
 0x91d   :  { %2591 = vmatprep.subr.mxu0 %v6873_v41  ;;  %4601 = vmatprep.subr.mxu1 %v8136_v28 }
 0x91e   :  { %2592 = vmatpush1.msra.mxu0 %v6879_v45  ;;  %4602 = vmatpush3.msra.mxu1 %v7009_v36 }
 0x91f   :  { %2593 = vmatprep.subr.mxu0 %v6885_v49  ;;  %4603 = vmatprep.subr.mxu1 %v8136_v28 }
 0x920   :  { %2594 = vmatpush1.msra.mxu0 %v6891_v58  ;;  %4604 = vmatpush3.msra.mxu1 %v7016_v42 }
 0x921   :  { %2595 = vmatprep.subr.mxu0 %v6897_v55  ;;  %4605 = vmatprep.subr.mxu1 %v8136_v28 }
 0x922   :  { %2596 = vmatpush1.msra.mxu0 %v6903_v39  ;;  %4606 = vmatpush3.msra.mxu1 %v7023_v10 }
 0x923   :  { %2597 = vmatprep.subr.mxu0 %v6909_v44  ;;  %4607 = vmatprep.subr.mxu1 %v8136_v28 }
 0x924   :  { %2598 = vmatpush1.msra.mxu0 %v6915_v63  ;;  %4608 = vmatpush3.msra.mxu1 %v8237_v35 }
 0x925   :  { %2599 = vmatprep.subr.mxu0 %v8238_v19  ;;  %4609 = vmatprep.subr.mxu1 %v8136_v28 }
 0x926   :  { %2600 = vmatpush1.msra.mxu0 %v8239_v33  ;;  %2633 = vmatprep.mubr.f32.mxu0 %v8136_v28 }
 0x927   :  { %4610 = vmatpush3.msra.mxu1 %v8240_v29  ;;  %4611 = vmatprep.mubr.msk.f32.mxu1 %vm5097_vm0, %v8136_v28 }
 0x928   :  { %2737 = vmatprep.subr.mxu0 %v8241_v52  ;;  %4614 = vmatprep.subr.mxu1 %v8136_v28 }
 0x9c7   :  { %v2467_v53 = vpop.f32.mrf.mxu0  ;;  %v2538_v54 = vpop.f32.mrf.mxu1 }
 0x9c8   :  { %v2542_v23 = vadd.f32 %v2467_v53, %v2060_v24  ;;  %v2556_v60 = vadd.f32 %v7185_v16, %v2538_v54  ;;  %v8246_v24 = vld [vmem:[#allocation6_spill] sm:$0xff]  ;;  %v8252_v54 = vld [vmem:[#allocation7_spill] sm:$0xff] }
 0x9c9   :  { %v4578_v56 = vpop.f32.mrf.mxu1  ;;  %v2469_v17 = vpop.f32.mrf.mxu0  ;;  %v2172_v53 = vadd.f32 %v8246_v24, %v7190_v21  ;;  %v8255_v24 = vld [vmem:[#allocation22_spill] sm:$0xff] }
 0x9ca   :  { %v3758_v15 = vmul.f32 -1.442695, %v2542_v23  ;;  %v2549_v29 = vadd.f32 %v2469_v17, %v2062_v27  ;;  %v8253_v27 = vld [vmem:[#allocation29_spill] sm:$0xff] }
 0x9cc   :  { %4928 = vpow2.f32 %v3758_v15  ;;  %v3759_v33 = vmul.f32 -1.442695, %v2549_v29 }
 0x9ce   :  { %4930 = vpow2.f32 %v3759_v33 }
 0x9d9   :  { %v4929_v19 = vpop.eup %4928 }
 0x9da   :  { %v2546_v52 = vadd.f32 1.0, %v4929_v19 }
 0x9db   :  { %v4931_v35 = vpop.eup %4930 }
 0x9dc   :  { %4932 = vrcp.f32 %v2546_v52  ;;  %v2553_v63 = vadd.f32 1.0, %v4931_v35  ;;  %v8249_v35 = vld [vmem:[#allocation15_spill] sm:$0xff]  ;;  %v8250_v52 = vld [vmem:[#allocation21_spill] sm:$0xff] }
 0x9de   :  { %4934 = vrcp.f32 %v2553_v63  ;;  %v8248_v63 = vld [vmem:[#allocation20_spill] sm:$0xff] }
 0x9e9   :  { %v4933_v31 = vpop.eup %4932 }
 0x9ea   :  { %v2557_v23 = vmul.f32 %v4933_v31, %v2556_v60  ;;  %v8251_v31 = vld [vmem:[#allocation28_spill] sm:$0xff]  ;;  %v8254_v60 = vld [vmem:[#allocation11_spill] sm:$0xff] }
 0x9eb   :  { %v4935_v26 = vpop.eup %4934 }
 0x9ec   :  { %v2558_v56 = vadd.f32 %v2557_v23, %v2172_v53  ;;  %v2560_v15 = vsub.f32 1.0, %v4935_v26  ;;  %v2562_v33 = vmul.f32 %v4935_v26, %v7193_v8  ;;  %v2066_v53 = vadd.f32 %v8255_v24, %v8254_v60 }
 0x9ee   :  { %4936 = vtanh.f32 %v2558_v56 }
 0x9fb   :  { %v4937_v17 = vpop.eup %4936 }
 0x9fc   :  { %v2561_v29 = vmul.f32 %v4937_v17, %v2560_v15 }
 0x9fe   :  { %v7272_v19 = vadd.f32 %v2562_v33, %v2561_v29  ;;  %v8256_v33 = vld [vmem:[#allocation23_spill] sm:$0xff] }
 0x9ff   :  { %v2068_v8 = vadd.f32 %v8256_v33, %v8244_v25 }
 0xa00   :  { %8247 = vst [vmem:[#allocation27_spill] sm:$0xff] %v7272_v19  ;;  %2634 = vmatmul.mubr.f32.vlgmr.msra.gmra.mxu0 %v7272_v19  ;;  %4612 = vmatmul.mubr.f32.vlgmr.msra.gmra.mxu1 %v7272_v19 }
 0xa01   :  { %2738 = vmatpush1.msra.mxu0 %v6747_v51  ;;  %4615 = vmatpush3.msra.mxu1 %v6931_v22 }
 0xa02   :  { %2739 = vmatprep.subr.mxu0 %v6753_v11  ;;  %4616 = vmatprep.subr.mxu1 %v8136_v28 }
 0xa03   :  { %2740 = vmatpush1.msra.mxu0 %v6759_v50  ;;  %4617 = vmatpush3.msra.mxu1 %v6938_v30 }
 0xa04   :  { %2741 = vmatprep.subr.mxu0 %v6765_v62  ;;  %4618 = vmatprep.subr.mxu1 %v8136_v28 }
 0xa05   :  { %2742 = vmatpush1.msra.mxu0 %v6771_v0  ;;  %4619 = vmatpush3.msra.mxu1 %v6945_v3 }
 0xa06   :  { %2743 = vmatprep.subr.mxu0 %v6777_v1  ;;  %4620 = vmatprep.subr.mxu1 %v8136_v28 }
 0xa07   :  { %2744 = vmatpush1.msra.mxu0 %v6783_v5  ;;  %4621 = vmatpush3.msra.mxu1 %v6953_v48 }
 0xa08   :  { %2745 = vmatprep.subr.mxu0 %v6789_v7  ;;  %4622 = vmatprep.subr.mxu1 %v8136_v28 }
 0xa09   :  { %2746 = vmatpush1.msra.mxu0 %v6795_v9  ;;  %4623 = vmatpush3.msra.mxu1 %v6960_v46 }
 0xa0a   :  { %2747 = vmatprep.subr.mxu0 %v6801_v12  ;;  %4624 = vmatprep.subr.mxu1 %v8136_v28 }
 0xa0b   :  { %2748 = vmatpush1.msra.mxu0 %v6807_v14  ;;  %4625 = vmatpush3.msra.mxu1 %v6967_v40 }
 0xa0c   :  { %2749 = vmatprep.subr.mxu0 %v6813_v2  ;;  %4626 = vmatprep.subr.mxu1 %v8136_v28 }
 0xa0d   :  { %2750 = vmatpush1.msra.mxu0 %v6819_v32  ;;  %4627 = vmatpush3.msra.mxu1 %v6974_v20 }
 0xa0e   :  { %2751 = vmatprep.subr.mxu0 %v6825_v6  ;;  %4628 = vmatprep.subr.mxu1 %v8136_v28 }
 0xa0f   :  { %2752 = vmatpush1.msra.mxu0 %v6831_v13  ;;  %4629 = vmatpush3.msra.mxu1 %v6981_v38 }
 0xa10   :  { %2753 = vmatprep.subr.mxu0 %v6837_v37  ;;  %4630 = vmatprep.subr.mxu1 %v8136_v28 }
 0xa11   :  { %2754 = vmatpush1.msra.mxu0 %v6843_v47  ;;  %4631 = vmatpush3.msra.mxu1 %v6988_v18 }
 0xa12   :  { %2755 = vmatprep.subr.mxu0 %v6849_v43  ;;  %4632 = vmatprep.subr.mxu1 %v8136_v28 }
 0xa13   :  { %2756 = vmatpush1.msra.mxu0 %v6855_v57  ;;  %4633 = vmatpush3.msra.mxu1 %v6995_v4 }
 0xa14   :  { %2757 = vmatprep.subr.mxu0 %v6861_v59  ;;  %4634 = vmatprep.subr.mxu1 %v8136_v28 }
 0xa15   :  { %2758 = vmatpush1.msra.mxu0 %v6867_v61  ;;  %4635 = vmatpush3.msra.mxu1 %v7002_v34 }
 0xa16   :  { %2759 = vmatprep.subr.mxu0 %v6873_v41  ;;  %4636 = vmatprep.subr.mxu1 %v8136_v28 }
 0xa17   :  { %2760 = vmatpush1.msra.mxu0 %v6879_v45  ;;  %4637 = vmatpush3.msra.mxu1 %v7009_v36 }
 0xa18   :  { %2761 = vmatprep.subr.mxu0 %v6885_v49  ;;  %4638 = vmatprep.subr.mxu1 %v8136_v28 }
 0xa19   :  { %2762 = vmatpush1.msra.mxu0 %v6891_v58  ;;  %4639 = vmatpush3.msra.mxu1 %v7016_v42 }
 0xa1a   :  { %2763 = vmatprep.subr.mxu0 %v6897_v55  ;;  %4640 = vmatprep.subr.mxu1 %v8136_v28 }
 0xa1b   :  { %2764 = vmatpush1.msra.mxu0 %v6903_v39  ;;  %4641 = vmatpush3.msra.mxu1 %v7023_v10 }
 0xa1c   :  { %2765 = vmatprep.subr.mxu0 %v6909_v44  ;;  %4642 = vmatprep.subr.mxu1 %v8136_v28 }
 0xa1d   :  { %2766 = vmatpush1.msra.mxu0 %v8248_v63  ;;  %4643 = vmatpush3.msra.mxu1 %v8249_v35 }
 0xa1e   :  { %2767 = vmatprep.subr.mxu0 %v8250_v52  ;;  %4644 = vmatprep.subr.mxu1 %v8136_v28 }
 0xa1f   :  { %2768 = vmatpush1.msra.mxu0 %v8251_v31  ;;  %2801 = vmatprep.mubr.f32.mxu0 %v8136_v28 }
 0xa20   :  { %4645 = vmatpush3.msra.mxu1 %v8252_v54  ;;  %4646 = vmatprep.mubr.msk.f32.mxu1 %vm5097_vm0, %v8136_v28 }
 0xa21   :  { %2905 = vmatprep.subr.mxu0 %v8253_v27  ;;  %4649 = vmatprep.subr.mxu1 %v8136_v28 }
 0xac0   :  { %v2635_v23 = vpop.f32.mrf.mxu0  ;;  %v2706_v56 = vpop.f32.mrf.mxu1 }
 0xac1   :  { %v2710_v26 = vadd.f32 %v2635_v23, %v2066_v53  ;;  %v2724_v24 = vadd.f32 %v7185_v16, %v2706_v56  ;;  %v8257_v53 = vld [vmem:[#allocation30_spill] sm:$0xff]  ;;  %v7508_v56 = vld [vmem:[%s8027_s7 + $0x108] sm:$0xff] }
 0xac2   :  { %v4613_v15 = vpop.f32.mrf.mxu1  ;;  %v2637_v29 = vpop.f32.mrf.mxu0  ;;  %v2177_v23 = vadd.f32 %v8257_v53, %v7190_v21  ;;  %v7533_v53 = vld [vmem:[%s8027_s7 + $0x100] sm:$0xff] }
 0xac3   :  { %v3760_v17 = vmul.f32 -1.442695, %v2710_v26  ;;  %v2717_v54 = vadd.f32 %v2637_v29, %v2068_v8  ;;  %v7514_v29 = vld [vmem:[%s8027_s7 + $0x118] sm:$0xff] }
 0xac5   :  { %4938 = vpow2.f32 %v3760_v17  ;;  %v3761_v31 = vmul.f32 -1.442695, %v2717_v54 }
 0xac7   :  { %4940 = vpow2.f32 %v3761_v31 }
 0xad2   :  { %v4939_v52 = vpop.eup %4938 }
 0xad3   :  { %v2714_v27 = vadd.f32 1.0, %v4939_v52 }
 0xad4   :  { %v4941_v35 = vpop.eup %4940 }
 0xad5   :  { %4942 = vrcp.f32 %v2714_v27  ;;  %v2721_v63 = vadd.f32 1.0, %v4941_v35  ;;  %v7495_v35 = vld [vmem:[%s8027_s7 + $0x130] sm:$0xff]  ;;  %v7520_v27 = vld [vmem:[%s8027_s7 + $0xf8] sm:$0xff] }
 0xad7   :  { %4944 = vrcp.f32 %v2721_v63  ;;  %v7489_v63 = vld [vmem:[%s8027_s7 + $0x120] sm:$0xff] }
 0xae2   :  { %v4943_v60 = vpop.eup %4942 }
 0xae3   :  { %v2725_v26 = vmul.f32 %v4943_v60, %v2724_v24  ;;  %v7501_v60 = vld [vmem:[%s8027_s7 + $0x110] sm:$0xff] }
 0xae4   :  { %v4945_v33 = vpop.eup %4944  ;;  %v7527_v24 = vld [vmem:[%s8027_s7 + $0xf0] sm:$0xff] }
 0xae5   :  { %v2726_v15 = vadd.f32 %v2725_v26, %v2177_v23  ;;  %v2728_v17 = vsub.f32 1.0, %v4945_v33  ;;  %v2730_v31 = vmul.f32 %v4945_v33, %v7272_v19  ;;  %v7539_v23 = vld [vmem:[%s8027_s7 + $0xe0] sm:$0xff]  ;;  %v7546_v26 = vld [vmem:[%s8027_s7 + $0xd8] sm:$0xff]  ;;  %v7558_v33 = vld [vmem:[%s8027_s7 + $0xc8] sm:$0xff] }
 0xae7   :  { %4946 = vtanh.f32 %v2726_v15  ;;  %v7552_v15 = vld [vmem:[%s8027_s7 + $0xe8] sm:$0xff] }
 0xaf4   :  { %v4947_v8 = vpop.eup %4946 }
 0xaf5   :  { %v2729_v54 = vmul.f32 %v4947_v8, %v2728_v17  ;;  %v7565_v17 = vld [vmem:[%s8027_s7 + $0xc0] sm:$0xff]  ;;  %v7571_v8 = vld [vmem:[%s8027_s7 + $0xd0] sm:$0xff] }
 0xaf7   :  { %v7351_v52 = vadd.f32 %v2730_v31, %v2729_v54  ;;  %v7577_v54 = vld [vmem:[%s8027_s7 + $0xb0] sm:$0xff]  ;;  %v7584_v31 = vld [vmem:[%s8027_s7 + $0xa8] sm:$0xff] }
 0xaf9   :  { %8258 = vst [vmem:[#allocation42_spill] sm:$0xff] %v7351_v52  ;;  %2802 = vmatmul.mubr.f32.vlgmr.msra.gmra.mxu0 %v7351_v52  ;;  %4647 = vmatmul.mubr.f32.vlgmr.msra.gmra.mxu1 %v7351_v52 }
 0xafa   :  { %2906 = vmatpush1.msra.mxu0 %v6747_v51  ;;  %4650 = vmatpush3.msra.mxu1 %v6931_v22  ;;  %v8259_v51 = vld [vmem:[#allocation20_spill] sm:$0xff] }
 0xafb   :  { %2907 = vmatprep.subr.mxu0 %v6753_v11  ;;  %4651 = vmatprep.subr.mxu1 %v8136_v28  ;;  %v8260_v11 = vld [vmem:[#allocation15_spill] sm:$0xff] }
 0xafc   :  { %2908 = vmatpush1.msra.mxu0 %v6759_v50  ;;  %4652 = vmatpush3.msra.mxu1 %v6938_v30  ;;  %v8261_v50 = vld [vmem:[#allocation21_spill] sm:$0xff] }
 0xafd   :  { %2909 = vmatprep.subr.mxu0 %v6765_v62  ;;  %4653 = vmatprep.subr.mxu1 %v8136_v28  ;;  %v8262_v62 = vld [vmem:[#allocation28_spill] sm:$0xff] }
 0xafe   :  { %2910 = vmatpush1.msra.mxu0 %v6771_v0  ;;  %4654 = vmatpush3.msra.mxu1 %v6945_v3  ;;  %v8263_v0 = vld [vmem:[#allocation7_spill] sm:$0xff] }
 0xaff   :  { %2911 = vmatprep.subr.mxu0 %v6777_v1  ;;  %4655 = vmatprep.subr.mxu1 %v8136_v28  ;;  %v7423_v1 = vld [vmem:[%s8027_s7 + $0x170] sm:$0xff] }
 0xb00   :  { %2912 = vmatpush1.msra.mxu0 %v6783_v5  ;;  %4656 = vmatpush3.msra.mxu1 %v6953_v48  ;;  %8264 = vst [vmem:[#allocation16_spill] sm:$0xff] %v7423_v1  ;;  %v8265_v5 = vld [vmem:[#allocation11_spill] sm:$0xff] }
 0xb01   :  { %2913 = vmatprep.subr.mxu0 %v6789_v7  ;;  %4657 = vmatprep.subr.mxu1 %v8136_v28  ;;  %v8266_v7 = vld [vmem:[#allocation31_spill] sm:$0xff] }
 0xb02   :  { %2914 = vmatpush1.msra.mxu0 %v6795_v9  ;;  %4658 = vmatpush3.msra.mxu1 %v6960_v46  ;;  %v2072_v9 = vadd.f32 %v8266_v7, %v8265_v5  ;;  %v7622_v7 = vld [vmem:[%s8027_s7 + $0x78] sm:$0xff] }
 0xb03   :  { %2915 = vmatprep.subr.mxu0 %v6801_v12  ;;  %4659 = vmatprep.subr.mxu1 %v8136_v28 }
 0xb04   :  { %2916 = vmatpush1.msra.mxu0 %v6807_v14  ;;  %4660 = vmatpush3.msra.mxu1 %v6967_v40 }
 0xb05   :  { %2917 = vmatprep.subr.mxu0 %v6813_v2  ;;  %4661 = vmatprep.subr.mxu1 %v8136_v28 }
 0xb06   :  { %2918 = vmatpush1.msra.mxu0 %v6819_v32  ;;  %4662 = vmatpush3.msra.mxu1 %v6974_v20 }
 0xb07   :  { %2919 = vmatprep.subr.mxu0 %v6825_v6  ;;  %4663 = vmatprep.subr.mxu1 %v8136_v28 }
 0xb08   :  { %2920 = vmatpush1.msra.mxu0 %v6831_v13  ;;  %4664 = vmatpush3.msra.mxu1 %v6981_v38 }
 0xb09   :  { %2921 = vmatprep.subr.mxu0 %v6837_v37  ;;  %4665 = vmatprep.subr.mxu1 %v8136_v28  ;;  %v8267_v37 = vld [vmem:[#allocation32_spill] sm:$0xff] }
 0xb0a   :  { %2922 = vmatpush1.msra.mxu0 %v6843_v47  ;;  %4666 = vmatpush3.msra.mxu1 %v6988_v18  ;;  %v2074_v47 = vadd.f32 %v8267_v37, %v8244_v25  ;;  %v7672_v37 = vld [vmem:[%s8027_s7 + $0x38] sm:$0xff] }
 0xb0b   :  { %2923 = vmatprep.subr.mxu0 %v6849_v43  ;;  %4667 = vmatprep.subr.mxu1 %v8136_v28 }
 0xb0c   :  { %2924 = vmatpush1.msra.mxu0 %v6855_v57  ;;  %4668 = vmatpush3.msra.mxu1 %v6995_v4  ;;  %v7442_v4 = vld [vmem:[%s8027_s7 + $0x168] sm:$0xff] }
 0xb0d   :  { %2925 = vmatprep.subr.mxu0 %v6861_v59  ;;  %4669 = vmatprep.subr.mxu1 %v8136_v28 }
 0xb0e   :  { %2926 = vmatpush1.msra.mxu0 %v6867_v61  ;;  %4670 = vmatpush3.msra.mxu1 %v7002_v34  ;;  %v7449_v34 = vld [vmem:[%s8027_s7 + $0x158] sm:$0xff] }
 0xb0f   :  { %2927 = vmatprep.subr.mxu0 %v6873_v41  ;;  %4671 = vmatprep.subr.mxu1 %v8136_v28 }
 0xb10   :  { %2928 = vmatpush1.msra.mxu0 %v6879_v45  ;;  %4672 = vmatpush3.msra.mxu1 %v7009_v36  ;;  %v7456_v36 = vld [vmem:[%s8027_s7 + $0x150] sm:$0xff] }
 0xb11   :  { %2929 = vmatprep.subr.mxu0 %v6885_v49  ;;  %4673 = vmatprep.subr.mxu1 %v8136_v28 }
 0xb12   :  { %2930 = vmatpush1.msra.mxu0 %v6891_v58  ;;  %4674 = vmatpush3.msra.mxu1 %v7016_v42  ;;  %v7470_v42 = vld [vmem:[%s8027_s7 + $0x138] sm:$0xff] }
 0xb13   :  { %2931 = vmatprep.subr.mxu0 %v6897_v55  ;;  %4675 = vmatprep.subr.mxu1 %v8136_v28  ;;  %v8268_v55 = vld [vmem:[#allocation24_spill] sm:$0xff] }
 0xb14   :  { %2932 = vmatpush1.msra.mxu0 %v6903_v39  ;;  %4676 = vmatpush3.msra.mxu1 %v7023_v10  ;;  %v2182_v39 = vadd.f32 %v8268_v55, %v7190_v21  ;;  %v7482_v10 = vld [vmem:[%s8027_s7 + $0x128] sm:$0xff] }
 0xb15   :  { %2933 = vmatprep.subr.mxu0 %v6909_v44  ;;  %4677 = vmatprep.subr.mxu1 %v8136_v28 }
 0xb16   :  { %2934 = vmatpush1.msra.mxu0 %v8259_v51  ;;  %4678 = vmatpush3.msra.mxu1 %v8260_v11  ;;  %v7590_v51 = vld [vmem:[%s8027_s7 + $0xb8] sm:$0xff] }
 0xb17   :  { %2935 = vmatprep.subr.mxu0 %v8261_v50  ;;  %4679 = vmatprep.subr.mxu1 %v8136_v28  ;;  %v7596_v11 = vld [vmem:[%s8027_s7 + $0x98] sm:$0xff]  ;;  %v7603_v50 = vld [vmem:[%s8027_s7 + $0x90] sm:$0xff] }
 0xb18   :  { %2936 = vmatpush1.msra.mxu0 %v8262_v62  ;;  %2969 = vmatprep.mubr.f32.mxu0 %v8136_v28  ;;  %v7609_v62 = vld [vmem:[%s8027_s7 + $0xa0] sm:$0xff] }
 0xb19   :  { %4680 = vmatpush3.msra.mxu1 %v8263_v0  ;;  %4681 = vmatprep.mubr.msk.f32.mxu1 %vm5097_vm0, %v8136_v28  ;;  %v7615_v0 = vld [vmem:[%s8027_s7 + $0x80] sm:$0xff] }
 0xb1a   :  { %3073 = vmatprep.subr.mxu0 %v7423_v1  ;;  %4684 = vmatprep.subr.mxu1 %v8136_v28 }
 0xbb9   :  { %v2803_v12 = vpop.f32.mrf.mxu0  ;;  %v2874_v14 = vpop.f32.mrf.mxu1 }
 0xbba   :  { %v2878_v2 = vadd.f32 %v2803_v12, %v2072_v9  ;;  %v2892_v49 = vadd.f32 %v7185_v16, %v2874_v14  ;;  %v7628_v9 = vld [vmem:[%s8027_s7 + $0x88] sm:$0xff]  ;;  %v7641_v14 = vld [vmem:[%s8027_s7 + $0x60] sm:$0xff] }
 0xbbb   :  { %v4648_v32 = vpop.f32.mrf.mxu1  ;;  %v2805_v13 = vpop.f32.mrf.mxu0  ;;  %v7634_v12 = vld [vmem:[%s8027_s7 + $0x68] sm:$0xff] }
 0xbbc   :  { %v3762_v6 = vmul.f32 -1.442695, %v2878_v2  ;;  %v2885_v43 = vadd.f32 %v2805_v13, %v2074_v47  ;;  %v7647_v2 = vld [vmem:[%s8027_s7 + $0x70] sm:$0xff]  ;;  %v7666_v13 = vld [vmem:[%s8027_s7 + $0x58] sm:$0xff] }
 0xbbd   :  { %v7653_v32 = vld [vmem:[%s8027_s7 + $0x50] sm:$0xff] }
 0xbbe   :  { %4948 = vpow2.f32 %v3762_v6  ;;  %v3763_v57 = vmul.f32 -1.442695, %v2885_v43  ;;  %v7660_v6 = vld [vmem:[%s8027_s7 + $0x48] sm:$0xff]  ;;  %v7679_v47 = vld [vmem:[%s8027_s7 + $0x30] sm:$0xff]  ;;  %v7685_v43 = vld [vmem:[%s8027_s7 + $0x40] sm:$0xff] }
 0xbc0   :  { %4950 = vpow2.f32 %v3763_v57  ;;  %v7691_v57 = vld [vmem:[%s8027_s7 + $0x20] sm:$0xff] }
 0xbcb   :  { %v4949_v59 = vpop.eup %4948 }
 0xbcc   :  { %v2882_v61 = vadd.f32 1.0, %v4949_v59  ;;  %v7698_v59 = vld [vmem:[%s8027_s7 + $0x18] sm:$0xff] }
 0xbcd   :  { %v4951_v41 = vpop.eup %4950  ;;  %8270 = vst [vmem:[#allocation29_spill] sm:$0xff] %v7698_v59 }
 0xbce   :  { %4952 = vrcp.f32 %v2882_v61  ;;  %v2889_v45 = vadd.f32 1.0, %v4951_v41  ;;  %v7704_v61 = vld [vmem:[%s8027_s7 + $0x28] sm:$0xff] }
 0xbcf   :  { %8271 = vst [vmem:[#allocation22_spill] sm:$0xff] %v7704_v61  ;;  %v7710_v41 = vld [vmem:[%s8027_s7 + $0x8] sm:$0xff] }
 0xbd0   :  { %4954 = vrcp.f32 %v2889_v45  ;;  %8272 = vst [vmem:[#allocation23_spill] sm:$0xff] %v7710_v41  ;;  %v7717_v45 = vld [vmem:[%s8027_s7] sm:$0xff] }
 0xbd1   :  { %8273 = vst [vmem:[#allocation30_spill] sm:$0xff] %v7717_v45 }
 0xbdb   :  { %v4953_v58 = vpop.eup %4952 }
 0xbdc   :  { %v2893_v44 = vmul.f32 %v4953_v58, %v2892_v49  ;;  %v7724_v49 = vld [vmem:[%s8027_s7 + $0x10] sm:$0xff]  ;;  %v8275_v58 = vld [vmem:[#allocation13_spill] sm:$0xff] }
 0xbdd   :  { %v4955_v48 = vpop.eup %4954  ;;  %8274 = vst [vmem:[#allocation20_spill] sm:$0xff] %v7724_v49  ;;  %v2078_v55 = vadd.f32 %v8275_v58, %v8265_v5 }
 0xbde   :  { %v2894_v3 = vadd.f32 %v2893_v44, %v2182_v39  ;;  %v2896_v46 = vsub.f32 1.0, %v4955_v48  ;;  %v2898_v38 = vmul.f32 %v4955_v48, %v7351_v52 }
 0xbe0   :  { %4956 = vtanh.f32 %v2894_v3 }
 0xbed   :  { %v4957_v40 = vpop.eup %4956 }
 0xbee   :  { %v2897_v20 = vmul.f32 %v4957_v40, %v2896_v46 }
 0xbf0   :  { %v7435_v18 = vadd.f32 %v2898_v38, %v2897_v20  ;;  %v8276_v20 = vld [vmem:[#allocation14_spill] sm:$0xff] }
 0xbf1   :  { %v2080_v38 = vadd.f32 %v8276_v20, %v8244_v25 }
 0xbf2   :  { %8269 = vst [vmem:[#allocation6_spill] sm:$0xff] %v7435_v18  ;;  %2970 = vmatmul.mubr.f32.vlgmr.msra.gmra.mxu0 %v7435_v18  ;;  %4682 = vmatmul.mubr.f32.vlgmr.msra.gmra.mxu1 %v7435_v18 }
 0xbf3   :  { %3074 = vmatpush1.msra.mxu0 %v7442_v4  ;;  %4685 = vmatpush3.msra.mxu1 %v6931_v22  ;;  %v7463_v22 = vld [vmem:[%s8027_s7 + $0x140] sm:$0xff] }
 0xbf4   :  { %3075 = vmatprep.subr.mxu0 %v7449_v34  ;;  %4686 = vmatprep.subr.mxu1 %v8136_v28 }
 0xbf5   :  { %3076 = vmatpush1.msra.mxu0 %v7456_v36  ;;  %4687 = vmatpush3.msra.mxu1 %v6938_v30  ;;  %v7476_v30 = vld [vmem:[%s8027_s7 + $0x148] sm:$0xff] }
 0xbf6   :  { %3077 = vmatprep.subr.mxu0 %v7463_v22  ;;  %4688 = vmatprep.subr.mxu1 %v8136_v28 }
 0xbf7   :  { %3078 = vmatpush1.msra.mxu0 %v7470_v42  ;;  %4689 = vmatpush3.msra.mxu1 %v7476_v30 }
 0xbf8   :  { %3079 = vmatprep.subr.mxu0 %v7482_v10  ;;  %4690 = vmatprep.subr.mxu1 %v8136_v28 }
 0xbf9   :  { %3080 = vmatpush1.msra.mxu0 %v7489_v63  ;;  %4691 = vmatpush3.msra.mxu1 %v7495_v35 }
 0xbfa   :  { %3081 = vmatprep.subr.mxu0 %v7501_v60  ;;  %4692 = vmatprep.subr.mxu1 %v8136_v28 }
 0xbfb   :  { %3082 = vmatpush1.msra.mxu0 %v7508_v56  ;;  %4693 = vmatpush3.msra.mxu1 %v7514_v29 }
 0xbfc   :  { %3083 = vmatprep.subr.mxu0 %v7520_v27  ;;  %4694 = vmatprep.subr.mxu1 %v8136_v28 }
 0xbfd   :  { %3084 = vmatpush1.msra.mxu0 %v7527_v24  ;;  %4695 = vmatpush3.msra.mxu1 %v7533_v53 }
 0xbfe   :  { %3085 = vmatprep.subr.mxu0 %v7539_v23  ;;  %4696 = vmatprep.subr.mxu1 %v8136_v28 }
 0xbff   :  { %3086 = vmatpush1.msra.mxu0 %v7546_v26  ;;  %4697 = vmatpush3.msra.mxu1 %v7552_v15 }
 0xc00   :  { %3087 = vmatprep.subr.mxu0 %v7558_v33  ;;  %4698 = vmatprep.subr.mxu1 %v8136_v28 }
 0xc01   :  { %3088 = vmatpush1.msra.mxu0 %v7565_v17  ;;  %4699 = vmatpush3.msra.mxu1 %v7571_v8 }
 0xc02   :  { %3089 = vmatprep.subr.mxu0 %v7577_v54  ;;  %4700 = vmatprep.subr.mxu1 %v8136_v28 }
 0xc03   :  { %3090 = vmatpush1.msra.mxu0 %v7584_v31  ;;  %4701 = vmatpush3.msra.mxu1 %v7590_v51 }
 0xc04   :  { %3091 = vmatprep.subr.mxu0 %v7596_v11  ;;  %4702 = vmatprep.subr.mxu1 %v8136_v28 }
 0xc05   :  { %3092 = vmatpush1.msra.mxu0 %v7603_v50  ;;  %4703 = vmatpush3.msra.mxu1 %v7609_v62 }
 0xc06   :  { %3093 = vmatprep.subr.mxu0 %v7615_v0  ;;  %4704 = vmatprep.subr.mxu1 %v8136_v28 }
 0xc07   :  { %3094 = vmatpush1.msra.mxu0 %v7622_v7  ;;  %4705 = vmatpush3.msra.mxu1 %v7628_v9 }
 0xc08   :  { %3095 = vmatprep.subr.mxu0 %v7634_v12  ;;  %4706 = vmatprep.subr.mxu1 %v8136_v28 }
 0xc09   :  { %3096 = vmatpush1.msra.mxu0 %v7641_v14  ;;  %4707 = vmatpush3.msra.mxu1 %v7647_v2 }
 0xc0a   :  { %3097 = vmatprep.subr.mxu0 %v7653_v32  ;;  %4708 = vmatprep.subr.mxu1 %v8136_v28 }
 0xc0b   :  { %3098 = vmatpush1.msra.mxu0 %v7660_v6  ;;  %4709 = vmatpush3.msra.mxu1 %v7666_v13 }
 0xc0c   :  { %3099 = vmatprep.subr.mxu0 %v7672_v37  ;;  %4710 = vmatprep.subr.mxu1 %v8136_v28 }
 0xc0d   :  { %3100 = vmatpush1.msra.mxu0 %v7679_v47  ;;  %4711 = vmatpush3.msra.mxu1 %v7685_v43 }
 0xc0e   :  { %3101 = vmatprep.subr.mxu0 %v7691_v57  ;;  %4712 = vmatprep.subr.mxu1 %v8136_v28 }
 0xc0f   :  { %3102 = vmatpush1.msra.mxu0 %v7698_v59  ;;  %4713 = vmatpush3.msra.mxu1 %v7704_v61 }
 0xc10   :  { %3103 = vmatprep.subr.mxu0 %v7710_v41  ;;  %4714 = vmatprep.subr.mxu1 %v8136_v28 }
 0xc11   :  { %3104 = vmatpush1.msra.mxu0 %v7717_v45  ;;  %3137 = vmatprep.mubr.f32.mxu0 %v8136_v28 }
 0xc12   :  { %4715 = vmatpush3.msra.mxu1 %v7724_v49  ;;  %4716 = vmatprep.mubr.msk.f32.mxu1 %vm5097_vm0, %v8136_v28 }
 0xc13   :  { %3241 = vmatprep.subr.mxu0 %v7423_v1  ;;  %4719 = vmatprep.subr.mxu1 %v8136_v28 }
 0xcb2   :  { %v2971_v39 = vpop.f32.mrf.mxu0  ;;  %v3042_v44 = vpop.f32.mrf.mxu1 }
 0xcb3   :  { %v3046_v3 = vadd.f32 %v2971_v39, %v2078_v55  ;;  %v3060_v58 = vadd.f32 %v7185_v16, %v3042_v44  ;;  %v8277_v55 = vld [vmem:[#allocation36_spill] sm:$0xff] }
 0xcb4   :  { %v4683_v48 = vpop.f32.mrf.mxu1  ;;  %v2973_v40 = vpop.f32.mrf.mxu0  ;;  %v2187_v39 = vadd.f32 %v8277_v55, %v7190_v21  ;;  %v8280_v44 = vld [vmem:[#allocation20_spill] sm:$0xff]  ;;  %v8283_v55 = vld [vmem:[#allocation25_spill] sm:$0xff] }
 0xcb5   :  { %v3764_v46 = vmul.f32 -1.442695, %v3046_v3  ;;  %v3053_v52 = vadd.f32 %v2973_v40, %v2080_v38  ;;  %v8281_v38 = vld [vmem:[#allocation16_spill] sm:$0xff] }
 0xcb7   :  { %4958 = vpow2.f32 %v3764_v46  ;;  %v3765_v19 = vmul.f32 -1.442695, %v3053_v52 }
 0xcb9   :  { %4960 = vpow2.f32 %v3765_v19 }
 0xcc4   :  { %v4959_v49 = vpop.eup %4958 }
 0xcc5   :  { %v3050_v1 = vadd.f32 1.0, %v4959_v49 }
 0xcc6   :  { %v4961_v45 = vpop.eup %4960 }
 0xcc7   :  { %4962 = vrcp.f32 %v3050_v1  ;;  %v3057_v41 = vadd.f32 1.0, %v4961_v45  ;;  %v7747_v1 = vld [vmem:[%s8027_s7 + $0x178] sm:$0xff]  ;;  %v8279_v45 = vld [vmem:[#allocation30_spill] sm:$0xff] }
 0xcc9   :  { %4964 = vrcp.f32 %v3057_v41  ;;  %v8278_v41 = vld [vmem:[#allocation23_spill] sm:$0xff] }
 0xcd4   :  { %v4963_v5 = vpop.eup %4962 }
 0xcd5   :  { %v3061_v3 = vmul.f32 %v4963_v5, %v3060_v58  ;;  %v7756_v5 = vld [vmem:[%s8027_s7 + $0x160] sm:$0xff]  ;;  %v8282_v58 = vld [vmem:[#allocation11_spill] sm:$0xff] }
 0xcd6   :  { %v4965_v20 = vpop.eup %4964 }
 0xcd7   :  { %v3062_v48 = vadd.f32 %v3061_v3, %v2187_v39  ;;  %v3064_v46 = vsub.f32 1.0, %v4965_v20  ;;  %v3066_v19 = vmul.f32 %v4965_v20, %v7435_v18  ;;  %v2084_v39 = vadd.f32 %v8283_v55, %v8282_v58 }
 0xcd9   :  { %4966 = vtanh.f32 %v3062_v48 }
 0xce6   :  { %v4967_v40 = vpop.eup %4966 }
 0xce7   :  { %v3065_v52 = vmul.f32 %v4967_v40, %v3064_v46 }
 0xce9   :  { %v7739_v49 = vadd.f32 %v3066_v19, %v3065_v52  ;;  %v8284_v19 = vld [vmem:[#allocation33_spill] sm:$0xff] }
 0xcea   :  { %v2086_v18 = vadd.f32 %v8284_v19, %v8244_v25 }
 0xceb   :  { %3138 = vmatmul.mubr.f32.vlgmr.msra.gmra.mxu0 %v7739_v49  ;;  %4717 = vmatmul.mubr.f32.vlgmr.msra.gmra.mxu1 %v7739_v49 }
 0xcec   :  { %3242 = vmatpush1.msra.mxu0 %v7442_v4  ;;  %4720 = vmatpush3.msra.mxu1 %v7747_v1 }
 0xced   :  { %3243 = vmatprep.subr.mxu0 %v7449_v34  ;;  %4721 = vmatprep.subr.mxu1 %v8136_v28 }
 0xcee   :  { %3244 = vmatpush1.msra.mxu0 %v7456_v36  ;;  %4722 = vmatpush3.msra.mxu1 %v7756_v5 }
 0xcef   :  { %3245 = vmatprep.subr.mxu0 %v7463_v22  ;;  %4723 = vmatprep.subr.mxu1 %v8136_v28 }
 0xcf0   :  { %3246 = vmatpush1.msra.mxu0 %v7470_v42  ;;  %4724 = vmatpush3.msra.mxu1 %v7476_v30 }
 0xcf1   :  { %3247 = vmatprep.subr.mxu0 %v7482_v10  ;;  %4725 = vmatprep.subr.mxu1 %v8136_v28 }
 0xcf2   :  { %3248 = vmatpush1.msra.mxu0 %v7489_v63  ;;  %4726 = vmatpush3.msra.mxu1 %v7495_v35 }
 0xcf3   :  { %3249 = vmatprep.subr.mxu0 %v7501_v60  ;;  %4727 = vmatprep.subr.mxu1 %v8136_v28 }
 0xcf4   :  { %3250 = vmatpush1.msra.mxu0 %v7508_v56  ;;  %4728 = vmatpush3.msra.mxu1 %v7514_v29 }
 0xcf5   :  { %3251 = vmatprep.subr.mxu0 %v7520_v27  ;;  %4729 = vmatprep.subr.mxu1 %v8136_v28 }
 0xcf6   :  { %3252 = vmatpush1.msra.mxu0 %v7527_v24  ;;  %4730 = vmatpush3.msra.mxu1 %v7533_v53 }
 0xcf7   :  { %3253 = vmatprep.subr.mxu0 %v7539_v23  ;;  %4731 = vmatprep.subr.mxu1 %v8136_v28 }
 0xcf8   :  { %3254 = vmatpush1.msra.mxu0 %v7546_v26  ;;  %4732 = vmatpush3.msra.mxu1 %v7552_v15 }
 0xcf9   :  { %3255 = vmatprep.subr.mxu0 %v7558_v33  ;;  %4733 = vmatprep.subr.mxu1 %v8136_v28 }
 0xcfa   :  { %3256 = vmatpush1.msra.mxu0 %v7565_v17  ;;  %4734 = vmatpush3.msra.mxu1 %v7571_v8 }
 0xcfb   :  { %3257 = vmatprep.subr.mxu0 %v7577_v54  ;;  %4735 = vmatprep.subr.mxu1 %v8136_v28 }
 0xcfc   :  { %3258 = vmatpush1.msra.mxu0 %v7584_v31  ;;  %4736 = vmatpush3.msra.mxu1 %v7590_v51 }
 0xcfd   :  { %3259 = vmatprep.subr.mxu0 %v7596_v11  ;;  %4737 = vmatprep.subr.mxu1 %v8136_v28 }
 0xcfe   :  { %3260 = vmatpush1.msra.mxu0 %v7603_v50  ;;  %4738 = vmatpush3.msra.mxu1 %v7609_v62 }
 0xcff   :  { %3261 = vmatprep.subr.mxu0 %v7615_v0  ;;  %4739 = vmatprep.subr.mxu1 %v8136_v28 }
 0xd00   :  { %3262 = vmatpush1.msra.mxu0 %v7622_v7  ;;  %4740 = vmatpush3.msra.mxu1 %v7628_v9 }
 0xd01   :  { %3263 = vmatprep.subr.mxu0 %v7634_v12  ;;  %4741 = vmatprep.subr.mxu1 %v8136_v28 }
 0xd02   :  { %3264 = vmatpush1.msra.mxu0 %v7641_v14  ;;  %4742 = vmatpush3.msra.mxu1 %v7647_v2 }
 0xd03   :  { %3265 = vmatprep.subr.mxu0 %v7653_v32  ;;  %4743 = vmatprep.subr.mxu1 %v8136_v28 }
 0xd04   :  { %3266 = vmatpush1.msra.mxu0 %v7660_v6  ;;  %4744 = vmatpush3.msra.mxu1 %v7666_v13 }
 0xd05   :  { %3267 = vmatprep.subr.mxu0 %v7672_v37  ;;  %4745 = vmatprep.subr.mxu1 %v8136_v28 }
 0xd06   :  { %3268 = vmatpush1.msra.mxu0 %v7679_v47  ;;  %4746 = vmatpush3.msra.mxu1 %v7685_v43 }
 0xd07   :  { %3269 = vmatprep.subr.mxu0 %v7691_v57  ;;  %4747 = vmatprep.subr.mxu1 %v8136_v28 }
 0xd08   :  { %3270 = vmatpush1.msra.mxu0 %v7698_v59  ;;  %4748 = vmatpush3.msra.mxu1 %v7704_v61 }
 0xd09   :  { %3271 = vmatprep.subr.mxu0 %v8278_v41  ;;  %4749 = vmatprep.subr.mxu1 %v8136_v28 }
 0xd0a   :  { %3272 = vmatpush1.msra.mxu0 %v8279_v45  ;;  %3305 = vmatprep.mubr.f32.mxu0 %v8136_v28 }
 0xd0b   :  { %4750 = vmatpush3.msra.mxu1 %v8280_v44  ;;  %4751 = vmatprep.mubr.msk.f32.mxu1 %vm5097_vm0, %v8136_v28 }
 0xd0c   :  { %3409 = vmatprep.subr.mxu0 %v8281_v38  ;;  %4754 = vmatprep.subr.mxu1 %v8136_v28 }
 0xdab   :  { %v3139_v3 = vpop.f32.mrf.mxu0  ;;  %v3210_v48 = vpop.f32.mrf.mxu1 }
 0xdac   :  { %v3214_v20 = vadd.f32 %v3139_v3, %v2084_v39  ;;  %v3228_v55 = vadd.f32 %v7185_v16, %v3210_v48  ;;  %v8285_v39 = vld [vmem:[#allocation34_spill] sm:$0xff]  ;;  %v8286_v16 = vld [vmem:[#allocation29_spill] sm:$0xff]  ;;  %v3588_v48 = vld [vmem:[%s8030_s10 + $0x28] sm:$0xff] }
 0xdad   :  { %v4718_v46 = vpop.f32.mrf.mxu1  ;;  %v3141_v52 = vpop.f32.mrf.mxu0  ;;  %v2192_v3 = vadd.f32 %v8285_v39, %v7190_v21  ;;  %v3584_v39 = vld [vmem:[%s8030_s10 + $0x8] sm:$0xff] }
 0xdae   :  { %v3766_v40 = vmul.f32 -1.442695, %v3214_v20  ;;  %v3221_v44 = vadd.f32 %v3141_v52, %v2086_v18  ;;  %v3587_v52 = vld [vmem:[%s8030_s10 + $0x20] sm:$0xff] }
 0xdb0   :  { %4968 = vpow2.f32 %v3766_v40  ;;  %v3767_v45 = vmul.f32 -1.442695, %v3221_v44 }
 0xdb2   :  { %4970 = vpow2.f32 %v3767_v45 }
 0xdbd   :  { %v4969_v41 = vpop.eup %4968 }
 0xdbe   :  { %v3218_v38 = vadd.f32 1.0, %v4969_v41 }
 0xdbf   :  { %v4971_v61 = vpop.eup %4970 }
 0xdc0   :  { %4972 = vrcp.f32 %v3218_v38  ;;  %v3225_v59 = vadd.f32 1.0, %v4971_v61  ;;  %v3592_v61 = vld [vmem:[%s8030_s10 + $0x48] sm:$0xff]  ;;  %v3586_v38 = vld [vmem:[%s8030_s10 + $0x18] sm:$0xff] }
 0xdc2   :  { %4974 = vrcp.f32 %v3225_v59  ;;  %v3593_v59 = vld [vmem:[%s8030_s10 + $0x50] sm:$0xff] }
 0xdcd   :  { %v4973_v58 = vpop.eup %4972 }
 0xdce   :  { %v3229_v20 = vmul.f32 %v4973_v58, %v3228_v55  ;;  %v3589_v58 = vld [vmem:[%s8030_s10 + $0x30] sm:$0xff] }
 0xdcf   :  { %v4975_v19 = vpop.eup %4974  ;;  %v3585_v55 = vld [vmem:[%s8030_s10 + $0x10] sm:$0xff] }
 0xdd0   :  { %v3230_v46 = vadd.f32 %v3229_v20, %v2192_v3  ;;  %v3232_v40 = vsub.f32 1.0, %v4975_v19  ;;  %v3234_v45 = vmul.f32 %v4975_v19, %v7739_v49  ;;  %v3583_v3 = vld [vmem:[%s8030_s10] sm:$0xff]  ;;  %v8297_v20 = vld [vmem:[#allocation27_spill] sm:$0xff] }
 0xdd1   :  { %v8299_v19 = vld [vmem:[#allocation42_spill] sm:$0xff] }
 0xdd2   :  { %4976 = vtanh.f32 %v3230_v46 }
 0xddf   :  { %v4977_v18 = vpop.eup %4976 }
 0xde0   :  { %v3233_v44 = vmul.f32 %v4977_v18, %v3232_v40  ;;  %v8301_v18 = vld [vmem:[#allocation6_spill] sm:$0xff] }
 0xde2   :  { %v7828_v41 = vadd.f32 %v3234_v45, %v3233_v44 }
 0xde4   :  { %3306 = vmatmul.mubr.f32.vlgmr.msra.gmra.mxu0 %v7828_v41  ;;  %4752 = vmatmul.mubr.f32.vlgmr.msra.gmra.mxu1 %v7828_v41 }
 0xde5   :  { %3410 = vmatpush1.msra.mxu0 %v7442_v4  ;;  %4755 = vmatpush3.msra.mxu1 %v7747_v1  ;;  %v8287_v4 = vld [vmem:[#allocation22_spill] sm:$0xff] }
 0xde6   :  { %3411 = vmatprep.subr.mxu0 %v7449_v34  ;;  %4756 = vmatprep.subr.mxu1 %v8136_v28  ;;  %v8288_v34 = vld [vmem:[#allocation23_spill] sm:$0xff]  ;;  %v3591_v1 = vld [vmem:[%s8030_s10 + $0x40] sm:$0xff] }
 0xde7   :  { %3412 = vmatpush1.msra.mxu0 %v7456_v36  ;;  %4757 = vmatpush3.msra.mxu1 %v7756_v5  ;;  %v8289_v36 = vld [vmem:[#allocation30_spill] sm:$0xff]  ;;  %v3590_v5 = vld [vmem:[%s8030_s10 + $0x38] sm:$0xff] }
 0xde8   :  { %3413 = vmatprep.subr.mxu0 %v7463_v22  ;;  %4758 = vmatprep.subr.mxu1 %v8136_v28  ;;  %v8290_v22 = vld [vmem:[#allocation20_spill] sm:$0xff] }
 0xde9   :  { %3414 = vmatpush1.msra.mxu0 %v7470_v42  ;;  %4759 = vmatpush3.msra.mxu1 %v7476_v30  ;;  %v3598_v42 = vld [vmem:[%s8030_s10 + $0x78] sm:$0xff]  ;;  %v8291_v30 = vld [vmem:[#allocation11_spill] sm:$0xff] }
 0xdea   :  { %3415 = vmatprep.subr.mxu0 %v7482_v10  ;;  %4760 = vmatprep.subr.mxu1 %v8136_v28  ;;  %v8292_v10 = vld [vmem:[#allocation35_spill] sm:$0xff] }
 0xdeb   :  { %3416 = vmatpush1.msra.mxu0 %v7489_v63  ;;  %4761 = vmatpush3.msra.mxu1 %v7495_v35  ;;  %v2090_v63 = vadd.f32 %v8292_v10, %v8291_v30 }
 0xdec   :  { %3417 = vmatprep.subr.mxu0 %v7501_v60  ;;  %4762 = vmatprep.subr.mxu1 %v8136_v28 }
 0xded   :  { %3418 = vmatpush1.msra.mxu0 %v7508_v56  ;;  %4763 = vmatpush3.msra.mxu1 %v7514_v29 }
 0xdee   :  { %3419 = vmatprep.subr.mxu0 %v7520_v27  ;;  %4764 = vmatprep.subr.mxu1 %v8136_v28 }
 0xdef   :  { %3420 = vmatpush1.msra.mxu0 %v7527_v24  ;;  %4765 = vmatpush3.msra.mxu1 %v7533_v53  ;;  %v8293_v53 = vld [vmem:[#allocation37_spill] sm:$0xff] }
 0xdf0   :  { %3421 = vmatprep.subr.mxu0 %v7539_v23  ;;  %4766 = vmatprep.subr.mxu1 %v8136_v28  ;;  %v2092_v23 = vadd.f32 %v8293_v53, %v8244_v25 }
 0xdf1   :  { %3422 = vmatpush1.msra.mxu0 %v7546_v26  ;;  %4767 = vmatpush3.msra.mxu1 %v7552_v15 }
 0xdf2   :  { %3423 = vmatprep.subr.mxu0 %v7558_v33  ;;  %4768 = vmatprep.subr.mxu1 %v8136_v28 }
 0xdf3   :  { %3424 = vmatpush1.msra.mxu0 %v7565_v17  ;;  %4769 = vmatpush3.msra.mxu1 %v7571_v8 }
 0xdf4   :  { %3425 = vmatprep.subr.mxu0 %v7577_v54  ;;  %4770 = vmatprep.subr.mxu1 %v8136_v28  ;;  %v7907_v54 = vld [vmem:[%s8029_s9] ss:$0 sm:$0xff] }
 0xdf5   :  { %3426 = vmatpush1.msra.mxu0 %v7584_v31  ;;  %4771 = vmatpush3.msra.mxu1 %v7590_v51 }
 0xdf6   :  { %3427 = vmatprep.subr.mxu0 %v7596_v11  ;;  %4772 = vmatprep.subr.mxu1 %v8136_v28  ;;  %v8294_v11 = vld [vmem:[#allocation41_spill] sm:$0xff] }
 0xdf7   :  { %3428 = vmatpush1.msra.mxu0 %v7603_v50  ;;  %4773 = vmatpush3.msra.mxu1 %v7609_v62  ;;  %v2197_v50 = vadd.f32 %v8294_v11, %v7190_v21 }
 0xdf8   :  { %3429 = vmatprep.subr.mxu0 %v7615_v0  ;;  %4774 = vmatprep.subr.mxu1 %v8136_v28 }
 0xdf9   :  { %3430 = vmatpush1.msra.mxu0 %v7622_v7  ;;  %4775 = vmatpush3.msra.mxu1 %v7628_v9 }
 0xdfa   :  { %3431 = vmatprep.subr.mxu0 %v7634_v12  ;;  %4776 = vmatprep.subr.mxu1 %v8136_v28 }
 0xdfb   :  { %3432 = vmatpush1.msra.mxu0 %v7641_v14  ;;  %4777 = vmatpush3.msra.mxu1 %v7647_v2 }
 0xdfc   :  { %3433 = vmatprep.subr.mxu0 %v7653_v32  ;;  %4778 = vmatprep.subr.mxu1 %v8136_v28 }
 0xdfd   :  { %3434 = vmatpush1.msra.mxu0 %v7660_v6  ;;  %4779 = vmatpush3.msra.mxu1 %v7666_v13  ;;  %v3597_v6 = vld [vmem:[%s8030_s10 + $0x70] sm:$0xff]  ;;  %v8295_v13 = vld [vmem:[#allocation43_spill] sm:$0xff] }
 0xdfe   :  { %3435 = vmatprep.subr.mxu0 %v7672_v37  ;;  %4780 = vmatprep.subr.mxu1 %v8136_v28 }
 0xdff   :  { %3436 = vmatpush1.msra.mxu0 %v7679_v47  ;;  %4781 = vmatpush3.msra.mxu1 %v7685_v43  ;;  %v3596_v47 = vld [vmem:[%s8030_s10 + $0x68] sm:$0xff]  ;;  %v3595_v43 = vld [vmem:[%s8030_s10 + $0x60] sm:$0xff] }
 0xe00   :  { %3437 = vmatprep.subr.mxu0 %v7691_v57  ;;  %4782 = vmatprep.subr.mxu1 %v8136_v28  ;;  %v3594_v57 = vld [vmem:[%s8030_s10 + $0x58] sm:$0xff] }
 0xe01   :  { %3438 = vmatpush1.msra.mxu0 %v8286_v16  ;;  %4783 = vmatpush3.msra.mxu1 %v8287_v4 }
 0xe02   :  { %3439 = vmatprep.subr.mxu0 %v8288_v34  ;;  %4784 = vmatprep.subr.mxu1 %v8136_v28  ;;  %v8306_v34 = vld [vmem:[#allocation38_spill] sm:$0xff] }
 0xe03   :  { %3440 = vmatpush1.msra.mxu0 %v8289_v36  ;;  %3473 = vmatprep.mubr.f32.mxu0 %v8136_v28  ;;  %v2096_v36 = vadd.f32 %v8306_v34, %v8291_v30  ;;  %v3772_v30 = vld [vmem:[%s8031_s11] ss:$0 sm:$0xff] }
 0xe04   :  { %4785 = vmatpush3.msra.mxu1 %v8290_v22  ;;  %4786 = vmatprep.mubr.msk.f32.mxu1 %vm5097_vm0, %v8136_v28 }
 0xe05   :  { %4789 = vmatprep.subr.mxu0 %v3598_v42 }
 0xea4   :  { %v3307_v35 = vpop.f32.mrf.mxu0  ;;  %v3378_v60 = vpop.f32.mrf.mxu1 }
 0xea5   :  { %v3382_v56 = vadd.f32 %v3307_v35, %v2090_v63  ;;  %v3396_v31 = vadd.f32 %v7907_v54, %v3378_v60 }
 0xea6   :  { %v4753_v29 = vpop.f32.mrf.mxu1  ;;  %v3309_v24 = vpop.f32.mrf.mxu0 }
 0xea7   :  { %v3768_v27 = vmul.f32 -1.442695, %v3382_v56  ;;  %v3389_v26 = vadd.f32 %v3309_v24, %v2092_v23  ;;  %v8307_v56 = vld [vmem:[#allocation40_spill] sm:$0xff] }
 0xea9   :  { %4978 = vpow2.f32 %v3768_v27  ;;  %v3769_v28 = vmul.f32 -1.442695, %v3389_v26 }
 0xeab   :  { %4980 = vpow2.f32 %v3769_v28 }
 0xeb6   :  { %v4979_v15 = vpop.eup %4978 }
 0xeb7   :  { %v3386_v33 = vadd.f32 1.0, %v4979_v15 }
 0xeb8   :  { %v4981_v17 = vpop.eup %4980 }
 0xeb9   :  { %4982 = vrcp.f32 %v3386_v33  ;;  %v3393_v8 = vadd.f32 1.0, %v4981_v17 }
 0xebb   :  { %4984 = vrcp.f32 %v3393_v8 }
 0xec6   :  { %v4983_v51 = vpop.eup %4982 }
 0xec7   :  { %v3397_v62 = vmul.f32 %v4983_v51, %v3396_v31 }
 0xec8   :  { %v4985_v7 = vpop.eup %4984 }
 0xec9   :  { %v3398_v0 = vadd.f32 %v3397_v62, %v2197_v50  ;;  %v3400_v9 = vsub.f32 1.0, %v4985_v7  ;;  %v3402_v2 = vmul.f32 %v4985_v7, %v7828_v41 }
 0xecb   :  { %4986 = vtanh.f32 %v3398_v0 }
 0xed8   :  { %v4987_v12 = vpop.eup %4986 }
 0xed9   :  { %v3401_v14 = vmul.f32 %v4987_v12, %v3400_v9 }
 0xedb   :  { %v7913_v32 = vadd.f32 %v3402_v2, %v3401_v14 }
 0xedd   :  { %3474 = vmatmul.mubr.f32.vlgmr.msra.gmra.mxu0 %v7913_v32  ;;  %4787 = vmatmul.mubr.f32.vlgmr.msra.gmra.mxu1 %v7913_v32 }
 0xede   :  { %4790 = vmatpush3.msra.mxu0 %v3598_v42  ;;  %4821 = vmatprep.mubr.msk.f32.mxu0 %vm595_vm9, %v8295_v13 }
 0xedf   :  { %4791 = vmatprep.subr.mxu0 %v3597_v6 }
 0xee0   :  { %4792 = vmatpush3.msra.mxu0 %v3597_v6 }
 0xee1   :  { %4793 = vmatprep.subr.mxu0 %v3596_v47 }
 0xee2   :  { %4794 = vmatpush3.msra.mxu0 %v3596_v47 }
 0xee3   :  { %4795 = vmatprep.subr.mxu0 %v3595_v43 }
 0xee4   :  { %4796 = vmatpush3.msra.mxu0 %v3595_v43 }
 0xee5   :  { %4797 = vmatprep.subr.mxu0 %v3594_v57 }
 0xee6   :  { %4798 = vmatpush3.msra.mxu0 %v3594_v57 }
 0xee7   :  { %4799 = vmatprep.subr.mxu0 %v3593_v59 }
 0xee8   :  { %4800 = vmatpush3.msra.mxu0 %v3593_v59 }
 0xee9   :  { %4801 = vmatprep.subr.mxu0 %v3592_v61 }
 0xeea   :  { %4802 = vmatpush3.msra.mxu0 %v3592_v61 }
 0xeeb   :  { %4803 = vmatprep.subr.mxu0 %v3591_v1 }
 0xeec   :  { %4804 = vmatpush3.msra.mxu0 %v3591_v1 }
 0xeed   :  { %4805 = vmatprep.subr.mxu0 %v3590_v5 }
 0xeee   :  { %4806 = vmatpush3.msra.mxu0 %v3590_v5 }
 0xeef   :  { %4807 = vmatprep.subr.mxu0 %v3589_v58 }
 0xef0   :  { %4808 = vmatpush3.msra.mxu0 %v3589_v58 }
 0xef1   :  { %4809 = vmatprep.subr.mxu0 %v3588_v48 }
 0xef2   :  { %4810 = vmatpush3.msra.mxu0 %v3588_v48 }
 0xef3   :  { %4811 = vmatprep.subr.mxu0 %v3587_v52 }
 0xef4   :  { %4812 = vmatpush3.msra.mxu0 %v3587_v52 }
 0xef5   :  { %4813 = vmatprep.subr.mxu0 %v3586_v38 }
 0xef6   :  { %4814 = vmatpush3.msra.mxu0 %v3586_v38 }
 0xef7   :  { %4815 = vmatprep.subr.mxu0 %v3585_v55 }
 0xef8   :  { %4816 = vmatpush3.msra.mxu0 %v3585_v55 }
 0xef9   :  { %4817 = vmatprep.subr.mxu0 %v3584_v39 }
 0xefa   :  { %4818 = vmatpush3.msra.mxu0 %v3584_v39 }
 0xefb   :  { %4819 = vmatprep.subr.mxu0 %v3583_v3 }
 0xefc   :  { %4820 = vmatpush3.msra.mxu0 %v3583_v3 }
 0xefd   :  { %4822 = vmatmul.mubr.msk.f32.vlgmr.msra.gmra.mxu0 %vm774_vm10, %v8297_v20 }
 0xefe   :  { %4824 = vmatprep.mubr.msk.f32.mxu0 %vm954_vm11, %v8299_v19 }
 0xf01   :  { %4825 = vmatmul.mubr.msk.f32.gmra.mxu0 %vm1134_vm12, %v8301_v18 }
 0xf02   :  { %4827 = vmatprep.mubr.msk.f32.mxu0 %vm1314_vm13, %v7739_v49  ;;  %v2098_v49 = vadd.f32 %v8307_v56, %v8244_v25  ;;  %v8308_v25 = vld [vmem:[#allocation39_spill] sm:$0xff] }
 0xf03   :  { %v2202_v8 = vadd.f32 %v8308_v25, %v7190_v21 }
 0xf05   :  { %4828 = vmatmul.mubr.msk.f32.gmra.mxu0 %vm1494_vm14, %v7828_v41 }
 0xf06   :  { %4830 = vmatprep.mubr.msk.f32.mxu0 %vm1674_vm15, %v7913_v32 }
 0xf9d   :  { %v3475_v22 = vpop.f32.mrf.mxu0  ;;  %v3546_v42 = vpop.f32.mrf.mxu1 }
 0xf9e   :  { %v3550_v10 = vadd.f32 %v3475_v22, %v2096_v36  ;;  %v3564_v28 = vadd.f32 %v7907_v54, %v3546_v42 }
 0xf9f   :  { %v4788_v63 = vpop.f32.mrf.mxu1  ;;  %v3477_v60 = vpop.f32.mrf.mxu0 }
 0xfa0   :  { %v3770_v35 = vmul.f32 -1.442695, %v3550_v10  ;;  %v3557_v29 = vadd.f32 %v3477_v60, %v2098_v49 }
 0xfa2   :  { %4988 = vpow2.f32 %v3770_v35  ;;  %v3771_v27 = vmul.f32 -1.442695, %v3557_v29 }
 0xfa4   :  { %4990 = vpow2.f32 %v3771_v27 }
 0xfaf   :  { %v4989_v41 = vpop.eup %4988 }
 0xfb0   :  { %v3554_v24 = vadd.f32 1.0, %v4989_v41 }
 0xfb1   :  { %v4991_v53 = vpop.eup %4990 }
 0xfb2   :  { %4992 = vrcp.f32 %v3554_v24  ;;  %v3561_v23 = vadd.f32 1.0, %v4991_v53 }
 0xfb4   :  { %4994 = vrcp.f32 %v3561_v23 }
 0xfbd   :  { %v4823_v26 = vpop.f32.mrf.mxu0 }
 0xfbe   :  { %v3678_v15 = vadd.f32 %v4823_v26, %v3772_v30 }
 0xfbf   :  { %v4993_v33 = vpop.eup %4992  ;;  %v3672_v17 = vpop.f32.mrf.mxu0 }
 0xfc0   :  { %v3565_v31 = vmul.f32 %v4993_v33, %v3564_v28  ;;  %3712 = vst [vmem:[%s8032_s12 + $0x8] sm:$0xff] %v3678_v15  ;;  %v3673_v51 = vadd.f32 %v3772_v30, %v3672_v17 }
 0xfc1   :  { %v4826_v11 = vpop.f32.mrf.mxu0  ;;  %v4995_v14 = vpop.eup %4994 }
 0xfc2   :  { %v3566_v50 = vadd.f32 %v3565_v31, %v2202_v8  ;;  %3711 = vst [vmem:[%s8032_s12] sm:$0xff] %v3673_v51  ;;  %v3688_v54 = vadd.f32 %v4826_v11, %v3772_v30  ;;  %v3568_v2 = vsub.f32 1.0, %v4995_v14  ;;  %v3570_v37 = vmul.f32 %v4995_v14, %v7913_v32 }
 0xfc3   :  { %v3682_v62 = vpop.f32.mrf.mxu0 }
 0xfc4   :  { %4996 = vtanh.f32 %v3566_v50  ;;  %3714 = vst [vmem:[%s8032_s12 + $0x18] sm:$0xff] %v3688_v54  ;;  %v3683_v21 = vadd.f32 %v3772_v30, %v3682_v62 }
 0xfc5   :  { %v4829_v0 = vpop.f32.mrf.mxu0 }
 0xfc6   :  { %3713 = vst [vmem:[%s8032_s12 + $0x10] sm:$0xff] %v3683_v21  ;;  %v3698_v7 = vadd.f32 %v4829_v0, %v3772_v30 }
 0xfc7   :  { %v3692_v9 = vpop.f32.mrf.mxu0 }
 0xfc8   :  { %3716 = vst [vmem:[%s8032_s12 + $0x28] sm:$0xff] %v3698_v7  ;;  %v3693_v12 = vadd.f32 %v3772_v30, %v3692_v9 }
 0xfca   :  { %3715 = vst [vmem:[%s8032_s12 + $0x20] sm:$0xff] %v3693_v12 }
 0xfd1   :  { %v4997_v6 = vpop.eup %4996 }
 0xfd2   :  { %v3569_v13 = vmul.f32 %v4997_v6, %v3568_v2 }
 0xfd4   :  { %v3571_v47 = vadd.f32 %v3570_v37, %v3569_v13 }
 0xfd6   :  { %4831 = vmatmul.mubr.msk.f32.gmra.mxu0 %vm1854_vm1, %v3571_v47 }
0x1096   :  { %v4832_v57 = vpop.f32.mrf.mxu0 }
0x1097   :  { %v3708_v59 = vadd.f32 %v4832_v57, %v3772_v30 }
0x1098   :  { %v3702_v61 = vpop.f32.mrf.mxu0 }
0x1099   :  { %3718 = vst [vmem:[%s8032_s12 + $0x38] sm:$0xff] %v3708_v59  ;;  %v3703_v1 = vadd.f32 %v3772_v30, %v3702_v61 }
0x109b   :  { %3717 = vst [vmem:[%s8032_s12 + $0x30] sm:$0xff] %v3703_v1 }

</bundles_post_ra>
